<compile_context>
chip_gen: v6e
topology: v6e:2x2x1
jax: 0.10.0
libtpu: 0.0.40
codegen_flags: <defaults>
</compile_context>

<pallas_src>
import functools

import jax
import jax.numpy as jnp
from jax import lax
from jax.experimental import pallas as pl
from jax.experimental.pallas import tpu as pltpu

BN_EPS = 1e-5


def _round_up(x, m):
    return ((x + m - 1) // m) * m


# ----------------------------------------------------------------------------
# Pallas kernel
# ----------------------------------------------------------------------------
def _decoder_block_kernel(Bblk, Cr, Wp, WIDEpad,
                          x_ref, masks_ref, w1_ref, w3_ref, hd_ref, cvec_ref,
                          o_ref):
    # ---- shared (per grid step) constants ------------------------------------
    m_int = masks_ref[0:1, :]            # original-pixel interior mask   (1, Spad)
    m_ring = masks_ref[1:2, :]           # conv1 output extent (dw zero pad outside)
    mv = masks_ref[2:3, :WIDEpad]        # valid output lanes, pre-scaled by 1/(H*W)

    c1 = hd_ref[:, 0:1]                  # bn1_s * (W1 @ bn0_t)
    c0 = hd_ref[:, 1:2]                  # bn1_s * b1 + bn1_t
    c2 = hd_ref[:, 2:3]                  # bn2_s * b2 + bn2_t
    wdw = hd_ref[:, 3:28]                # (Hd, 25) BN2-scaled depthwise taps
    c3 = cvec_ref[:, 0:1]                # bn3_t
    wfc1t = cvec_ref[:, 1:1 + Cr]        # fc1.weight.T   (Cout, Cr)
    wfc2 = cvec_ref[:, 1 + Cr:1 + 2 * Cr]  # fc2.weight    (Cout, Cr)
    w1 = w1_ref[...]                     # (Hd, Cin)  = bn1_s * W1 * bn0_s
    w3 = w3_ref[...]                     # (Cout, Hd) = bn3_s * W3

    # Lane-dependent bias of the folded BN0/conv1/BN1 chain (hoisted once).
    bias1 = c1 * m_int + c0              # (Hd, Spad)

    # ---- statically unrolled loop over the Bblk images of this block ---------
    for i in range(Bblk):
        x = x_ref[i]                                                     # (Cin, Spad)

        # 1x1 conv (padding=1 ring falls out of the zero-masked input) + folded
        # BN0/BN1/bias, SiLU, then zero the depthwise conv's own padding ring.
        h1 = jnp.dot(w1, x, preferred_element_type=jnp.float32) + bias1
        h1 = (h1 * jax.nn.sigmoid(h1)) * m_ring                          # (Hd, Spad)

        # Depthwise 5x5 conv: 25 static lane-shifted taps of the flat canvas.
        acc = h1[:, 0:WIDEpad] * wdw[:, 0:1]
        for k in range(1, 25):
            off = (k // 5) * Wp + (k % 5)                                # all < 128
            acc = acc + h1[:, off:off + WIDEpad] * wdw[:, k:k + 1]

        h2 = acc + c2
        h2 = h2 * jax.nn.sigmoid(h2)                                     # (Hd, WIDEpad)

        # 1x1 conv to out_channels (stride == 1) with BN3 folded in.
        h4 = jnp.dot(w3, h2, preferred_element_type=jnp.float32) + c3    # (Cout, WIDEpad)

        # Squeeze-Excite (masked mean; mv already carries the 1/(H*W) scale).
        y = jnp.sum(h4 * mv, axis=1, keepdims=True)                      # (Cout, 1)
        t1 = jnp.maximum(jnp.sum(wfc1t * y, axis=0, keepdims=True), 0.0)  # (1, Cr)
        y2 = jax.nn.sigmoid(jnp.sum(wfc2 * t1, axis=1, keepdims=True))   # (Cout, 1)

        o_ref[i] = (h4 * y2).astype(o_ref.dtype)                         # dense store


# ----------------------------------------------------------------------------
# Wrapper (glue)
# ----------------------------------------------------------------------------
def decoder_conv_se_block(x_nchw, kparams, *, upsample=False, stride=1, bblk=None):
    # TODO(synk): stride > 1 (strided subsample of the final 1x1 conv) not implemented.
    assert stride == 1, "only stride=1 implemented in the Pallas kernel"
    if upsample:  # UpsamplingNearest2d(scale_factor=2) -- pure data movement (glue)
        x_nchw = jnp.repeat(jnp.repeat(x_nchw, 2, axis=2), 2, axis=3)

    B, Cin, H, W = x_nchw.shape
    Cout = kparams['w3p'].shape[0]
    Cr = (kparams['cvec'].shape[1] - 1) // 2
    assert kparams['hd_pack'].shape[1] == 28

    Hp, Wp = H + 4, W + 4
    WIDE = H * Wp                                    # wide (row-stride Wp) valid width
    WIDEpad = _round_up(WIDE, 128)                   # lane-dense output width
    # Canvas lanes: must hold the padded canvas AND the largest tap read
    # (WIDEpad + 4*Wp + 4).  VMEM value slicing has no OOB check -- keep this.
    Spad = _round_up(max(Hp * Wp, WIDEpad + 4 * Wp + 4), 128)

    # Images per grid step: amortize per-step overhead, keep >= 2 grid steps.
    if bblk is None:
        bblk = max(1, min(8, B // 2)) if B >= 2 else 1
    G = pl.cdiv(B, bblk)
    Bp = G * bblk                                    # batch padded to a block multiple

    # Embed each image in the (Hp, Wp) canvas, flatten with row stride Wp, pad lanes.
    xc = jnp.pad(x_nchw, ((0, Bp - B), (0, 0), (2, 2), (2, 2)))
    xc = xc.reshape(Bp, Cin, Hp * Wp)
    xc = jnp.pad(xc, ((0, 0), (0, 0), (0, Spad - Hp * Wp)))

    # One consolidated mask slab (3, Spad), flat-canvas coordinates.
    p = jnp.arange(Spad)
    r, c = p // Wp, p % Wp
    in_canvas = p < Hp * Wp
    m_int = (in_canvas & (r >= 2) & (r < H + 2)
             & (c >= 2) & (c < W + 2)).astype(jnp.float32)           # original pixels
    m_ring = (in_canvas & (r >= 1) & (r < H + 3)
              & (c >= 1) & (c < W + 3)).astype(jnp.float32)          # conv1 output extent
    m_valid = ((p < WIDE) & (c < W)).astype(jnp.float32) * (1.0 / float(H * W))
    masks = jnp.stack([m_int, m_ring, m_valid], axis=0)

    kernel = functools.partial(_decoder_block_kernel, bblk, Cr, Wp, WIDEpad)

    def full_spec(a):
        nd = a.ndim
        return pl.BlockSpec(a.shape, lambda g, _nd=nd: (0,) * _nd)

    in_specs = [pl.BlockSpec((bblk, Cin, Spad), lambda g: (g, 0, 0)),
                full_spec(masks),
                full_spec(kparams['w1p']),
                full_spec(kparams['w3p']),
                full_spec(kparams['hd_pack']),
                full_spec(kparams['cvec'])]

    out_wide = pl.pallas_call(
        kernel,
        out_shape=jax.ShapeDtypeStruct((Bp, Cout, WIDEpad), jnp.float32),
        grid=(G,),
        in_specs=in_specs,
        out_specs=pl.BlockSpec((bblk, Cout, WIDEpad), lambda g: (g, 0, 0)),
        compiler_params=pltpu.CompilerParams(
            dimension_semantics=("parallel",),       # batch blocks are independent
            vmem_limit_bytes=32 * 1024 * 1024),      # small footprint, safe on 64MiB parts
    )(xc, masks, kparams['w1p'], kparams['w3p'], kparams['hd_pack'], kparams['cvec'])

    # Drop the pad batch rows, the pad lanes and the Wp-W junk columns (cheap XLA glue).
    return out_wide[:B, :, :WIDE].reshape(B, Cout, H, Wp)[:, :, :, :W]


# ----------------------------------------------------------------------------
# Parameter construction & folding
# ----------------------------------------------------------------------------
def spectral_normalize(w, key, n_iter=1, eps=1e-12):
    """PyTorch spectral_norm forward semantics: one power iteration, W / sigma."""
    out_ch = w.shape[0]
    w_mat = w.reshape(out_ch, -1)
    u = jax.random.normal(key, (out_ch,), dtype=w.dtype)
    u = u / (jnp.linalg.norm(u) + eps)
    v = None
    for _ in range(n_iter):
        v = w_mat.T @ u
        v = v / (jnp.linalg.norm(v) + eps)
        u = w_mat @ v
        u = u / (jnp.linalg.norm(u) + eps)
    sigma = u @ (w_mat @ v)
    return w / sigma


def make_params(key, Cin, Cout, ex=6, reduction=8):
    Hd = Cin * ex
    Cr = Cout // reduction
    keys = jax.random.split(key, 16)

    def bn(k, ch):
        k1, k2, k3, k4 = jax.random.split(k, 4)
        return dict(gamma=1.0 + 0.1 * jax.random.normal(k1, (ch,), jnp.float32),
                    beta=0.1 * jax.random.normal(k2, (ch,), jnp.float32),
                    mean=0.1 * jax.random.normal(k3, (ch,), jnp.float32),
                    var=1.0 + 0.1 * jax.random.uniform(k4, (ch,), jnp.float32))

    bn0 = bn(keys[0], Cin)
    w1 = jax.random.normal(keys[1], (Hd, Cin, 1, 1), jnp.float32) / jnp.sqrt(float(Cin))
    w1 = spectral_normalize(w1, keys[2])
    b1 = 0.1 * jax.random.normal(keys[3], (Hd,), jnp.float32)
    bn1 = bn(keys[4], Hd)

    w2 = jax.random.normal(keys[5], (Hd, 1, 5, 5), jnp.float32) / 5.0
    w2 = spectral_normalize(w2, keys[6])
    b2 = 0.1 * jax.random.normal(keys[7], (Hd,), jnp.float32)
    bn2 = bn(keys[8], Hd)

    w3 = jax.random.normal(keys[9], (Cout, Hd, 1, 1), jnp.float32) / jnp.sqrt(float(Hd))
    bn3 = bn(keys[10], Cout)

    wfc1 = jax.random.normal(keys[11], (Cr, Cout), jnp.float32) / jnp.sqrt(float(Cout))
    wfc2 = jax.random.normal(keys[12], (Cout, Cr), jnp.float32) / jnp.sqrt(float(max(Cr, 1)))

    return dict(bn0=bn0, bn1=bn1, bn2=bn2, bn3=bn3,
                w1=w1, b1=b1, w2=w2, b2=b2, w3=w3, wfc1=wfc1, wfc2=wfc2)


def fold_params(raw):
    """Fold eval-mode BN affines and conv biases into the weights (wrapper-side)."""
    def bn_st(pr):
        s = pr['gamma'] / jnp.sqrt(pr['var'] + BN_EPS)
        t = pr['beta'] - pr['mean'] * s
        return s, t

    s0, t0 = bn_st(raw['bn0'])
    s1, t1 = bn_st(raw['bn1'])
    s2, t2 = bn_st(raw['bn2'])
    s3, t3 = bn_st(raw['bn3'])

    w1 = raw['w1'][:, :, 0, 0]                              # (Hd, Cin)
    Hd = w1.shape[0]
    w1p = s1[:, None] * w1 * s0[None, :]
    c1 = s1 * (w1 @ t0)
    c0 = s1 * raw['b1'] + t1

    wdwp = s2[:, None] * raw['w2'][:, 0, :, :].reshape(Hd, 25)
    c2 = s2 * raw['b2'] + t2

    w3p = s3[:, None] * raw['w3'][:, :, 0, 0]               # (Cout, Hd)
    c3 = t3

    hd_pack = jnp.concatenate([c1[:, None], c0[:, None], c2[:, None], wdwp], axis=1)  # (Hd, 28)
    cvec = jnp.concatenate([c3[:, None], jnp.transpose(raw['wfc1']), raw['wfc2']],
                           axis=1)                                                     # (Cout, 1+2Cr)
    return dict(w1p=w1p, w3p=w3p, hd_pack=hd_pack, cvec=cvec)


# ----------------------------------------------------------------------------
# Pure-JAX reference (for verification)
# ----------------------------------------------------------------------------
def reference_forward(x, raw, *, upsample=False, stride=1):
    if upsample:
        x = jnp.repeat(jnp.repeat(x, 2, axis=2), 2, axis=3)

    def bn(h, pr):
        return ((h - pr['mean'][None, :, None, None])
                / jnp.sqrt(pr['var'] + BN_EPS)[None, :, None, None]
                * pr['gamma'][None, :, None, None]
                + pr['beta'][None, :, None, None])

    dn = ('NCHW', 'OIHW', 'NCHW')
    h = bn(x, raw['bn0'])
    h = lax.conv_general_dilated(h, raw['w1'], (1, 1), ((1, 1), (1, 1)),
                                 dimension_numbers=dn) + raw['b1'][None, :, None, None]
    h = bn(h, raw['bn1']); h = h * jax.nn.sigmoid(h)
    Hd = raw['w2'].shape[0]
    h = lax.conv_general_dilated(h, raw['w2'], (1, 1), ((1, 1), (1, 1)),
                                 dimension_numbers=dn,
                                 feature_group_count=Hd) + raw['b2'][None, :, None, None]
    h = bn(h, raw['bn2']); h = h * jax.nn.sigmoid(h)
    h = lax.conv_general_dilated(h, raw['w3'], (stride, stride), ((0, 0), (0, 0)),
                                 dimension_numbers=dn)
    h = bn(h, raw['bn3'])
    y = jnp.mean(h, axis=(2, 3))                       # (B, Cout)
    y = jnp.maximum(y @ raw['wfc1'].T, 0.0)
    y = jax.nn.sigmoid(y @ raw['wfc2'].T)
    return h * y[:, :, None, None]


# ----------------------------------------------------------------------------
if __name__ == "__main__":
    key = jax.random.PRNGKey(0)
    kx, kp = jax.random.split(key)

    B, Cin, H, W = 2, 4, 16, 16
    Cout, ex, stride, upsample = 16, 6, 1, False

    x = jax.random.normal(kx, (B, Cin, H, W), dtype=jnp.float32)
    raw = make_params(kp, Cin, Cout, ex)
    kparams = fold_params(raw)

    out = decoder_conv_se_block(x, kparams, upsample=upsample, stride=stride)
    out = jax.block_until_ready(out)

    ref = reference_forward(x, raw, upsample=upsample, stride=stride)
    assert out.shape == ref.shape, (out.shape, ref.shape)
    err = float(jnp.max(jnp.abs(out - ref)))
    assert err < 1e-3, f"max abs err {err}"

    # Exercise the batched (Bblk > 1, grid of 2 parallel steps) path as well.
    x2 = jax.random.normal(jax.random.PRNGKey(1), (8, Cin, 8, 8), dtype=jnp.float32)
    out2 = jax.block_until_ready(decoder_conv_se_block(x2, kparams))
    ref2 = reference_forward(x2, raw)
    err2 = float(jnp.max(jnp.abs(out2 - ref2)))
    assert err2 < 1e-3, f"max abs err (batched) {err2}"

    print("KERNEL_OK")
</pallas_src>

<mosaic_0001>
module attributes {stable_mosaic.version = 11 : i64} {
  func.func @_decoder_block_kernel(%arg0: i32, %arg1: memref<1x4x512xf32, #tpu.memory_space<vmem>>, %arg2: memref<3x512xf32, #tpu.memory_space<vmem>>, %arg3: memref<24x4xf32, #tpu.memory_space<vmem>>, %arg4: memref<16x24xf32, #tpu.memory_space<vmem>>, %arg5: memref<24x28xf32, #tpu.memory_space<vmem>>, %arg6: memref<16x5xf32, #tpu.memory_space<vmem>>, %arg7: memref<1x16x384xf32, #tpu.memory_space<vmem>>) attributes {dimension_semantics = [#tpu.dimension_semantics<parallel>], iteration_bounds = array<i64: 2>, scalar_prefetch = 0 : i64, scratch_operands = 0 : i64, tpu.core_type = #tpu.core_type<tc>, window_params = [{transform_indices = @transform_0, window_bounds = array<i64: 1, 4, 512>}, {pipeline_mode = #tpu.pipeline_mode<synchronous>, transform_indices = @transform_1, window_bounds = array<i64: 3, 512>}, {pipeline_mode = #tpu.pipeline_mode<synchronous>, transform_indices = @transform_2, window_bounds = array<i64: 24, 4>}, {pipeline_mode = #tpu.pipeline_mode<synchronous>, transform_indices = @transform_3, window_bounds = array<i64: 16, 24>}, {pipeline_mode = #tpu.pipeline_mode<synchronous>, transform_indices = @transform_4, window_bounds = array<i64: 24, 28>}, {pipeline_mode = #tpu.pipeline_mode<synchronous>, transform_indices = @transform_5, window_bounds = array<i64: 16, 5>}, {transform_indices = @transform_6, window_bounds = array<i64: 1, 16, 384>}]} {
    %c0 = arith.constant 0 : index
    %c0_0 = arith.constant 0 : index
    %0 = vector.load %arg2[%c0, %c0_0] : memref<3x512xf32, #tpu.memory_space<vmem>>, vector<1x512xf32>
    %c1 = arith.constant 1 : index
    %c0_1 = arith.constant 0 : index
    %1 = vector.load %arg2[%c1, %c0_1] : memref<3x512xf32, #tpu.memory_space<vmem>>, vector<1x512xf32>
    %c2 = arith.constant 2 : index
    %c0_2 = arith.constant 0 : index
    %2 = vector.load %arg2[%c2, %c0_2] : memref<3x512xf32, #tpu.memory_space<vmem>>, vector<1x384xf32>
    %c0_3 = arith.constant 0 : index
    %c0_4 = arith.constant 0 : index
    %3 = vector.load %arg5[%c0_3, %c0_4] : memref<24x28xf32, #tpu.memory_space<vmem>>, vector<24x1xf32>
    %c0_5 = arith.constant 0 : index
    %c1_6 = arith.constant 1 : index
    %4 = vector.load %arg5[%c0_5, %c1_6] : memref<24x28xf32, #tpu.memory_space<vmem>>, vector<24x1xf32>
    %c0_7 = arith.constant 0 : index
    %c2_8 = arith.constant 2 : index
    %5 = vector.load %arg5[%c0_7, %c2_8] : memref<24x28xf32, #tpu.memory_space<vmem>>, vector<24x1xf32>
    %c0_9 = arith.constant 0 : index
    %c3 = arith.constant 3 : index
    %6 = vector.load %arg5[%c0_9, %c3] : memref<24x28xf32, #tpu.memory_space<vmem>>, vector<24x25xf32>
    %c0_10 = arith.constant 0 : index
    %c0_11 = arith.constant 0 : index
    %7 = vector.load %arg6[%c0_10, %c0_11] : memref<16x5xf32, #tpu.memory_space<vmem>>, vector<16x1xf32>
    %c0_12 = arith.constant 0 : index
    %c1_13 = arith.constant 1 : index
    %8 = vector.load %arg6[%c0_12, %c1_13] : memref<16x5xf32, #tpu.memory_space<vmem>>, vector<16x2xf32>
    %c0_14 = arith.constant 0 : index
    %c3_15 = arith.constant 3 : index
    %9 = vector.load %arg6[%c0_14, %c3_15] : memref<16x5xf32, #tpu.memory_space<vmem>>, vector<16x2xf32>
    %c0_16 = arith.constant 0 : index
    %c0_17 = arith.constant 0 : index
    %10 = vector.load %arg3[%c0_16, %c0_17] : memref<24x4xf32, #tpu.memory_space<vmem>>, vector<24x4xf32>
    %c0_18 = arith.constant 0 : index
    %c0_19 = arith.constant 0 : index
    %11 = vector.load %arg4[%c0_18, %c0_19] : memref<16x24xf32, #tpu.memory_space<vmem>>, vector<16x24xf32>
    %12 = vector.broadcast %3 : vector<24x1xf32> to vector<24x512xf32>
    %13 = vector.broadcast %0 : vector<1x512xf32> to vector<24x512xf32>
    %14 = arith.mulf %12, %13 : vector<24x512xf32>
    %15 = vector.broadcast %4 : vector<24x1xf32> to vector<24x512xf32>
    %16 = arith.addf %14, %15 : vector<24x512xf32>
    %c0_20 = arith.constant 0 : index
    %c0_21 = arith.constant 0 : index
    %c0_22 = arith.constant 0 : index
    %17 = vector.load %arg1[%c0_20, %c0_21, %c0_22] : memref<1x4x512xf32, #tpu.memory_space<vmem>>, vector<1x4x512xf32>
    %18 = vector.shape_cast %17 : vector<1x4x512xf32> to vector<4x512xf32>
    %cst = arith.constant dense<0.000000e+00> : vector<24x512xf32>
    %19 = tpu.matmul %10, %18, %cst {dimension_numbers = #tpu.dot_dimension_numbers<[1], [0], [0], [1], [0, 0, 1, 1], [], []>} : vector<24x4xf32>, vector<4x512xf32>, vector<24x512xf32> -> vector<24x512xf32>
    %20 = arith.addf %19, %16 : vector<24x512xf32>
    %21 = arith.negf %20 : vector<24x512xf32>
    %22 = math.exp %21 : vector<24x512xf32>
    %cst_23 = arith.constant 1.000000e+00 : f32
    %23 = vector.broadcast %cst_23 : f32 to vector<24x512xf32>
    %24 = arith.addf %23, %22 : vector<24x512xf32>
    %25 = arith.divf %23, %24 : vector<24x512xf32>
    %26 = arith.mulf %20, %25 : vector<24x512xf32>
    %27 = vector.broadcast %1 : vector<1x512xf32> to vector<24x512xf32>
    %28 = arith.mulf %26, %27 : vector<24x512xf32>
    %29 = vector.extract_strided_slice %28 {offsets = [0, 0], sizes = [24, 384], strides = [1, 1]} : vector<24x512xf32> to vector<24x384xf32>
    %30 = vector.extract_strided_slice %6 {offsets = [0, 0], sizes = [24, 1], strides = [1, 1]} : vector<24x25xf32> to vector<24x1xf32>
    %31 = vector.broadcast %30 : vector<24x1xf32> to vector<24x384xf32>
    %32 = arith.mulf %29, %31 : vector<24x384xf32>
    %33 = vector.extract_strided_slice %28 {offsets = [0, 1], sizes = [24, 384], strides = [1, 1]} : vector<24x512xf32> to vector<24x384xf32>
    %34 = vector.extract_strided_slice %6 {offsets = [0, 1], sizes = [24, 1], strides = [1, 1]} : vector<24x25xf32> to vector<24x1xf32>
    %35 = vector.broadcast %34 : vector<24x1xf32> to vector<24x384xf32>
    %36 = arith.mulf %33, %35 : vector<24x384xf32>
    %37 = arith.addf %32, %36 : vector<24x384xf32>
    %38 = vector.extract_strided_slice %28 {offsets = [0, 2], sizes = [24, 384], strides = [1, 1]} : vector<24x512xf32> to vector<24x384xf32>
    %39 = vector.extract_strided_slice %6 {offsets = [0, 2], sizes = [24, 1], strides = [1, 1]} : vector<24x25xf32> to vector<24x1xf32>
    %40 = vector.broadcast %39 : vector<24x1xf32> to vector<24x384xf32>
    %41 = arith.mulf %38, %40 : vector<24x384xf32>
    %42 = arith.addf %37, %41 : vector<24x384xf32>
    %43 = vector.extract_strided_slice %28 {offsets = [0, 3], sizes = [24, 384], strides = [1, 1]} : vector<24x512xf32> to vector<24x384xf32>
    %44 = vector.extract_strided_slice %6 {offsets = [0, 3], sizes = [24, 1], strides = [1, 1]} : vector<24x25xf32> to vector<24x1xf32>
    %45 = vector.broadcast %44 : vector<24x1xf32> to vector<24x384xf32>
    %46 = arith.mulf %43, %45 : vector<24x384xf32>
    %47 = arith.addf %42, %46 : vector<24x384xf32>
    %48 = vector.extract_strided_slice %28 {offsets = [0, 4], sizes = [24, 384], strides = [1, 1]} : vector<24x512xf32> to vector<24x384xf32>
    %49 = vector.extract_strided_slice %6 {offsets = [0, 4], sizes = [24, 1], strides = [1, 1]} : vector<24x25xf32> to vector<24x1xf32>
    %50 = vector.broadcast %49 : vector<24x1xf32> to vector<24x384xf32>
    %51 = arith.mulf %48, %50 : vector<24x384xf32>
    %52 = arith.addf %47, %51 : vector<24x384xf32>
    %53 = vector.extract_strided_slice %28 {offsets = [0, 20], sizes = [24, 384], strides = [1, 1]} : vector<24x512xf32> to vector<24x384xf32>
    %54 = vector.extract_strided_slice %6 {offsets = [0, 5], sizes = [24, 1], strides = [1, 1]} : vector<24x25xf32> to vector<24x1xf32>
    %55 = vector.broadcast %54 : vector<24x1xf32> to vector<24x384xf32>
    %56 = arith.mulf %53, %55 : vector<24x384xf32>
    %57 = arith.addf %52, %56 : vector<24x384xf32>
    %58 = vector.extract_strided_slice %28 {offsets = [0, 21], sizes = [24, 384], strides = [1, 1]} : vector<24x512xf32> to vector<24x384xf32>
    %59 = vector.extract_strided_slice %6 {offsets = [0, 6], sizes = [24, 1], strides = [1, 1]} : vector<24x25xf32> to vector<24x1xf32>
    %60 = vector.broadcast %59 : vector<24x1xf32> to vector<24x384xf32>
    %61 = arith.mulf %58, %60 : vector<24x384xf32>
    %62 = arith.addf %57, %61 : vector<24x384xf32>
    %63 = vector.extract_strided_slice %28 {offsets = [0, 22], sizes = [24, 384], strides = [1, 1]} : vector<24x512xf32> to vector<24x384xf32>
    %64 = vector.extract_strided_slice %6 {offsets = [0, 7], sizes = [24, 1], strides = [1, 1]} : vector<24x25xf32> to vector<24x1xf32>
    %65 = vector.broadcast %64 : vector<24x1xf32> to vector<24x384xf32>
    %66 = arith.mulf %63, %65 : vector<24x384xf32>
    %67 = arith.addf %62, %66 : vector<24x384xf32>
    %68 = vector.extract_strided_slice %28 {offsets = [0, 23], sizes = [24, 384], strides = [1, 1]} : vector<24x512xf32> to vector<24x384xf32>
    %69 = vector.extract_strided_slice %6 {offsets = [0, 8], sizes = [24, 1], strides = [1, 1]} : vector<24x25xf32> to vector<24x1xf32>
    %70 = vector.broadcast %69 : vector<24x1xf32> to vector<24x384xf32>
    %71 = arith.mulf %68, %70 : vector<24x384xf32>
    %72 = arith.addf %67, %71 : vector<24x384xf32>
    %73 = vector.extract_strided_slice %28 {offsets = [0, 24], sizes = [24, 384], strides = [1, 1]} : vector<24x512xf32> to vector<24x384xf32>
    %74 = vector.extract_strided_slice %6 {offsets = [0, 9], sizes = [24, 1], strides = [1, 1]} : vector<24x25xf32> to vector<24x1xf32>
    %75 = vector.broadcast %74 : vector<24x1xf32> to vector<24x384xf32>
    %76 = arith.mulf %73, %75 : vector<24x384xf32>
    %77 = arith.addf %72, %76 : vector<24x384xf32>
    %78 = vector.extract_strided_slice %28 {offsets = [0, 40], sizes = [24, 384], strides = [1, 1]} : vector<24x512xf32> to vector<24x384xf32>
    %79 = vector.extract_strided_slice %6 {offsets = [0, 10], sizes = [24, 1], strides = [1, 1]} : vector<24x25xf32> to vector<24x1xf32>
    %80 = vector.broadcast %79 : vector<24x1xf32> to vector<24x384xf32>
    %81 = arith.mulf %78, %80 : vector<24x384xf32>
    %82 = arith.addf %77, %81 : vector<24x384xf32>
    %83 = vector.extract_strided_slice %28 {offsets = [0, 41], sizes = [24, 384], strides = [1, 1]} : vector<24x512xf32> to vector<24x384xf32>
    %84 = vector.extract_strided_slice %6 {offsets = [0, 11], sizes = [24, 1], strides = [1, 1]} : vector<24x25xf32> to vector<24x1xf32>
    %85 = vector.broadcast %84 : vector<24x1xf32> to vector<24x384xf32>
    %86 = arith.mulf %83, %85 : vector<24x384xf32>
    %87 = arith.addf %82, %86 : vector<24x384xf32>
    %88 = vector.extract_strided_slice %28 {offsets = [0, 42], sizes = [24, 384], strides = [1, 1]} : vector<24x512xf32> to vector<24x384xf32>
    %89 = vector.extract_strided_slice %6 {offsets = [0, 12], sizes = [24, 1], strides = [1, 1]} : vector<24x25xf32> to vector<24x1xf32>
    %90 = vector.broadcast %89 : vector<24x1xf32> to vector<24x384xf32>
    %91 = arith.mulf %88, %90 : vector<24x384xf32>
    %92 = arith.addf %87, %91 : vector<24x384xf32>
    %93 = vector.extract_strided_slice %28 {offsets = [0, 43], sizes = [24, 384], strides = [1, 1]} : vector<24x512xf32> to vector<24x384xf32>
    %94 = vector.extract_strided_slice %6 {offsets = [0, 13], sizes = [24, 1], strides = [1, 1]} : vector<24x25xf32> to vector<24x1xf32>
    %95 = vector.broadcast %94 : vector<24x1xf32> to vector<24x384xf32>
    %96 = arith.mulf %93, %95 : vector<24x384xf32>
    %97 = arith.addf %92, %96 : vector<24x384xf32>
    %98 = vector.extract_strided_slice %28 {offsets = [0, 44], sizes = [24, 384], strides = [1, 1]} : vector<24x512xf32> to vector<24x384xf32>
    %99 = vector.extract_strided_slice %6 {offsets = [0, 14], sizes = [24, 1], strides = [1, 1]} : vector<24x25xf32> to vector<24x1xf32>
    %100 = vector.broadcast %99 : vector<24x1xf32> to vector<24x384xf32>
    %101 = arith.mulf %98, %100 : vector<24x384xf32>
    %102 = arith.addf %97, %101 : vector<24x384xf32>
    %103 = vector.extract_strided_slice %28 {offsets = [0, 60], sizes = [24, 384], strides = [1, 1]} : vector<24x512xf32> to vector<24x384xf32>
    %104 = vector.extract_strided_slice %6 {offsets = [0, 15], sizes = [24, 1], strides = [1, 1]} : vector<24x25xf32> to vector<24x1xf32>
    %105 = vector.broadcast %104 : vector<24x1xf32> to vector<24x384xf32>
    %106 = arith.mulf %103, %105 : vector<24x384xf32>
    %107 = arith.addf %102, %106 : vector<24x384xf32>
    %108 = vector.extract_strided_slice %28 {offsets = [0, 61], sizes = [24, 384], strides = [1, 1]} : vector<24x512xf32> to vector<24x384xf32>
    %109 = vector.extract_strided_slice %6 {offsets = [0, 16], sizes = [24, 1], strides = [1, 1]} : vector<24x25xf32> to vector<24x1xf32>
    %110 = vector.broadcast %109 : vector<24x1xf32> to vector<24x384xf32>
    %111 = arith.mulf %108, %110 : vector<24x384xf32>
    %112 = arith.addf %107, %111 : vector<24x384xf32>
    %113 = vector.extract_strided_slice %28 {offsets = [0, 62], sizes = [24, 384], strides = [1, 1]} : vector<24x512xf32> to vector<24x384xf32>
    %114 = vector.extract_strided_slice %6 {offsets = [0, 17], sizes = [24, 1], strides = [1, 1]} : vector<24x25xf32> to vector<24x1xf32>
    %115 = vector.broadcast %114 : vector<24x1xf32> to vector<24x384xf32>
    %116 = arith.mulf %113, %115 : vector<24x384xf32>
    %117 = arith.addf %112, %116 : vector<24x384xf32>
    %118 = vector.extract_strided_slice %28 {offsets = [0, 63], sizes = [24, 384], strides = [1, 1]} : vector<24x512xf32> to vector<24x384xf32>
    %119 = vector.extract_strided_slice %6 {offsets = [0, 18], sizes = [24, 1], strides = [1, 1]} : vector<24x25xf32> to vector<24x1xf32>
    %120 = vector.broadcast %119 : vector<24x1xf32> to vector<24x384xf32>
    %121 = arith.mulf %118, %120 : vector<24x384xf32>
    %122 = arith.addf %117, %121 : vector<24x384xf32>
    %123 = vector.extract_strided_slice %28 {offsets = [0, 64], sizes = [24, 384], strides = [1, 1]} : vector<24x512xf32> to vector<24x384xf32>
    %124 = vector.extract_strided_slice %6 {offsets = [0, 19], sizes = [24, 1], strides = [1, 1]} : vector<24x25xf32> to vector<24x1xf32>
    %125 = vector.broadcast %124 : vector<24x1xf32> to vector<24x384xf32>
    %126 = arith.mulf %123, %125 : vector<24x384xf32>
    %127 = arith.addf %122, %126 : vector<24x384xf32>
    %128 = vector.extract_strided_slice %28 {offsets = [0, 80], sizes = [24, 384], strides = [1, 1]} : vector<24x512xf32> to vector<24x384xf32>
    %129 = vector.extract_strided_slice %6 {offsets = [0, 20], sizes = [24, 1], strides = [1, 1]} : vector<24x25xf32> to vector<24x1xf32>
    %130 = vector.broadcast %129 : vector<24x1xf32> to vector<24x384xf32>
    %131 = arith.mulf %128, %130 : vector<24x384xf32>
    %132 = arith.addf %127, %131 : vector<24x384xf32>
    %133 = vector.extract_strided_slice %28 {offsets = [0, 81], sizes = [24, 384], strides = [1, 1]} : vector<24x512xf32> to vector<24x384xf32>
    %134 = vector.extract_strided_slice %6 {offsets = [0, 21], sizes = [24, 1], strides = [1, 1]} : vector<24x25xf32> to vector<24x1xf32>
    %135 = vector.broadcast %134 : vector<24x1xf32> to vector<24x384xf32>
    %136 = arith.mulf %133, %135 : vector<24x384xf32>
    %137 = arith.addf %132, %136 : vector<24x384xf32>
    %138 = vector.extract_strided_slice %28 {offsets = [0, 82], sizes = [24, 384], strides = [1, 1]} : vector<24x512xf32> to vector<24x384xf32>
    %139 = vector.extract_strided_slice %6 {offsets = [0, 22], sizes = [24, 1], strides = [1, 1]} : vector<24x25xf32> to vector<24x1xf32>
    %140 = vector.broadcast %139 : vector<24x1xf32> to vector<24x384xf32>
    %141 = arith.mulf %138, %140 : vector<24x384xf32>
    %142 = arith.addf %137, %141 : vector<24x384xf32>
    %143 = vector.extract_strided_slice %28 {offsets = [0, 83], sizes = [24, 384], strides = [1, 1]} : vector<24x512xf32> to vector<24x384xf32>
    %144 = vector.extract_strided_slice %6 {offsets = [0, 23], sizes = [24, 1], strides = [1, 1]} : vector<24x25xf32> to vector<24x1xf32>
    %145 = vector.broadcast %144 : vector<24x1xf32> to vector<24x384xf32>
    %146 = arith.mulf %143, %145 : vector<24x384xf32>
    %147 = arith.addf %142, %146 : vector<24x384xf32>
    %148 = vector.extract_strided_slice %28 {offsets = [0, 84], sizes = [24, 384], strides = [1, 1]} : vector<24x512xf32> to vector<24x384xf32>
    %149 = vector.extract_strided_slice %6 {offsets = [0, 24], sizes = [24, 1], strides = [1, 1]} : vector<24x25xf32> to vector<24x1xf32>
    %150 = vector.broadcast %149 : vector<24x1xf32> to vector<24x384xf32>
    %151 = arith.mulf %148, %150 : vector<24x384xf32>
    %152 = arith.addf %147, %151 : vector<24x384xf32>
    %153 = vector.broadcast %5 : vector<24x1xf32> to vector<24x384xf32>
    %154 = arith.addf %152, %153 : vector<24x384xf32>
    %155 = arith.negf %154 : vector<24x384xf32>
    %156 = math.exp %155 : vector<24x384xf32>
    %cst_24 = arith.constant 1.000000e+00 : f32
    %157 = vector.broadcast %cst_24 : f32 to vector<24x384xf32>
    %158 = arith.addf %157, %156 : vector<24x384xf32>
    %159 = arith.divf %157, %158 : vector<24x384xf32>
    %160 = arith.mulf %154, %159 : vector<24x384xf32>
    %cst_25 = arith.constant dense<0.000000e+00> : vector<16x384xf32>
    %161 = tpu.matmul %11, %160, %cst_25 {dimension_numbers = #tpu.dot_dimension_numbers<[1], [0], [0], [1], [0, 0, 1, 1], [], []>} : vector<16x24xf32>, vector<24x384xf32>, vector<16x384xf32> -> vector<16x384xf32>
    %162 = vector.broadcast %7 : vector<16x1xf32> to vector<16x384xf32>
    %163 = arith.addf %161, %162 : vector<16x384xf32>
    %164 = vector.broadcast %2 : vector<1x384xf32> to vector<16x384xf32>
    %165 = arith.mulf %163, %164 : vector<16x384xf32>
    %cst_26 = arith.constant dense<0.000000e+00> : vector<16xf32>
    %166 = vector.multi_reduction <add>, %165, %cst_26 [1] : vector<16x384xf32> to vector<16xf32>
    %167 = vector.shape_cast %166 : vector<16xf32> to vector<16x1xf32>
    %168 = vector.broadcast %167 : vector<16x1xf32> to vector<16x2xf32>
    %169 = arith.mulf %8, %168 : vector<16x2xf32>
    %cst_27 = arith.constant dense<0.000000e+00> : vector<2xf32>
    %170 = vector.multi_reduction <add>, %169, %cst_27 [0] : vector<16x2xf32> to vector<2xf32>
    %171 = vector.shape_cast %170 : vector<2xf32> to vector<1x2xf32>
    %cst_28 = arith.constant 0.000000e+00 : f32
    %172 = vector.broadcast %cst_28 : f32 to vector<1x2xf32>
    %173 = arith.maximumf %171, %172 : vector<1x2xf32>
    %174 = vector.broadcast %173 : vector<1x2xf32> to vector<16x2xf32>
    %175 = arith.mulf %9, %174 : vector<16x2xf32>
    %cst_29 = arith.constant dense<0.000000e+00> : vector<16xf32>
    %176 = vector.multi_reduction <add>, %175, %cst_29 [1] : vector<16x2xf32> to vector<16xf32>
    %177 = vector.shape_cast %176 : vector<16xf32> to vector<16x1xf32>
    %178 = arith.negf %177 : vector<16x1xf32>
    %179 = math.exp %178 : vector<16x1xf32>
    %cst_30 = arith.constant 1.000000e+00 : f32
    %180 = vector.broadcast %cst_30 : f32 to vector<16x1xf32>
    %181 = arith.addf %180, %179 : vector<16x1xf32>
    %182 = arith.divf %180, %181 : vector<16x1xf32>
    %183 = vector.broadcast %182 : vector<16x1xf32> to vector<16x384xf32>
    %184 = arith.mulf %163, %183 : vector<16x384xf32>
    %c0_31 = arith.constant 0 : index
    %c0_32 = arith.constant 0 : index
    %c0_33 = arith.constant 0 : index
    %185 = vector.load %arg7[%c0_31, %c0_32, %c0_33] : memref<1x16x384xf32, #tpu.memory_space<vmem>>, vector<1x16x384xf32>
    %186 = vector.shape_cast %185 : vector<1x16x384xf32> to vector<16x384xf32>
    %187 = vector.shape_cast %184 : vector<16x384xf32> to vector<1x16x384xf32>
    tpu.vector_store %arg7[%c0_31, %c0_32, %c0_33], %187 {strides = array<i32>} : memref<1x16x384xf32, #tpu.memory_space<vmem>>, vector<1x16x384xf32>,
    return
  }
  func.func @transform_0(%arg0: i32) -> (i32, i32, i32) {
    %c0_i32 = arith.constant 0 : i32
    %c0_i32_0 = arith.constant 0 : i32
    %c0_i32_1 = arith.constant 0 : i32
    return %arg0, %c0_i32, %c0_i32_0 : i32, i32, i32
  }
  func.func @transform_1(%arg0: i32) -> (i32, i32) {
    %c0_i32 = arith.constant 0 : i32
    %c0_i32_0 = arith.constant 0 : i32
    %c0_i32_1 = arith.constant 0 : i32
    return %c0_i32, %c0_i32_0 : i32, i32
  }
  func.func @transform_2(%arg0: i32) -> (i32, i32) {
    %c0_i32 = arith.constant 0 : i32
    %c0_i32_0 = arith.constant 0 : i32
    %c0_i32_1 = arith.constant 0 : i32
    return %c0_i32, %c0_i32_0 : i32, i32
  }
  func.func @transform_3(%arg0: i32) -> (i32, i32) {
    %c0_i32 = arith.constant 0 : i32
    %c0_i32_0 = arith.constant 0 : i32
    %c0_i32_1 = arith.constant 0 : i32
    return %c0_i32, %c0_i32_0 : i32, i32
  }
  func.func @transform_4(%arg0: i32) -> (i32, i32) {
    %c0_i32 = arith.constant 0 : i32
    %c0_i32_0 = arith.constant 0 : i32
    %c0_i32_1 = arith.constant 0 : i32
    return %c0_i32, %c0_i32_0 : i32, i32
  }
  func.func @transform_5(%arg0: i32) -> (i32, i32) {
    %c0_i32 = arith.constant 0 : i32
    %c0_i32_0 = arith.constant 0 : i32
    %c0_i32_1 = arith.constant 0 : i32
    return %c0_i32, %c0_i32_0 : i32, i32
  }
  func.func @transform_6(%arg0: i32) -> (i32, i32, i32) {
    %c0_i32 = arith.constant 0 : i32
    %c0_i32_0 = arith.constant 0 : i32
    %c0_i32_1 = arith.constant 0 : i32
    return %arg0, %c0_i32, %c0_i32_0 : i32, i32, i32
  }
}

</mosaic_0001>

<bundles_post_ra>
// kernel: tpu_custom_call.1
= control target key start
LH: loop header
LB: loop body
LE: loop exit
PB: predicated region body
PF: predicated region fallthrough
CT: control target
= control target key end

     0   :  { %11 = vsyncpa [#allocation3], 0  ;;  %s6441_s0 = inlined_call_operand.vmem [shape: f32[2,4,512], index: 0, kind: input, shape index: {}]   ;;  %s6442_s1 = inlined_call_operand.hbm [shape: f32[3,512], index: 1, kind: input, shape index: {}]   ;;  %s6443_s2 = inlined_call_operand.vmem [shape: f32[24,4], index: 2, kind: input, shape index: {}]   ;;  %s6444_s3 = inlined_call_operand.hbm [shape: f32[16,24], index: 3, kind: input, shape index: {}]   ;;  %s6445_s4 = inlined_call_operand.vmem [shape: f32[24,28], index: 4, kind: input, shape index: {}]   ;;  %s6446_s5 = inlined_call_operand.vmem [shape: f32[16,5], index: 5, kind: input, shape index: {}]   ;;  %s6447_s6 = inlined_call_operand.hbm [shape: f32[2,16,384], index: 6, kind: output, shape index: {}]  }
   0x1   :  { %12 = vsyncpa [#allocation6], 0 }
   0x2   :  { %13 = vsyncpa [#allocation4], 0 }
   0x3   :  { %15 = vsyncpa [#allocation4 + $0x1], 0  ;;  %s3805_s21 = smov 0   ;;  %s3807_s22 = smov 0  }
   0x4   :  { %s3809_s23 = smov 0   ;;  %s3811_s24 = smov 0  }
   0x5 LB: > { %s3826_s25 = sadd.s32 4294967295, %s3707_s24   ;;  %s3245_s26 = sadd.s32 4294967294, %s3707_s24   ;;  %s3707_s24 = sphi %s3811_s24, %s7067_s24   ;;  %s3703_s23 = sphi %s3809_s23, %s7066_s23   ;;  %s3699_s22 = sphi %s3807_s22, %s7065_s22   ;;  %s3695_s21 = sphi %s3805_s21, %s7064_s21  }
   0x6   : > { %s3830_s27 = sadd.s32 1, %s3707_s24   ;;  %s159_s28 = sadd.s32 1, %s3703_s23 }
   0x7   : > { %s156_s29 = ssub.s32 %s3707_s24, %s3830_s27  ;;  %p169_p0 = scmp.ne.s32.totalorder %s3703_s23, %s3699_s22 }
   0x8   : > { %p157_p1 = scmp.eq.s32.totalorder %s156_s29, 0  ;;  %p170_p2 = scmp.eq.s32.totalorder %s3826_s25, 1 }
   0x9   : > { %p175_p3 = scmp.ne.s32.totalorder %s3699_s22, %s3695_s21  ;;  %p176_p4 = scmp.eq.s32.totalorder %s3245_s26, 1 }
   0xa   : > { %s3841_s30 = scalar_select %p157_p1, %s3703_s23, %s159_s28  }
   0xb   : > { %p3843_p5 = por %p170_p2, %p169_p0  ;;  %p3847_p6 = por %p176_p4, %p175_p3 }
   0xc   : > { %p3246_p7 = scmp.ge.s32.totalorder %s3707_s24, 1  ;;  %p183_p8 = scmp.lt.s32.totalorder %s3707_s24, 3 }
   0xd   : > { %s6592_s7 = scalar_select %p3843_p5, 1, 0 }
   0xe   : > { %s6593_s8 = scalar_select %p3847_p6, 1, 0 }
   0xf   : > { %p6448_p9 = scmp.eq.s32.totalorder %s3826_s25, 0  ;;  %p3854_p10 = pnand %p3246_p7, %p183_p8 }
  0x10   : > { %s3709_s10 = smov [#allocation2]   ;;  %s3710_s12 = smov [#allocation5]  }
  0x11   : > { %s6594_s9 = scalar_select %p3854_p10, 1, 0 }
  0x12   : > { %s196_s11 = sshll.u32 %s3709_s10, 4  ;;  %p3322_p11 = pneg %p3854_p10  ;;  %s197_s11 = int_to_ptr.vmem [resolvable:$true] %s196_s11 }
  0x13   : > { %s209_s13 = sshll.u32 %s3710_s12, 4  ;;  %s3598_s15 = scalar_lea.vmem %s197_s11, 256  ;;  %s210_s13 = int_to_ptr.vmem [resolvable:$true] %s209_s13 }
  0x14   : > { %p3862_p12 = pnand %p6448_p9, %p3322_p11  ;;  %p3599_p0 = scmp.ne.s32.totalorder %s197_s11, %s3598_s15 }
  0x15   : > { %p3606_p3 = scmp.lt.s32.totalorder %s197_s11, %s197_s11  ;;  %p3607_p4 = scmp.lt.s32.totalorder %s3598_s15, %s3598_s15 }
  0x16   : > { %p3589_p13 = pneg %p3862_p12 }
  0x17   : > { %p3608_p7 = por %p3607_p4, %p3606_p3 }
  0x18   : > { %p3601_p1 = pnand %p3599_p0, %p3589_p13 }
  0x1a   : > { %p3602_p2 = pneg %p3601_p1 }
  0x1c   : > { %p3609_p8 = pnand %p3608_p7, %p3602_p2 }
  0x1e   : > { %3612 = shalt.err (!%p3609_p8)
}
  0x1f   : > { %3325 = dma.hbm_to_vmem [thread:$0]  (!%p3862_p12), %s6442_s1, 256, %s197_s11, [#allocation3]  }
  0x20   : > { %s3624_s18 = scalar_lea.vmem %s210_s13, 256  ;;  %p3632_p0 = scmp.lt.s32.totalorder %s210_s13, %s210_s13 }
  0x21   : > { %p3625_p11 = scmp.ne.s32.totalorder %s210_s13, %s3624_s18  ;;  %p3633_p1 = scmp.lt.s32.totalorder %s3624_s18, %s3624_s18 }
  0x23   : > { %p3627_p9 = pnand %p3625_p11, %p3589_p13  ;;  %p3634_p5 = por %p3633_p1, %p3632_p0 }
  0x25   : > { %p3628_p6 = pneg %p3627_p9 }
  0x27   : > { %p3635_p10 = pnand %p3634_p5, %p3628_p6 }
  0x29   : > { %3638 = shalt.err (!%p3635_p10)
}
  0x2a   : > { %s3711_s19 = smov 128   ;;  %s3712_s20 = smov 8  }
  0x2b   : > { %3328 = dma.hbm_to_vmem [thread:$0]  (!%p3862_p12), %s6444_s3, 256, %s210_s13, [#allocation6], %s3711_s19, %s3711_s19, %s3712_s20  }
  0x2c   : > { %p6596_p2 = scmp.ne.s32.totalorder %s6594_s9, 0 }
  0x2e   : > { %239 = sbr.rel (%p6596_p2) target bundleno = 1940 (0x794), region = 44 }
  0x33   : > { %p6597_p3 = scmp.eq.s32.totalorder %s3826_s25, 0 }
  0x35   : > { %3682 = dma.done.wait (%p6597_p3), [#allocation3], 256   ;;  %p6598_p9 = pmov %p6597_p3 }
  0x36   : > { %p6599_p5 = pmov %p6597_p3 }
  0x37   : > { %3684 = vsyncadd (%p6598_p9), [#allocation3], 4294967040 }
  0x38   : > { %3686 = dma.done.wait (%p6599_p5), [#allocation6], 256   ;;  %p6600_p6 = pmov %p6597_p3 }
  0x39   : > { %p273_p10 = scmp.lt.s32.totalorder %s3826_s25, 1  ;;  %v6452_v0 = vmov 0   ;;  %v6451_v1 = vmov 0.0   ;;  %v3906_v2 = vld [vmem:[%s6445_s4 + $0x10] sm:$0xff]  ;;  %vm381_vm0 = vcmask 1043456   ;;  %v3912_v7 = vld [vmem:[%s6445_s4] sm:$0xff]  ;;  %v309_v26 = vlaneseq }
  0x3a   : > { %3688 = vsyncadd (%p6600_p6), [#allocation6], 4294967040  ;;  %3431 = vset.pattern.permute.xlu1 %v6452_v0  ;;  %454 = vmatprep.mubr.f32.mxu0 %v6451_v1  ;;  %v288_v8 = vld [vmem:[%s6443_s2] sm:$0xff]  ;;  %vm371_vm1 = vcmask 31744   ;;  %v3923_v9 = vld [vmem:[%s6445_s4 + $0x8] sm:$0xff]  ;;  %v3715_v10 = vmov 1  }
  0x3b   : > { %s274_s29 = scalar_select %p273_p10, %s3826_s25, 1  ;;  %537 = vmatprep.mubr.f32.mxu1 %v6451_v1  ;;  %3430 = vset.pattern.permute.xlu0 %v6452_v0  ;;  %v289_v11 = vld [vmem:[%s6443_s2 + $0x8] sm:$0xff]  ;;  %v290_v12 = vld [vmem:[%s6443_s2 + $0x10] sm:$0xff]  ;;  %v3716_v13 = vmov 3   ;;  %v3717_v14 = vmov 4   ;;  %v3718_v15 = vmov 5  }
  0x3c   : > { %305 = vperm.xlu1 %3431, %v3906_v2   ;;  %295 = vperm.xlu0 %3430, %v3912_v7   ;;  %v3719_v16 = vmov 6   ;;  %v3720_v17 = vmov 7   ;;  %v3721_v18 = vmov 8   ;;  %v3722_v19 = vmov 9   ;;  %s3729_s10 = smov 127   ;;  %s3730_s11 = smov 126  }
  0x3d   : > { %s3295_s9 = sshll.u32 %s274_s29, 4  ;;  %v3723_v20 = vmov 10   ;;  %v3724_v21 = vmov 12   ;;  %v3725_v22 = vmov 13   ;;  %v3726_v23 = vmov 14   ;;  %s3733_s13 = smov 124  }
  0x3e   : > { %s277_s12 = scalar_lea.vmem %s6441_s0, %s3295_s9  ;;  %v3727_v24 = vmov 15   ;;  %v3728_v25 = vmov 11   ;;  %v3982_v27 = vshrl.u32 %v309_v26, 7  ;;  %v278_v31 = vld [vmem:[#allocation2] ss:$4 sm:$0xf] }
  0x3f   : > { %v365_v3 = vld [vmem:[%s277_s12] sm:$0xff]  ;;  %v366_v4 = vld [vmem:[%s277_s12 + $0x8] sm:$0xff]  ;;  %s3731_s12 = smov 125   ;;  %s3734_s14 = smov 108   ;;  %v3738_v0 = vmov 19   ;;  %vm754_vm2 = vcmask 1039360  }
  0x40   : > { %v369_v5 = vcombine.high %v365_v3, %v365_v3  ;;  %v370_v6 = vcombine.high %v366_v4, %v366_v4  ;;  %3432 = vset.pattern.permute.xlu1 %v3715_v10  ;;  %300 = vperm.xlu0 %3430, %v3923_v9   ;;  %v3985_v29 = vsub.s32 0, %v3982_v27  ;;  %v3988_v30 = vsub.s32 2, %v3982_v27  ;;  %s3735_s15 = smov 107   ;;  %s3747_s28 = smov 106  }
  0x41   : > { %342 = vperm.xlu1 %3432, %v3912_v7   ;;  %v3997_v34 = vsub.s32 1, %v3982_v27  ;;  %v323_v35 = vsub.s32 3, %v3982_v27  ;;  %s3748_s29 = smov 105   ;;  %s3749_s9 = smov 104   ;;  %vm842_vm3 = vcmask 1031168   ;;  %vm930_vm4 = vcmask 1022976  }
  0x42   : > { %3255 = vmatprep.subr.msk.mxu0 %vm381_vm0, %v369_v5  ;;  %3260 = vmatprep.subr.msk.mxu1 %vm381_vm0, %v370_v6  ;;  %6601 = vst [vmem:[#allocation11_spill] sm:$0xff] %v3985_v29  ;;  %6602 = vst [vmem:[#allocation12_spill] sm:$0xff] %v3988_v30  ;;  %v3991_v32 = vrot.slane %v278_v31, %v3985_v29  ;;  %v3994_v33 = vrot.slane %v278_v31, %v3988_v30  ;;  %s3755_s16 = smov 68   ;;  %s3756_s17 = smov 67   ;;  %vm1018_vm5 = vcmask 1014784   ;;  %vm1106_vm6 = vcmask 883712  }
  0x43   : > { %3256 = vmatpush1.msk.msra.mxu0 %vm381_vm0, %v365_v3  ;;  %3261 = vmatpush1.msk.msra.mxu1 %vm381_vm0, %v366_v4  ;;  %6603 = vst [vmem:[#allocation13_spill] sm:$0xff] %v3997_v34  ;;  %v4003_v40 = vrot.slane %v278_v31, %v3997_v34  ;;  %v4007_v41 = vrot.slane %v278_v31, %v323_v35  ;;  %s3757_s18 = smov 66   ;;  %s3759_s19 = smov 65   ;;  %vm1194_vm7 = vcmask 875520   ;;  %vm1282_vm8 = vcmask 867328  }
  0x44   : > { %3257 = vmatmul.mubr.msk.f32.vlgmr.msra.gmra.mxu0 %vm371_vm1, %v288_v8  ;;  %3262 = vmatmul.mubr.msk.f32.vlgmr.msra.gmra.mxu1 %vm371_vm1, %v288_v8  ;;  %s3760_s20 = smov 64   ;;  %s3761_s26 = smov 48   ;;  %vm1370_vm9 = vcmask 859136   ;;  %vm6579_vm10 = vcmask 850944   ;;  %vm6581_vm11 = vcmask 719872   ;;  %vm6575_vm12 = vcmask 523264  }
  0x45   : > { %460 = vmatprep.mubr.f32.mxu0 %v6451_v1  ;;  %543 = vmatprep.mubr.f32.mxu1 %v6451_v1  ;;  %vm1634_vm13 = vcmask 711680   ;;  %vm1722_vm14 = vcmask 703488   ;;  %vm6583_vm15 = vcmask 695296   ;;  %vm1898_vm0 = vcmask 687104   ;;  %p7062_p13 = scmp.ne.s32.totalorder %s6592_s7, 0 }
  0x46   : > { %350 = vperm.xlu1 %3432, %v3906_v2   ;;  %3433 = vset.pattern.permute.xlu0 %v3715_v10 }
  0x47   : > { %346 = vperm.xlu0 %3433, %v3923_v9  }
  0x48   : > { %3258 = vmatmul.mubr.msk.f32.gmra.mxu0 %vm371_vm1, %v289_v11  ;;  %3263 = vmatmul.mubr.msk.f32.gmra.mxu1 %vm371_vm1, %v289_v11 }
  0x49   : > { %466 = vmatprep.mubr.f32.mxu0 %v6451_v1  ;;  %549 = vmatprep.mubr.f32.mxu1 %v6451_v1 }
  0x4a   : > { %3434 = vset.pattern.permute.xlu1 %v3716_v13 }
  0x4b   : > { %674 = vperm.xlu1 %3434, %v3912_v7   ;;  %3435 = vset.pattern.permute.xlu0 %v3716_v13 }
  0x4c   : > { %3259 = vmatmul.mubr.msk.f32.gmra.mxu0 %vm371_vm1, %v290_v12  ;;  %3264 = vmatmul.mubr.msk.f32.gmra.mxu1 %vm371_vm1, %v290_v12  ;;  %vm1986_vm1 = vcmask 556032  }
  0x4d   : > { %2971 = vmatprep.mubr.f32.mxu0 %v6451_v1  ;;  %678 = vperm.xlu0 %3435, %v3923_v9  }
  0x4f   : > { %682 = vperm.xlu1 %3434, %v3906_v2  }
  0x51   : > { %3437 = vset.pattern.permute.xlu0 %v3717_v14 }
  0x52   : > { %699 = vperm.xlu0 %3437, %v3923_v9  }
  0x53   : > { %3436 = vset.pattern.permute.xlu1 %v3717_v14 }
  0x54   : > { %695 = vperm.xlu1 %3436, %v3912_v7  }
  0x56   : > { %3439 = vset.pattern.permute.xlu0 %v3718_v15 }
  0x57   : > { %787 = vperm.xlu0 %3439, %v3923_v9  }
  0x58   : > { %703 = vperm.xlu1 %3436, %v3906_v2  }
  0x5b   : > { %3441 = vset.pattern.permute.xlu0 %v3719_v16 }
  0x5c   : > { %3438 = vset.pattern.permute.xlu1 %v3718_v15  ;;  %875 = vperm.xlu0 %3441, %v3923_v9  }
  0x5d   : > { %783 = vperm.xlu1 %3438, %v3912_v7  }
  0x60   : > { %3443 = vset.pattern.permute.xlu0 %v3720_v17 }
  0x61   : > { %791 = vperm.xlu1 %3438, %v3906_v2   ;;  %963 = vperm.xlu0 %3443, %v3923_v9  }
  0x65   : > { %3440 = vset.pattern.permute.xlu1 %v3719_v16  ;;  %3445 = vset.pattern.permute.xlu0 %v3721_v18 }
  0x66   : > { %871 = vperm.xlu1 %3440, %v3912_v7   ;;  %1051 = vperm.xlu0 %3445, %v3923_v9  }
  0x6a   : > { %879 = vperm.xlu1 %3440, %v3906_v2   ;;  %3447 = vset.pattern.permute.xlu0 %v3722_v19 }
  0x6b   : > { %1139 = vperm.xlu0 %3447, %v3923_v9  }
  0x6e   : > { %3442 = vset.pattern.permute.xlu1 %v3720_v17 }
  0x6f   : > { %959 = vperm.xlu1 %3442, %v3912_v7   ;;  %3448 = vset.pattern.permute.xlu0 %v3723_v20 }
  0x70   : > { %1231 = vperm.xlu0 %3448, %v3906_v2  }
  0x73   : > { %967 = vperm.xlu1 %3442, %v3906_v2  }
  0x74   : > { %1223 = vperm.xlu0 %3448, %v3912_v7  }
  0x77   : > { %3444 = vset.pattern.permute.xlu1 %v3721_v18 }
  0x78   : > { %1047 = vperm.xlu1 %3444, %v3912_v7   ;;  %3451 = vset.pattern.permute.xlu0 %v3724_v21 }
  0x79   : > { %1407 = vperm.xlu0 %3451, %v3906_v2  }
  0x7c   : > { %1055 = vperm.xlu1 %3444, %v3906_v2  }
  0x7d   : > { %3453 = vset.pattern.permute.xlu0 %v3725_v22 }
  0x7e   : > { %1495 = vperm.xlu0 %3453, %v3906_v2  }
  0x80   : > { %3446 = vset.pattern.permute.xlu1 %v3722_v19 }
  0x81   : > { %1135 = vperm.xlu1 %3446, %v3912_v7  }
  0x82   : > { %3455 = vset.pattern.permute.xlu0 %v3726_v23 }
  0x83   : > { %1583 = vperm.xlu0 %3455, %v3906_v2  }
  0x85   : > { %1143 = vperm.xlu1 %3446, %v3906_v2  }
  0x87   : > { %3457 = vset.pattern.permute.xlu0 %v3727_v24 }
  0x88   : > { %1671 = vperm.xlu0 %3457, %v3906_v2  }
  0x89   : > { %3449 = vset.pattern.permute.xlu1 %v3723_v20 }
  0x8a   : > { %1227 = vperm.xlu1 %3449, %v3923_v9  }
  0x8e   : > { %3450 = vset.pattern.permute.xlu1 %v3728_v25 }
  0x8f   : > { %1319 = vperm.xlu1 %3450, %v3906_v2  }
  0x93   : > { %1315 = vperm.xlu1 %3450, %v3923_v9  }
  0x97   : > { %1311 = vperm.xlu1 %3450, %v3912_v7  }
  0x9b   : > { %3452 = vset.pattern.permute.xlu1 %v3724_v21 }
  0x9c   : > { %1403 = vperm.xlu1 %3452, %v3923_v9  }
  0xa0   : > { %1399 = vperm.xlu1 %3452, %v3912_v7  }
  0xa4   : > { %3454 = vset.pattern.permute.xlu1 %v3725_v22 }
  0xa5   : > { %1491 = vperm.xlu1 %3454, %v3923_v9  }
  0xa9   : > { %1487 = vperm.xlu1 %3454, %v3912_v7  }
  0xad   : > { %3456 = vset.pattern.permute.xlu1 %v3726_v23 }
  0xae   : > { %1579 = vperm.xlu1 %3456, %v3923_v9  }
  0xb2   : > { %1575 = vperm.xlu1 %3456, %v3912_v7  }
  0xb6   : > { %3458 = vset.pattern.permute.xlu1 %v3727_v24 }
  0xb7   : > { %1667 = vperm.xlu1 %3458, %v3923_v9   ;;  %v306_v28 = vpop.permute.xlu1 %305  ;;  %v296_v36 = vpop.permute.xlu0 %295 }
  0xb8   : > { %v329_v38 = vmul.f32 %v3991_v32, %v296_v36  ;;  %v331_v39 = vmul.f32 %v3994_v33, %v296_v36  ;;  %v330_v44 = vmul.f32 %v4003_v40, %v296_v36  ;;  %v332_v45 = vmul.f32 %v4007_v41, %v296_v36 }
  0xb9   : > { %v337_v55 = vmul.f32 %v3991_v32, %v306_v28  ;;  %v339_v62 = vmul.f32 %v3994_v33, %v306_v28  ;;  %v338_v63 = vmul.f32 %v4003_v40, %v306_v28  ;;  %v340_v6 = vmul.f32 %v4007_v41, %v306_v28 }
  0xbc   : > { %v343_v37 = vpop.permute.xlu1 %342 }
  0xbd   : > { %v353_v42 = vadd.f32 %v343_v37, %v329_v38  ;;  %v355_v43 = vadd.f32 %v343_v37, %v331_v39  ;;  %v354_v51 = vadd.f32 %v343_v37, %v330_v44  ;;  %v356_v52 = vadd.f32 %v343_v37, %v332_v45 }
  0xc1   : > { %v351_v46 = vpop.permute.xlu1 %350 }
  0xc2   : > { %v361_v11 = vadd.f32 %v351_v46, %v337_v55  ;;  %v363_v13 = vadd.f32 %v351_v46, %v339_v62  ;;  %v362_v16 = vadd.f32 %v351_v46, %v338_v63  ;;  %v364_v17 = vadd.f32 %v351_v46, %v340_v6  ;;  %v280_v63 = vld [vmem:[#allocation2 + $0x1] ss:$4 sm:$0xf] }
  0xc6   : > { %v4028_v3 = vpop.permute.xlu1 %674 }
  0xca   : > { %v4046_v24 = vpop.permute.xlu1 %682 }
  0xcb   : > { %6604 = vst [vmem:[#allocation14_spill] sm:$0xff] %v4046_v24 }
  0xcf   : > { %v4051_v36 = vpop.permute.xlu1 %695 }
  0xd3   : > { %v4053_v46 = vpop.permute.xlu1 %703 }
  0xd8   : > { %v4056_v62 = vpop.permute.xlu1 %783 }
 0x104   : > { %v456_v47 = vpop.f32.mrf.mxu0  ;;  %v539_v48 = vpop.f32.mrf.mxu1 }
 0x105   : > { %v4011_v49 = vadd.f32 %v456_v47, %v353_v42  ;;  %v4013_v50 = vadd.f32 %v539_v48, %v355_v43  ;;  %v301_v48 = vpop.permute.xlu0 %300 }
 0x106   : > { %v458_v53 = vpop.f32.mrf.mxu0  ;;  %v541_v54 = vpop.f32.mrf.mxu1 }
 0x107   : > { %v3265_v56 = vmul.f32 -1.442695, %v4011_v49  ;;  %v3267_v57 = vmul.f32 -1.442695, %v4013_v50  ;;  %v4018_v58 = vadd.f32 %v458_v53, %v354_v51  ;;  %v4020_v59 = vadd.f32 %v541_v54, %v356_v52 }
 0x108   : > { %v4022_v60 = vpop.f32.mrf.mxu0  ;;  %v4024_v61 = vpop.f32.mrf.mxu1 }
 0x109   : > { %3489 = vpow2.f32 %v3265_v56  ;;  %v3266_v4 = vmul.f32 -1.442695, %v4018_v58  ;;  %v3268_v5 = vmul.f32 -1.442695, %v4020_v59  ;;  %v333_v56 = vmul.f32 %v3991_v32, %v301_v48  ;;  %v347_v6 = vpop.permute.xlu0 %346 }
 0x10a   : > { %3491 = vpow2.f32 %v3267_v57  ;;  %v4033_v8 = vpop.f32.mrf.mxu0  ;;  %v4035_v10 = vpop.f32.mrf.mxu1  ;;  %v4064_v32 = vrot.slane %v280_v63, %v3988_v30 }
 0x10b   : > { %3493 = vpow2.f32 %v3266_v4 }
 0x10c   : > { %3495 = vpow2.f32 %v3268_v5  ;;  %v468_v12 = vpop.f32.mrf.mxu0  ;;  %v551_v14 = vpop.f32.mrf.mxu1  ;;  %v334_v5 = vmul.f32 %v4003_v40, %v301_v48  ;;  %v4069_v40 = vrot.slane %v280_v63, %v3997_v34 }
 0x10d   : > { %v4037_v15 = vadd.f32 %v468_v12, %v361_v11  ;;  %v4039_v18 = vadd.f32 %v551_v14, %v363_v13  ;;  %v335_v11 = vmul.f32 %v3994_v33, %v301_v48  ;;  %v4061_v12 = vrot.slane %v280_v63, %v3985_v29 }
 0x10e   : > { %v470_v19 = vpop.f32.mrf.mxu0  ;;  %v553_v20 = vpop.f32.mrf.mxu1  ;;  %v357_v13 = vadd.f32 %v347_v6, %v333_v56  ;;  %v358_v33 = vadd.f32 %v347_v6, %v334_v5  ;;  %v3739_v29 = vmov 20  }
 0x10f   : > { %v3273_v21 = vmul.f32 -1.442695, %v4037_v15  ;;  %v4042_v22 = vadd.f32 %v470_v19, %v362_v16  ;;  %v4044_v23 = vadd.f32 %v553_v20, %v364_v17  ;;  %v3275_v25 = vmul.f32 -1.442695, %v4039_v18 }
 0x110   : > { %v336_v16 = vmul.f32 %v4007_v41, %v301_v48  ;;  %v4072_v20 = vadd.f32 %v4022_v60, %v357_v13  ;;  %v4086_v60 = vadd.f32 %v4033_v8, %v358_v33 }
 0x111   : > { %3497 = vpow2.f32 %v3273_v21  ;;  %v3274_v26 = vmul.f32 -1.442695, %v4042_v22  ;;  %v3276_v28 = vmul.f32 -1.442695, %v4044_v23 }
 0x112   : > { %3499 = vpow2.f32 %v3275_v25  ;;  %v4074_v25 = vpop.permute.xlu1 %791 }
 0x113   : > { %3501 = vpow2.f32 %v3274_v26 }
 0x114   : > { %3503 = vpow2.f32 %v3276_v28  ;;  %v359_v28 = vadd.f32 %v347_v6, %v335_v11 }
 0x116   : > { %v3490_v31 = vpop.eup %3489 }
 0x117   : > { %v3492_v37 = vpop.eup %3491  ;;  %v592_v38 = vadd.f32 1.0, %v3490_v31 }
 0x118   : > { %v3494_v39 = vpop.eup %3493  ;;  %v594_v42 = vadd.f32 1.0, %v3492_v37 }
 0x119   : > { %v3496_v43 = vpop.eup %3495  ;;  %3505 = vrcp.f32 %v592_v38  ;;  %v593_v44 = vadd.f32 1.0, %v3494_v39  ;;  %v4090_v39 = vadd.f32 %v4024_v61, %v359_v28  ;;  %v3270_v61 = vmul.f32 -1.442695, %v4086_v60 }
 0x11a   : > { %3507 = vrcp.f32 %v594_v42  ;;  %v595_v45 = vadd.f32 1.0, %v3496_v43 }
 0x11b   : > { %3509 = vrcp.f32 %v593_v44  ;;  %v3271_v48 = vmul.f32 -1.442695, %v4090_v39 }
 0x11c   : > { %3511 = vrcp.f32 %v595_v45  ;;  %v872_v45 = vpop.permute.xlu1 %871 }
 0x11e   : > { %v3498_v47 = vpop.eup %3497 }
 0x11f   : > { %v3500_v51 = vpop.eup %3499  ;;  %v600_v52 = vadd.f32 1.0, %v3498_v47 }
 0x120   : > { %v3502_v53 = vpop.eup %3501  ;;  %v602_v54 = vadd.f32 1.0, %v3500_v51 }
 0x121   : > { %v3504_v55 = vpop.eup %3503  ;;  %3513 = vrcp.f32 %v600_v52  ;;  %v601_v57 = vadd.f32 1.0, %v3502_v53 }
 0x122   : > { %3515 = vrcp.f32 %v602_v54  ;;  %v603_v4 = vadd.f32 1.0, %v3504_v55 }
 0x123   : > { %3517 = vrcp.f32 %v601_v57 }
 0x124   : > { %3519 = vrcp.f32 %v603_v4 }
 0x126   : > { %v3506_v14 = vpop.eup %3505 }
 0x127   : > { %v3508_v17 = vpop.eup %3507  ;;  %v628_v19 = vmul.f32 %v3506_v14, %v4011_v49  ;;  %v4083_v49 = vrot.slane %v280_v63, %v323_v35 }
 0x128   : > { %v3510_v21 = vpop.eup %3509  ;;  %v630_v26 = vmul.f32 %v3508_v17, %v4013_v50  ;;  %v360_v50 = vadd.f32 %v347_v6, %v336_v16 }
 0x129   : > { %v3512_v31 = vpop.eup %3511  ;;  %v4078_v37 = vmul.f32 %v4061_v12, %v628_v19  ;;  %v629_v41 = vmul.f32 %v3510_v21, %v4018_v58  ;;  %v3269_v58 = vmul.f32 -1.442695, %v4072_v20 }
 0x12a   : > { %v631_v38 = vmul.f32 %v3512_v31, %v4020_v59  ;;  %v4093_v42 = vmul.f32 %v4064_v32, %v630_v26  ;;  %v4102_v35 = vadd.f32 %v4035_v10, %v360_v50 }
 0x12b   : > { %6605 = vst [vmem:[#allocation15_spill] sm:$0xff] %v4078_v37  ;;  %v4096_v43 = vmul.f32 %v4069_v40, %v629_v41  ;;  %v706_v27 = vmul.f32 %v4051_v36, %v4078_v37  ;;  %3521 = vpow2.f32 %v3269_v58  ;;  %v794_v5 = vmul.f32 %v4056_v62, %v4078_v37 }
 0x12c   : > { %v4105_v59 = vmul.f32 %v4083_v49, %v631_v38  ;;  %v708_v51 = vmul.f32 %v4051_v36, %v4093_v42  ;;  %v3272_v53 = vmul.f32 -1.442695, %v4102_v35  ;;  %3523 = vpow2.f32 %v3270_v61 }
 0x12d   : > { %6606 = vst [vmem:[#allocation16_spill] sm:$0xff] %v4096_v43  ;;  %730 = vrot.lane.b32.xlu1 %v706_v27, %s3729_s10  ;;  %v707_v8 = vmul.f32 %v4051_v36, %v4096_v43  ;;  %3525 = vpow2.f32 %v3271_v48  ;;  %v882_v14 = vmul.f32 %v872_v45, %v4078_v37  ;;  %v883_v17 = vmul.f32 %v872_v45, %v4096_v43 }
 0x12e   : > { %6607 = vst [vmem:[#allocation17_spill] sm:$0xff] %v4105_v59  ;;  %v3514_v44 = vpop.eup %3513  ;;  %3527 = vpow2.f32 %v3272_v53  ;;  %v797_v11 = vmul.f32 %v4056_v62, %v4105_v59  ;;  %v884_v21 = vmul.f32 %v872_v45, %v4093_v42  ;;  %v885_v31 = vmul.f32 %v872_v45, %v4105_v59 }
 0x12f   : > { %v3516_v47 = vpop.eup %3515  ;;  %v636_v10 = vmul.f32 %v3514_v44, %v4037_v15  ;;  %732 = vrot.lane.b32.xlu0 %v707_v8, %s3729_s10  ;;  %v709_v15 = vmul.f32 %v4051_v36, %v4105_v59  ;;  %v796_v36 = vmul.f32 %v4056_v62, %v4093_v42  ;;  %v3732_v58 = vmov 16  }
 0x130   : > { %v3518_v52 = vpop.eup %3517  ;;  %v638_v54 = vmul.f32 %v3516_v47, %v4039_v18  ;;  %3459 = vset.pattern.permute.xlu0 %v3732_v58 }
 0x131   : > { %v3520_v55 = vpop.eup %3519  ;;  %v4119_v56 = vmul.f32 %v4061_v12, %v636_v10  ;;  %v637_v57 = vmul.f32 %v3518_v52, %v4042_v22  ;;  %734 = vrot.lane.b32.xlu1 %v708_v51, %s3729_s10  ;;  %v4135_v22 = vpop.permute.xlu1 %879 }
 0x132   : > { %v4126_v63 = vmul.f32 %v4064_v32, %v638_v54  ;;  %v639_v4 = vmul.f32 %v3520_v55, %v4044_v23  ;;  %v795_v23 = vmul.f32 %v4056_v62, %v4096_v43 }
 0x133   : > { %6608 = vst [vmem:[#allocation18_spill] sm:$0xff] %v4119_v56  ;;  %v4130_v18 = vmul.f32 %v4069_v40, %v637_v57  ;;  %736 = vrot.lane.b32.xlu0 %v709_v15, %s3729_s10 }
 0x134   : > { %v4138_v6 = vmul.f32 %v4083_v49, %v639_v4 }
 0x135   : > { %818 = vrot.lane.b32.xlu1 %v794_v5, %s3730_s11  ;;  %v960_v13 = vpop.permute.xlu1 %959  ;;  %v4181_v5 = vpop.permute.xlu0 %678 }
 0x136   : > { %v970_v50 = vmul.f32 %v960_v13, %v4078_v37  ;;  %v971_v61 = vmul.f32 %v960_v13, %v4096_v43  ;;  %v972_v44 = vmul.f32 %v960_v13, %v4093_v42  ;;  %v973_v45 = vmul.f32 %v960_v13, %v4105_v59  ;;  %6609 = vst [vmem:[#allocation19_spill] sm:$0xff] %v4181_v5 }
 0x137   : > { %820 = vrot.lane.b32.xlu0 %v795_v23, %s3730_s11 }
 0x138   : > { %v3522_v16 = vpop.eup %3521 }
 0x139   : > { %822 = vrot.lane.b32.xlu1 %v796_v36, %s3730_s11  ;;  %v3524_v19 = vpop.eup %3523  ;;  %v596_v33 = vadd.f32 1.0, %v3522_v16  ;;  %v4155_v28 = vpop.permute.xlu1 %967 }
 0x13a   : > { %v3526_v26 = vpop.eup %3525  ;;  %v597_v62 = vadd.f32 1.0, %v3524_v19 }
 0x13b   : > { %824 = vrot.lane.b32.xlu0 %v797_v11, %s3730_s11  ;;  %v3528_v41 = vpop.eup %3527  ;;  %3529 = vrcp.f32 %v596_v33  ;;  %v598_v38 = vadd.f32 1.0, %v3526_v26  ;;  %v700_v33 = vpop.permute.xlu0 %699 }
 0x13c   : > { %3531 = vrcp.f32 %v597_v62  ;;  %v599_v27 = vadd.f32 1.0, %v3528_v41 }
 0x13d   : > { %906 = vrot.lane.b32.xlu1 %v882_v14, %s3731_s12  ;;  %v1048_v8 = vpop.permute.xlu1 %1047  ;;  %3533 = vrcp.f32 %v598_v38 }
 0x13e   : > { %3535 = vrcp.f32 %v599_v27  ;;  %v1058_v47 = vmul.f32 %v1048_v8, %v4078_v37  ;;  %v1059_v10 = vmul.f32 %v1048_v8, %v4096_v43  ;;  %v1060_v51 = vmul.f32 %v1048_v8, %v4093_v42 }
 0x13f   : > { %908 = vrot.lane.b32.xlu0 %v883_v17, %s3731_s12  ;;  %v1061_v53 = vmul.f32 %v1048_v8, %v4105_v59  ;;  %v788_v62 = vpop.permute.xlu0 %787 }
 0x141   : > { %910 = vrot.lane.b32.xlu1 %v884_v21, %s3731_s12  ;;  %v4170_v48 = vpop.permute.xlu1 %1055 }
 0x143   : > { %912 = vrot.lane.b32.xlu0 %v885_v31, %s3731_s12  ;;  %v876_v38 = vpop.permute.xlu0 %875 }
 0x145   : > { %994 = vrot.lane.b32.xlu1 %v970_v50, %s3733_s13  ;;  %v1136_v55 = vpop.permute.xlu1 %1135 }
 0x146   : > { %v1146_v15 = vmul.f32 %v1136_v55, %v4078_v37  ;;  %v1147_v36 = vmul.f32 %v1136_v55, %v4096_v43  ;;  %v1148_v14 = vmul.f32 %v1136_v55, %v4093_v42  ;;  %v1149_v19 = vmul.f32 %v1136_v55, %v4105_v59 }
 0x147   : > { %996 = vrot.lane.b32.xlu0 %v971_v61, %s3733_s13 }
 0x148   : > { %v3530_v52 = vpop.eup %3529 }
 0x149   : > { %998 = vrot.lane.b32.xlu1 %v972_v44, %s3733_s13  ;;  %v3532_v54 = vpop.eup %3531  ;;  %v632_v57 = vmul.f32 %v3530_v52, %v4072_v20  ;;  %v4192_v16 = vpop.permute.xlu1 %1143 }
 0x14a   : > { %v3534_v4 = vpop.eup %3533  ;;  %v633_v23 = vmul.f32 %v3532_v54, %v4086_v60  ;;  %v964_v44 = vpop.permute.xlu0 %963 }
 0x14b   : > { %1000 = vrot.lane.b32.xlu0 %v973_v45, %s3733_s13  ;;  %v3536_v11 = vpop.eup %3535  ;;  %v4187_v13 = vmul.f32 %v4061_v12, %v632_v57  ;;  %v634_v20 = vmul.f32 %v3534_v4, %v4090_v39 }
 0x14c   : > { %v4195_v17 = vmul.f32 %v4069_v40, %v633_v23  ;;  %v635_v60 = vmul.f32 %v3536_v11, %v4102_v35 }
 0x14d   : > { %1082 = vrot.lane.b32.xlu1 %v1058_v47, %s3734_s14  ;;  %v4201_v12 = vmul.f32 %v4064_v32, %v634_v20  ;;  %v710_v39 = vmul.f32 %v700_v33, %v4187_v13  ;;  %v4210_v35 = vpop.permute.xlu1 %1227  ;;  %v886_v8 = vmul.f32 %v876_v38, %v4187_v13 }
 0x14e   : > { %6610 = vst [vmem:[#allocation20_spill] sm:$0xff] %v4195_v17  ;;  %v4206_v21 = vmul.f32 %v4083_v49, %v635_v60  ;;  %v711_v40 = vmul.f32 %v700_v33, %v4195_v17  ;;  %v798_v49 = vmul.f32 %v788_v62, %v4187_v13  ;;  %v799_v41 = vmul.f32 %v788_v62, %v4195_v17  ;;  %v1052_v52 = vpop.permute.xlu0 %1051 }
 0x14f   : > { %1084 = vrot.lane.b32.xlu0 %v1059_v10, %s3734_s14  ;;  %v712_v26 = vmul.f32 %v700_v33, %v4201_v12  ;;  %v800_v50 = vmul.f32 %v788_v62, %v4201_v12  ;;  %v887_v45 = vmul.f32 %v876_v38, %v4195_v17  ;;  %v888_v47 = vmul.f32 %v876_v38, %v4201_v12 }
 0x150   : > { %6611 = vst [vmem:[#allocation21_spill] sm:$0xff] %v4206_v21  ;;  %v713_v32 = vmul.f32 %v700_v33, %v4206_v21  ;;  %v801_v27 = vmul.f32 %v788_v62, %v4206_v21  ;;  %v975_v54 = vmul.f32 %v964_v44, %v4195_v17  ;;  %v976_v57 = vmul.f32 %v964_v44, %v4201_v12 }
 0x151   : > { %1086 = vrot.lane.b32.xlu1 %v1060_v51, %s3734_s14  ;;  %v4218_v31 = vpop.permute.xlu1 %1319  ;;  %v889_v51 = vmul.f32 %v876_v38, %v4206_v21  ;;  %v977_v4 = vmul.f32 %v964_v44, %v4206_v21  ;;  %v1062_v23 = vmul.f32 %v1052_v52, %v4187_v13  ;;  %v1063_v11 = vmul.f32 %v1052_v52, %v4195_v17 }
 0x152   : > { %v1065_v60 = vmul.f32 %v1052_v52, %v4206_v21  ;;  %v715_v38 = vmul.f32 %v4053_v46, %v4130_v18 }
 0x153   : > { %1088 = vrot.lane.b32.xlu0 %v1061_v53, %s3734_s14  ;;  %v974_v53 = vmul.f32 %v964_v44, %v4187_v13  ;;  %v717_v44 = vmul.f32 %v4053_v46, %v4138_v6 }
 0x155   : > { %1170 = vrot.lane.b32.xlu1 %v1146_v15, %s3735_s15  ;;  %v4226_v61 = vpop.permute.xlu1 %1315  ;;  %v1140_v15 = vpop.permute.xlu0 %1139 }
 0x156   : > { %v1150_v33 = vmul.f32 %v1140_v15, %v4187_v13 }
 0x157   : > { %1172 = vrot.lane.b32.xlu0 %v1147_v36, %s3735_s15 }
 0x159   : > { %1174 = vrot.lane.b32.xlu1 %v1148_v14, %s3735_s15  ;;  %v4234_v10 = vpop.permute.xlu1 %1311  ;;  %v4254_v20 = vpop.permute.xlu0 %1231  ;;  %v1064_v14 = vmul.f32 %v1052_v52, %v4201_v12 }
 0x15b   : > { %1176 = vrot.lane.b32.xlu0 %v1149_v19, %s3735_s15 }
 0x15d   : > { %738 = vrot.lane.b32.xlu1 %v710_v39, %s3729_s10  ;;  %v4242_v55 = vpop.permute.xlu1 %1403  ;;  %v4264_v39 = vpop.permute.xlu0 %1223 }
 0x15f   : > { %740 = vrot.lane.b32.xlu0 %v711_v40, %s3729_s10  ;;  %v1151_v40 = vmul.f32 %v1140_v15, %v4195_v17 }
 0x161   : > { %742 = vrot.lane.b32.xlu1 %v712_v26, %s3729_s10  ;;  %v4250_v36 = vpop.permute.xlu1 %1399  ;;  %v1152_v26 = vmul.f32 %v1140_v15, %v4201_v12 }
 0x163   : > { %744 = vrot.lane.b32.xlu0 %v713_v32, %s3729_s10  ;;  %v1153_v32 = vmul.f32 %v1140_v15, %v4206_v21 }
 0x165   : > { %826 = vrot.lane.b32.xlu1 %v798_v49, %s3730_s11  ;;  %v4260_v19 = vpop.permute.xlu1 %1491  ;;  %v4274_v49 = vpop.permute.xlu0 %1407 }
 0x167   : > { %828 = vrot.lane.b32.xlu0 %v799_v41, %s3730_s11  ;;  %v714_v41 = vmul.f32 %v4053_v46, %v4119_v56 }
 0x169   : > { %830 = vrot.lane.b32.xlu1 %v800_v50, %s3730_s11  ;;  %v4270_v62 = vpop.permute.xlu1 %1487 }
 0x16b   : > { %832 = vrot.lane.b32.xlu0 %v801_v27, %s3730_s11  ;;  %v716_v27 = vmul.f32 %v4053_v46, %v4126_v63  ;;  %v805_v46 = vmul.f32 %v4074_v25, %v4138_v6 }
 0x16d   : > { %914 = vrot.lane.b32.xlu1 %v886_v8, %s3731_s12  ;;  %v4282_v50 = vpop.permute.xlu1 %1579  ;;  %v4287_v8 = vpop.permute.xlu0 %1495 }
 0x16f   : > { %916 = vrot.lane.b32.xlu0 %v887_v45, %s3731_s12  ;;  %v802_v45 = vmul.f32 %v4074_v25, %v4119_v56 }
 0x171   : > { %918 = vrot.lane.b32.xlu1 %v888_v47, %s3731_s12  ;;  %v4295_v47 = vpop.permute.xlu1 %1575  ;;  %v4300_v52 = vpop.permute.xlu0 %1583 }
 0x173   : > { %920 = vrot.lane.b32.xlu0 %v889_v51, %s3731_s12  ;;  %v803_v51 = vmul.f32 %v4074_v25, %v4130_v18 }
 0x175   : > { %1002 = vrot.lane.b32.xlu1 %v974_v53, %s3733_s13  ;;  %v804_v53 = vmul.f32 %v4074_v25, %v4126_v63  ;;  %v4313_v15 = vpop.permute.xlu0 %1671  ;;  %v892_v25 = vmul.f32 %v4135_v22, %v4126_v63 }
 0x177   : > { %1004 = vrot.lane.b32.xlu0 %v975_v54, %s3733_s13  ;;  %v4308_v54 = vpop.permute.xlu1 %1667 }
 0x179   : > { %1006 = vrot.lane.b32.xlu1 %v976_v57, %s3733_s13  ;;  %v890_v57 = vmul.f32 %v4135_v22, %v4119_v56 }
 0x17b   : > { %1008 = vrot.lane.b32.xlu0 %v977_v4, %s3733_s13  ;;  %v891_v4 = vmul.f32 %v4135_v22, %v4130_v18 }
 0x17d   : > { %1090 = vrot.lane.b32.xlu1 %v1062_v23, %s3734_s14 }
 0x17f   : > { %1092 = vrot.lane.b32.xlu0 %v1063_v11, %s3734_s14 }
 0x181   : > { %1094 = vrot.lane.b32.xlu1 %v1064_v14, %s3734_s14  ;;  %v893_v14 = vmul.f32 %v4135_v22, %v4138_v6  ;;  %v980_v22 = vmul.f32 %v4155_v28, %v4126_v63 }
 0x183   : > { %1096 = vrot.lane.b32.xlu0 %v1065_v60, %s3734_s14 }
 0x185   : > { %1178 = vrot.lane.b32.xlu1 %v1150_v33, %s3735_s15  ;;  %v978_v33 = vmul.f32 %v4155_v28, %v4119_v56 }
 0x187   : > { %1180 = vrot.lane.b32.xlu0 %v1151_v40, %s3735_s15 }
 0x189   : > { %1182 = vrot.lane.b32.xlu1 %v1152_v26, %s3735_s15  ;;  %v979_v26 = vmul.f32 %v4155_v28, %v4130_v18 }
 0x18b   : > { %1184 = vrot.lane.b32.xlu0 %v1153_v32, %s3735_s15 }
 0x18d   : > { %746 = vrot.lane.b32.xlu1 %v714_v41, %s3729_s10 }
 0x18f   : > { %748 = vrot.lane.b32.xlu0 %v715_v38, %s3729_s10  ;;  %v981_v38 = vmul.f32 %v4155_v28, %v4138_v6  ;;  %v1068_v28 = vmul.f32 %v4170_v48, %v4126_v63 }
 0x191   : > { %750 = vrot.lane.b32.xlu1 %v716_v27, %s3729_s10 }
 0x193   : > { %752 = vrot.lane.b32.xlu0 %v717_v44, %s3729_s10  ;;  %v1066_v44 = vmul.f32 %v4170_v48, %v4119_v56  ;;  %s3750_s10 = smov 88  }
 0x195   : > { %834 = vrot.lane.b32.xlu1 %v802_v45, %s3730_s11 }
 0x197   : > { %836 = vrot.lane.b32.xlu0 %v803_v51, %s3730_s11  ;;  %v1067_v51 = vmul.f32 %v4170_v48, %v4130_v18 }
 0x199   : > { %838 = vrot.lane.b32.xlu1 %v804_v53, %s3730_s11 }
 0x19b   : > { %840 = vrot.lane.b32.xlu0 %v805_v46, %s3730_s11  ;;  %s3751_s11 = smov 87  }
 0x19d   : > { %922 = vrot.lane.b32.xlu1 %v890_v57, %s3731_s12  ;;  %v1069_v57 = vmul.f32 %v4170_v48, %v4138_v6  ;;  %v1156_v48 = vmul.f32 %v4192_v16, %v4126_v63 }
 0x19f   : > { %924 = vrot.lane.b32.xlu0 %v891_v4, %s3731_s12  ;;  %v4319_v23 = vpop.permute.xlu1 %730 }
 0x1a1   : > { %v4323_v11 = vpop.permute.xlu0 %732  ;;  %926 = vrot.lane.b32.xlu1 %v892_v25, %s3731_s12  ;;  %v1154_v25 = vmul.f32 %v4192_v16, %v4119_v56 }
 0x1a3   : > { %928 = vrot.lane.b32.xlu0 %v893_v14, %s3731_s12  ;;  %v4329_v60 = vpop.permute.xlu1 %734 }
 0x1a5   : > { %v4333_v40 = vpop.permute.xlu0 %736  ;;  %1010 = vrot.lane.b32.xlu1 %v978_v33, %s3733_s13  ;;  %v1155_v33 = vmul.f32 %v4192_v16, %v4130_v18 }
 0x1a7   : > { %1012 = vrot.lane.b32.xlu0 %v979_v26, %s3733_s13  ;;  %v4339_v32 = vpop.permute.xlu1 %818 }
 0x1a8   : > { %6612 = vst [vmem:[#allocation22_spill] sm:$0xff] %v4339_v32 }
 0x1a9   : > { %v4343_v41 = vpop.permute.xlu0 %820  ;;  %1014 = vrot.lane.b32.xlu1 %v980_v22, %s3733_s13 }
 0x1aa   : > { %6613 = vst [vmem:[#allocation23_spill] sm:$0xff] %v4343_v41 }
 0x1ab   : > { %1016 = vrot.lane.b32.xlu0 %v981_v38, %s3733_s13  ;;  %v4349_v27 = vpop.permute.xlu1 %822  ;;  %s3752_s13 = smov 86  }
 0x1ac   : > { %6614 = vst [vmem:[#allocation24_spill] sm:$0xff] %v4349_v27 }
 0x1ad   : > { %v4353_v45 = vpop.permute.xlu0 %824  ;;  %1098 = vrot.lane.b32.xlu1 %v1066_v44, %s3734_s14 }
 0x1ae   : > { %6615 = vst [vmem:[#allocation25_spill] sm:$0xff] %v4353_v45 }
 0x1af   : > { %1100 = vrot.lane.b32.xlu0 %v1067_v51, %s3734_s14  ;;  %v4359_v53 = vpop.permute.xlu1 %906  ;;  %v3736_v51 = vmov 17  }
 0x1b0   : > { %6616 = vst [vmem:[#allocation26_spill] sm:$0xff] %v4359_v53 }
 0x1b1   : > { %v4363_v46 = vpop.permute.xlu0 %908  ;;  %1102 = vrot.lane.b32.xlu1 %v1068_v28, %s3734_s14 }
 0x1b2   : > { %6617 = vst [vmem:[#allocation27_spill] sm:$0xff] %v4363_v46 }
 0x1b3   : > { %1104 = vrot.lane.b32.xlu0 %v1069_v57, %s3734_s14  ;;  %v4369_v4 = vpop.permute.xlu1 %910  ;;  %s3753_s14 = smov 85  }
 0x1b4   : > { %6618 = vst [vmem:[#allocation28_spill] sm:$0xff] %v4369_v4  ;;  %v1506_v4 = vmul.f32 %v4287_v8, %v4119_v56 }
 0x1b5   : > { %v4373_v14 = vpop.permute.xlu0 %912  ;;  %1186 = vrot.lane.b32.xlu1 %v1154_v25, %s3735_s15 }
 0x1b6   : > { %6619 = vst [vmem:[#allocation29_spill] sm:$0xff] %v4373_v14  ;;  %v1683_v14 = vmul.f32 %v4313_v15, %v4130_v18 }
 0x1b7   : > { %1188 = vrot.lane.b32.xlu0 %v1155_v33, %s3735_s15  ;;  %v4379_v26 = vpop.permute.xlu1 %994  ;;  %v3737_v33 = vmov 18  }
 0x1b8   : > { %6620 = vst [vmem:[#allocation30_spill] sm:$0xff] %v4379_v26 }
 0x1b9   : > { %v4383_v22 = vpop.permute.xlu0 %996  ;;  %1190 = vrot.lane.b32.xlu1 %v1156_v48, %s3735_s15 }
 0x1ba   : > { %6621 = vst [vmem:[#allocation31_spill] sm:$0xff] %v4383_v22 }
 0x1bb   : > { %1759 = vperm.xlu0 %3459, %v3906_v2   ;;  %v4387_v38 = vpop.permute.xlu1 %998 }
 0x1bc   : > { %6622 = vst [vmem:[#allocation32_spill] sm:$0xff] %v4387_v38 }
 0x1bd   : > { %v4389_v44 = vpop.permute.xlu0 %1000  ;;  %1663 = vperm.xlu1 %3458, %v3912_v7  }
 0x1be   : > { %6623 = vst [vmem:[#allocation33_spill] sm:$0xff] %v4389_v44 }
 0x1bf   : > { %3461 = vset.pattern.permute.xlu0 %v3736_v51  ;;  %v4392_v28 = vpop.permute.xlu1 %1082 }
 0x1c0   : > { %6624 = vst [vmem:[#allocation34_spill] sm:$0xff] %v4392_v28  ;;  %1847 = vperm.xlu0 %3461, %v3906_v2   ;;  %v6468_v28 = vmov 26  }
 0x1c1   : > { %v4395_v57 = vpop.permute.xlu0 %1084  ;;  %3460 = vset.pattern.permute.xlu1 %v3732_v58 }
 0x1c2   : > { %6625 = vst [vmem:[#allocation35_spill] sm:$0xff] %v4395_v57  ;;  %1755 = vperm.xlu1 %3460, %v3923_v9  }
 0x1c3   : > { %v4399_v25 = vpop.permute.xlu1 %1086 }
 0x1c4   : > { %6626 = vst [vmem:[#allocation36_spill] sm:$0xff] %v4399_v25  ;;  %3463 = vset.pattern.permute.xlu0 %v3737_v33 }
 0x1c5   : > { %1935 = vperm.xlu0 %3463, %v3906_v2   ;;  %v4402_v48 = vpop.permute.xlu0 %1088 }
 0x1c6   : > { %6627 = vst [vmem:[#allocation37_spill] sm:$0xff] %v4402_v48  ;;  %1751 = vperm.xlu1 %3460, %v3912_v7  }
 0x1c7   : > { %v4405_v1 = vpop.permute.xlu1 %1170 }
 0x1c8   : > { %6628 = vst [vmem:[#allocation38_spill] sm:$0xff] %v4405_v1 }
 0x1c9   : > { %3465 = vset.pattern.permute.xlu0 %v3738_v0  ;;  %v4407_v30 = vpop.permute.xlu0 %1172 }
 0x1ca   : > { %6629 = vst [vmem:[#allocation39_spill] sm:$0xff] %v4407_v30  ;;  %2023 = vperm.xlu0 %3465, %v3906_v2   ;;  %3462 = vset.pattern.permute.xlu1 %v3736_v51  ;;  %v3740_v30 = vmov 21  }
 0x1cb   : > { %1843 = vperm.xlu1 %3462, %v3923_v9   ;;  %v4411_v58 = vpop.permute.xlu1 %1174 }
 0x1cc   : > { %6630 = vst [vmem:[#allocation40_spill] sm:$0xff] %v4411_v58  ;;  %v3581_v58 = vld [vmem:[%s6445_s4 + $0x10] sm:$0xff] }
 0x1cd   : > { %v4413_v34 = vpop.permute.xlu0 %1176 }
 0x1ce   : > { %6631 = vst [vmem:[#allocation41_spill] sm:$0xff] %v4413_v34  ;;  %3467 = vset.pattern.permute.xlu0 %v3739_v29 }
 0x1cf   : > { %2111 = vperm.xlu0 %3467, %v3906_v2   ;;  %1839 = vperm.xlu1 %3462, %v3912_v7   ;;  %v4417_v48 = vpop.permute.xlu1 %738  ;;  %v3741_v7 = vmov 22  }
 0x1d0   : > { %6632 = vst [vmem:[#allocation42_spill] sm:$0xff] %v4417_v48  ;;  %v4434_v48 = vld [vmem:[%s6445_s4] sm:$0xff] }
 0x1d1   : > { %v4419_v1 = vpop.permute.xlu0 %740 }
 0x1d2   : > { %6633 = vst [vmem:[#allocation43_spill] sm:$0xff] %v4419_v1 }
 0x1d3   : > { %3469 = vset.pattern.permute.xlu0 %v3740_v30  ;;  %3464 = vset.pattern.permute.xlu1 %v3737_v33  ;;  %v4421_v51 = vpop.permute.xlu1 %742 }
 0x1d4   : > { %6634 = vst [vmem:[#allocation44_spill] sm:$0xff] %v4421_v51  ;;  %2199 = vperm.xlu0 %3469, %v3581_v58   ;;  %1931 = vperm.xlu1 %3464, %v3923_v9   ;;  %v3742_v9 = vmov 23  }
 0x1d5   : > { %v4427_v34 = vpop.permute.xlu0 %744 }
 0x1d6   : > { %6635 = vst [vmem:[#allocation45_spill] sm:$0xff] %v4427_v34 }
 0x1d7   : > { %v4429_v2 = vpop.permute.xlu1 %826 }
 0x1d8   : > { %6636 = vst [vmem:[#allocation46_spill] sm:$0xff] %v4429_v2  ;;  %3471 = vset.pattern.permute.xlu0 %v3741_v7  ;;  %1927 = vperm.xlu1 %3464, %v4434_v48   ;;  %v4446_v2 = vld [vmem:[%s6445_s4 + $0x8] sm:$0xff] }
 0x1d9   : > { %2287 = vperm.xlu0 %3471, %v3581_v58   ;;  %v4437_v33 = vpop.permute.xlu0 %828 }
 0x1da   : > { %6637 = vst [vmem:[#allocation47_spill] sm:$0xff] %v4437_v33  ;;  %v3743_v33 = vmov 24  }
 0x1db   : > { %v4439_v1 = vpop.permute.xlu1 %830 }
 0x1dc   : > { %6638 = vst [vmem:[#allocation48_spill] sm:$0xff] %v4439_v1  ;;  %3466 = vset.pattern.permute.xlu1 %v3738_v0 }
 0x1dd   : > { %3473 = vset.pattern.permute.xlu0 %v3742_v9  ;;  %v4441_v51 = vpop.permute.xlu0 %832  ;;  %2019 = vperm.xlu1 %3466, %v4446_v2  }
 0x1de   : > { %6639 = vst [vmem:[#allocation49_spill] sm:$0xff] %v4441_v51  ;;  %2375 = vperm.xlu0 %3473, %v3581_v58   ;;  %v3744_v51 = vmov 25  }
 0x1df   : > { %v4449_v34 = vpop.permute.xlu1 %914 }
 0x1e0   : > { %6640 = vst [vmem:[#allocation50_spill] sm:$0xff] %v4449_v34 }
 0x1e1   : > { %v4451_v25 = vpop.permute.xlu0 %916  ;;  %2015 = vperm.xlu1 %3466, %v4434_v48  }
 0x1e2   : > { %6641 = vst [vmem:[#allocation51_spill] sm:$0xff] %v4451_v25  ;;  %3475 = vset.pattern.permute.xlu0 %v3743_v33 }
 0x1e3   : > { %2463 = vperm.xlu0 %3475, %v3581_v58   ;;  %v4454_v0 = vpop.permute.xlu1 %918 }
 0x1e4   : > { %6642 = vst [vmem:[#allocation52_spill] sm:$0xff] %v4454_v0 }
 0x1e5   : > { %v4456_v1 = vpop.permute.xlu0 %920  ;;  %3468 = vset.pattern.permute.xlu1 %v3739_v29 }
 0x1e6   : > { %6643 = vst [vmem:[#allocation53_spill] sm:$0xff] %v4456_v1  ;;  %2107 = vperm.xlu1 %3468, %v4446_v2   ;;  %v6469_v1 = vmov 27  }
 0x1e7   : > { %3477 = vset.pattern.permute.xlu0 %v3744_v51  ;;  %v4459_v44 = vpop.permute.xlu1 %1002 }
 0x1e8   : > { %6644 = vst [vmem:[#allocation54_spill] sm:$0xff] %v4459_v44  ;;  %2551 = vperm.xlu0 %3477, %v3581_v58  }
 0x1e9   : > { %v4461_v34 = vpop.permute.xlu0 %1004 }
 0x1ea   : > { %6645 = vst [vmem:[#allocation55_spill] sm:$0xff] %v4461_v34  ;;  %2103 = vperm.xlu1 %3468, %v4434_v48  }
 0x1eb   : > { %v4464_v25 = vpop.permute.xlu1 %1006 }
 0x1ec   : > { %6646 = vst [vmem:[#allocation56_spill] sm:$0xff] %v4464_v25  ;;  %3479 = vset.pattern.permute.xlu0 %v6468_v28  ;;  %v1244_v28 = vmul.f32 %v4254_v20, %v4126_v63 }
 0x1ed   : > { %2639 = vperm.xlu0 %3479, %v3581_v58   ;;  %v4467_v0 = vpop.permute.xlu0 %1008 }
 0x1ee   : > { %6647 = vst [vmem:[#allocation57_spill] sm:$0xff] %v4467_v0  ;;  %3470 = vset.pattern.permute.xlu1 %v3740_v30  ;;  %v1324_v0 = vmul.f32 %v4234_v10, %v4093_v42 }
 0x1ef   : > { %2195 = vperm.xlu1 %3470, %v4446_v2   ;;  %v4470_v29 = vpop.permute.xlu1 %1090 }
 0x1f0   : > { %6648 = vst [vmem:[#allocation58_spill] sm:$0xff] %v4470_v29  ;;  %v1239_v29 = vmul.f32 %v4210_v35, %v4195_v17 }
 0x1f1   : > { %3481 = vset.pattern.permute.xlu0 %v6469_v1  ;;  %v4473_v44 = vpop.permute.xlu0 %1092 }
 0x1f2   : > { %6649 = vst [vmem:[#allocation59_spill] sm:$0xff] %v4473_v44  ;;  %2727 = vperm.xlu0 %3481, %v3581_v58  }
 0x1f3   : > { %2191 = vperm.xlu1 %3470, %v4434_v48   ;;  %v4476_v34 = vpop.permute.xlu1 %1094 }
 0x1f4   : > { %6650 = vst [vmem:[#allocation60_spill] sm:$0xff] %v4476_v34 }
 0x1f5   : > { %v4478_v25 = vpop.permute.xlu0 %1096 }
 0x1f6   : > { %6651 = vst [vmem:[#allocation61_spill] sm:$0xff] %v4478_v25  ;;  %2719 = vperm.xlu0 %3481, %v4434_v48  }
 0x1f7   : > { %3472 = vset.pattern.permute.xlu1 %v3741_v7  ;;  %v4481_v30 = vpop.permute.xlu1 %1178 }
 0x1f8   : > { %6652 = vst [vmem:[#allocation62_spill] sm:$0xff] %v4481_v30  ;;  %2283 = vperm.xlu1 %3472, %v4446_v2  }
 0x1f9   : > { %v4486_v1 = vpop.permute.xlu0 %1180 }
 0x1fa   : > { %6653 = vst [vmem:[#allocation63_spill] sm:$0xff] %v4486_v1  ;;  %1278 = vrot.lane.b32.xlu0 %v1244_v28, %s3747_s28  ;;  %v1331_v1 = vmul.f32 %v4218_v31, %v4130_v18 }
 0x1fb   : > { %v4489_v58 = vpop.permute.xlu1 %1182 }
 0x1fc   : > { %6654 = vst [vmem:[#allocation64_spill] sm:$0xff] %v4489_v58  ;;  %2279 = vperm.xlu1 %3472, %v4434_v48   ;;  %v1238_v58 = vmul.f32 %v4210_v35, %v4187_v13 }
 0x1fd   : > { %v4494_v7 = vpop.permute.xlu0 %1184 }
 0x1fe   : > { %6655 = vst [vmem:[#allocation65_spill] sm:$0xff] %v4494_v7  ;;  %1268 = vrot.lane.b32.xlu0 %v1239_v29, %s3747_s28  ;;  %v1157_v29 = vmul.f32 %v4192_v16, %v4138_v6  ;;  %v1328_v16 = vmul.f32 %v4226_v61, %v4201_v12 }
 0x1ff   : > { %v4497_v30 = vpop.permute.xlu1 %746 }
 0x200   : > { %6656 = vst [vmem:[#allocation66_spill] sm:$0xff] %v4497_v30  ;;  %3474 = vset.pattern.permute.xlu1 %v3742_v9 }
 0x201   : > { %v4501_v44 = vpop.permute.xlu0 %748  ;;  %2371 = vperm.xlu1 %3474, %v4446_v2  }
 0x202   : > { %6657 = vst [vmem:[#allocation67_spill] sm:$0xff] %v4501_v44  ;;  %1364 = vrot.lane.b32.xlu0 %v1331_v1, %s3748_s29 }
 0x203   : > { %v4505_v28 = vpop.permute.xlu1 %750 }
 0x204   : > { %6658 = vst [vmem:[#allocation68_spill] sm:$0xff] %v4505_v28 }
 0x205   : > { %v4509_v7 = vpop.permute.xlu0 %752  ;;  %2367 = vperm.xlu1 %3474, %v4434_v48  }
 0x206   : > { %6659 = vst [vmem:[#allocation69_spill] sm:$0xff] %v4509_v7  ;;  %1266 = vrot.lane.b32.xlu0 %v1238_v58, %s3747_s28  ;;  %v1236_v7 = vmul.f32 %v4264_v39, %v4093_v42 }
 0x207   : > { %v4513_v9 = vpop.permute.xlu1 %834 }
 0x208   : > { %6660 = vst [vmem:[#allocation70_spill] sm:$0xff] %v4513_v9 }
 0x209   : > { %v4517_v34 = vpop.permute.xlu0 %836  ;;  %3476 = vset.pattern.permute.xlu1 %v3743_v33 }
 0x20a   : > { %6661 = vst [vmem:[#allocation71_spill] sm:$0xff] %v4517_v34  ;;  %1192 = vrot.lane.b32.xlu0 %v1157_v29, %s3735_s15  ;;  %2459 = vperm.xlu1 %3476, %v4446_v2   ;;  %s3754_s15 = smov 84  }
 0x20b   : > { %v4521_v1 = vpop.permute.xlu1 %838 }
 0x20c   : > { %6662 = vst [vmem:[#allocation72_spill] sm:$0xff] %v4521_v1 }
 0x20d   : > { %v4525_v28 = vpop.permute.xlu0 %840 }
 0x20e   : > { %6663 = vst [vmem:[#allocation73_spill] sm:$0xff] %v4525_v28  ;;  %1262 = vrot.lane.b32.xlu0 %v1236_v7, %s3747_s28  ;;  %2455 = vperm.xlu1 %3476, %v4434_v48   ;;  %v1420_v28 = vmul.f32 %v4274_v49, %v4126_v63 }
 0x20f   : > { %v4529_v58 = vpop.permute.xlu1 %922 }
 0x210   : > { %6664 = vst [vmem:[#allocation74_spill] sm:$0xff] %v4529_v58 }
 0x211   : > { %v4533_v33 = vpop.permute.xlu0 %924 }
 0x212   : > { %6665 = vst [vmem:[#allocation75_spill] sm:$0xff] %v4533_v33  ;;  %1358 = vrot.lane.b32.xlu0 %v1328_v16, %s3748_s29  ;;  %3478 = vset.pattern.permute.xlu1 %v3744_v51  ;;  %v1326_v16 = vmul.f32 %v4226_v61, %v4187_v13 }
 0x213   : > { %2547 = vperm.xlu1 %3478, %v4446_v2   ;;  %v4537_v29 = vpop.permute.xlu1 %926 }
 0x214   : > { %6666 = vst [vmem:[#allocation76_spill] sm:$0xff] %v4537_v29  ;;  %v6670_v29 = vmov 26  }
 0x215   : > { %v4541_v7 = vpop.permute.xlu0 %928 }
 0x216   : > { %6667 = vst [vmem:[#allocation77_spill] sm:$0xff] %v4541_v7  ;;  %1454 = vrot.lane.b32.xlu0 %v1420_v28, %s3749_s9  ;;  %v1245_v28 = vmul.f32 %v4254_v20, %v4138_v6 }
 0x217   : > { %2543 = vperm.xlu1 %3478, %v4434_v48   ;;  %v4545_v1 = vpop.permute.xlu1 %1010 }
 0x218   : > { %6668 = vst [vmem:[#allocation78_spill] sm:$0xff] %v4545_v1 }
 0x219   : > { %v4549_v51 = vpop.permute.xlu0 %1012 }
 0x21a   : > { %6669 = vst [vmem:[#allocation79_spill] sm:$0xff] %v4549_v51  ;;  %1354 = vrot.lane.b32.xlu0 %v1326_v16, %s3748_s29  ;;  %v1416_v16 = vmul.f32 %v4242_v55, %v4201_v12 }
 0x21b   : > { %3480 = vset.pattern.permute.xlu1 %v6670_v29  ;;  %v4553_v25 = vpop.permute.xlu1 %1014  ;;  %v6674_v29 = vmov 27  }
 0x21c   : > { %6671 = vst [vmem:[#allocation80_spill] sm:$0xff] %v4553_v25  ;;  %2635 = vperm.xlu1 %3480, %v4446_v2  }
 0x21d   : > { %v4559_v7 = vpop.permute.xlu0 %1016 }
 0x21e   : > { %1280 = vrot.lane.b32.xlu0 %v1245_v28, %s3747_s28  ;;  %6672 = vst [vmem:[#allocation81_spill] sm:$0xff] %v4559_v7  ;;  %v1508_v7 = vmul.f32 %v4287_v8, %v4126_v63 }
 0x21f   : > { %v4564_v1 = vpop.permute.xlu1 %1098 }
 0x220   : > { %2631 = vperm.xlu1 %3480, %v4434_v48   ;;  %6673 = vst [vmem:[#allocation82_spill] sm:$0xff] %v4564_v1  ;;  %v1243_v48 = vmul.f32 %v4254_v20, %v4130_v18 }
 0x221   : > { %v4571_v25 = vpop.permute.xlu0 %1100 }
 0x222   : > { %1350 = vrot.lane.b32.xlu0 %v1324_v0, %s3748_s29  ;;  %6675 = vst [vmem:[#allocation83_spill] sm:$0xff] %v4571_v25 }
 0x223   : > { %v4576_v28 = vpop.permute.xlu1 %1102 }
 0x224   : > { %3482 = vset.pattern.permute.xlu1 %v6674_v29  ;;  %6676 = vst [vmem:[#allocation84_spill] sm:$0xff] %v4576_v28  ;;  %v1414_v29 = vmul.f32 %v4242_v55, %v4187_v13 }
 0x225   : > { %2723 = vperm.xlu1 %3482, %v4446_v2   ;;  %v1242_v2 = vmul.f32 %v4254_v20, %v4119_v56  ;;  %v4584_v0 = vpop.permute.xlu0 %1104 }
 0x226   : > { %1446 = vrot.lane.b32.xlu0 %v1416_v16, %s3749_s9  ;;  %6677 = vst [vmem:[#allocation85_spill] sm:$0xff] %v4584_v0  ;;  %v1332_v0 = vmul.f32 %v4218_v31, %v4126_v63 }
 0x227   : > { %v4589_v16 = vpop.permute.xlu1 %1186 }
 0x228   : > { %6678 = vst [vmem:[#allocation86_spill] sm:$0xff] %v4589_v16 }
 0x229   : > { %1276 = vrot.lane.b32.xlu1 %v1243_v48, %s3747_s28  ;;  %v1240_v48 = vmul.f32 %v4210_v35, %v4201_v12  ;;  %v4597_v20 = vpop.permute.xlu0 %1188 }
 0x22a   : > { %1542 = vrot.lane.b32.xlu0 %v1508_v7, %s3750_s10  ;;  %v1241_v7 = vmul.f32 %v4210_v35, %v4206_v21  ;;  %6679 = vst [vmem:[#allocation87_spill] sm:$0xff] %v4597_v20  ;;  %v1330_v35 = vmul.f32 %v4218_v31, %v4119_v56 }
 0x22d   : > { %1274 = vrot.lane.b32.xlu1 %v1242_v2, %s3747_s28  ;;  %v4602_v2 = vpop.permute.xlu1 %1190 }
 0x22e   : > { %1442 = vrot.lane.b32.xlu0 %v1414_v29, %s3749_s9  ;;  %6680 = vst [vmem:[#allocation88_spill] sm:$0xff] %v4602_v2  ;;  %v1411_v29 = vmul.f32 %v4250_v36, %v4096_v43 }
 0x231   : > { %1270 = vrot.lane.b32.xlu1 %v1240_v48, %s3747_s28 }
 0x232   : > { %1272 = vrot.lane.b32.xlu0 %v1241_v7, %s3747_s28  ;;  %v1503_v7 = vmul.f32 %v4260_v19, %v4195_v17 }
 0x235   : > { %1366 = vrot.lane.b32.xlu1 %v1332_v0, %s3748_s29  ;;  %v1235_v0 = vmul.f32 %v4264_v39, %v4096_v43 }
 0x236   : > { %v4607_v28 = vpop.permute.xlu0 %1759  ;;  %1436 = vrot.lane.b32.xlu0 %v1411_v29, %s3749_s9  ;;  %v1595_v29 = vmul.f32 %v4300_v52, %v4130_v18 }
 0x238   : > { %v4612_v48 = vpop.permute.xlu1 %1663 }
 0x239   : > { %1362 = vrot.lane.b32.xlu1 %v1330_v35, %s3748_s29  ;;  %v1327_v35 = vmul.f32 %v4226_v61, %v4195_v17 }
 0x23a   : > { %1532 = vrot.lane.b32.xlu0 %v1503_v7, %s3750_s10  ;;  %v1410_v7 = vmul.f32 %v4250_v36, %v4078_v37 }
 0x23b   : > { %v4618_v2 = vpop.permute.xlu0 %1847 }
 0x23d   : > { %1260 = vrot.lane.b32.xlu1 %v1235_v0, %s3747_s28  ;;  %v4625_v16 = vpop.permute.xlu1 %1755  ;;  %v1419_v0 = vmul.f32 %v4274_v49, %v4130_v18 }
 0x23e   : > { %1628 = vrot.lane.b32.xlu0 %v1595_v29, %s3751_s11  ;;  %v1594_v29 = vmul.f32 %v4300_v52, %v4119_v56 }
 0x240   : > { %v4630_v20 = vpop.permute.xlu0 %1935 }
 0x241   : > { %1356 = vrot.lane.b32.xlu1 %v1327_v35, %s3748_s29  ;;  %v4635_v1 = vpop.permute.xlu1 %1751  ;;  %v1234_v35 = vmul.f32 %v4264_v39, %v4078_v37 }
 0x242   : > { %1434 = vrot.lane.b32.xlu0 %v1410_v7, %s3749_s9  ;;  %v1329_v7 = vmul.f32 %v4226_v61, %v4206_v21 }
 0x245   : > { %v4642_v25 = vpop.permute.xlu0 %2023  ;;  %1452 = vrot.lane.b32.xlu1 %v1419_v0, %s3749_s9  ;;  %v1418_v0 = vmul.f32 %v4274_v49, %v4119_v56 }
 0x246   : > { %1626 = vrot.lane.b32.xlu0 %v1594_v29, %s3751_s11  ;;  %v4646_v51 = vpop.permute.xlu1 %1843  ;;  %v1499_v29 = vmul.f32 %v4270_v62, %v4096_v43 }
 0x249   : > { %1258 = vrot.lane.b32.xlu1 %v1234_v35, %s3747_s28  ;;  %v1323_v35 = vmul.f32 %v4234_v10, %v4096_v43 }
 0x24a   : > { %v4653_v57 = vpop.permute.xlu0 %2111  ;;  %1360 = vrot.lane.b32.xlu0 %v1329_v7, %s3748_s29  ;;  %v4656_v38 = vpop.permute.xlu1 %1839  ;;  %v1591_v7 = vmul.f32 %v4282_v50, %v4195_v17 }
 0x24d   : > { %1450 = vrot.lane.b32.xlu1 %v1418_v0, %s3749_s9  ;;  %v1415_v0 = vmul.f32 %v4242_v55, %v4195_v17 }
 0x24e   : > { %1524 = vrot.lane.b32.xlu0 %v1499_v29, %s3750_s10 }
 0x24f   : > { %v4664_v58 = vpop.permute.xlu0 %2199  ;;  %v4666_v61 = vpop.permute.xlu1 %1931 }
 0x251   : > { %1348 = vrot.lane.b32.xlu1 %v1323_v35, %s3748_s29  ;;  %v1507_v35 = vmul.f32 %v4287_v8, %v4130_v18 }
 0x252   : > { %1620 = vrot.lane.b32.xlu0 %v1591_v7, %s3751_s11  ;;  %v1498_v7 = vmul.f32 %v4270_v62, %v4078_v37 }
 0x253   : > { %v4674_v33 = vpop.permute.xlu1 %1927 }
 0x254   : > { %v4678_v29 = vpop.permute.xlu0 %2287 }
 0x255   : > { %1444 = vrot.lane.b32.xlu1 %v1415_v0, %s3749_s9  ;;  %v1322_v0 = vmul.f32 %v4234_v10, %v4078_v37 }
 0x256   : > { %1716 = vrot.lane.b32.xlu0 %v1683_v14, %s3752_s13  ;;  %v1682_v14 = vmul.f32 %v4313_v15, %v4119_v56 }
 0x258   : > { %v4686_v26 = vpop.permute.xlu1 %2019 }
 0x259   : > { %v4690_v22 = vpop.permute.xlu0 %2375  ;;  %1540 = vrot.lane.b32.xlu1 %v1507_v35, %s3750_s10  ;;  %v1417_v35 = vmul.f32 %v4242_v55, %v4206_v21  ;;  %v1412_v55 = vmul.f32 %v4250_v36, %v4093_v42 }
 0x25a   : > { %1522 = vrot.lane.b32.xlu0 %v1498_v7, %s3750_s10 }
 0x25c   : > { %v4696_v9 = vpop.permute.xlu1 %2015 }
 0x25d   : > { %1346 = vrot.lane.b32.xlu1 %v1322_v0, %s3748_s29  ;;  %v1333_v0 = vmul.f32 %v4218_v31, %v4138_v6 }
 0x25e   : > { %v4701_v34 = vpop.permute.xlu0 %2463  ;;  %1714 = vrot.lane.b32.xlu0 %v1682_v14, %s3752_s13  ;;  %v1587_v14 = vmul.f32 %v4295_v47, %v4096_v43 }
 0x25f   : > { %6681 = vst [vmem:[#allocation89_spill] sm:$0xff] %v4701_v34 }
 0x261   : > { %1538 = vrot.lane.b32.xlu1 %v1506_v4, %s3750_s10  ;;  %v4709_v7 = vpop.permute.xlu1 %2107 }
 0x262   : > { %1448 = vrot.lane.b32.xlu0 %v1417_v35, %s3749_s9  ;;  %v1679_v35 = vmul.f32 %v4308_v54, %v4195_v17 }
 0x263   : > { %v4712_v53 = vpop.permute.xlu0 %2551 }
 0x265   : > { %1368 = vrot.lane.b32.xlu1 %v1333_v0, %s3748_s29  ;;  %v4719_v46 = vpop.permute.xlu1 %2103  ;;  %v1504_v0 = vmul.f32 %v4260_v19, %v4201_v12 }
 0x266   : > { %1612 = vrot.lane.b32.xlu0 %v1587_v14, %s3751_s11  ;;  %v1771_v14 = vmul.f32 %v4607_v28, %v4130_v18 }
 0x268   : > { %v4724_v4 = vpop.permute.xlu0 %2639 }
 0x269   : > { %6682 = vst [vmem:[#allocation90_spill] sm:$0xff] %v4724_v4  ;;  %1438 = vrot.lane.b32.xlu1 %v1412_v55, %s3749_s9  ;;  %v1596_v55 = vmul.f32 %v4300_v52, %v4126_v63 }
 0x26a   : > { %1708 = vrot.lane.b32.xlu0 %v1679_v35, %s3752_s13  ;;  %v4730_v31 = vpop.permute.xlu1 %2195  ;;  %v1586_v35 = vmul.f32 %v4295_v47, %v4078_v37 }
 0x26d   : > { %v4736_v30 = vpop.permute.xlu0 %2727  ;;  %1534 = vrot.lane.b32.xlu1 %v1504_v0, %s3750_s10  ;;  %v1502_v0 = vmul.f32 %v4260_v19, %v4187_v13 }
 0x26e   : > { %6683 = vst [vmem:[#allocation91_spill] sm:$0xff] %v4736_v30  ;;  %1804 = vrot.lane.b32.xlu0 %v1771_v14, %s3753_s14  ;;  %v4740_v44 = vpop.permute.xlu1 %2191  ;;  %v1770_v14 = vmul.f32 %v4607_v28, %v4119_v56 }
 0x271   : > { %v4746_v45 = vpop.permute.xlu0 %2719  ;;  %1630 = vrot.lane.b32.xlu1 %v1596_v55, %s3751_s11  ;;  %v1237_v55 = vmul.f32 %v4264_v39, %v4105_v59 }
 0x272   : > { %6684 = vst [vmem:[#allocation92_spill] sm:$0xff] %v4746_v45  ;;  %1610 = vrot.lane.b32.xlu0 %v1586_v35, %s3751_s11  ;;  %v1505_v35 = vmul.f32 %v4260_v19, %v4206_v21  ;;  %v1500_v19 = vmul.f32 %v4270_v62, %v4093_v42 }
 0x273   : > { %v4750_v30 = vpop.permute.xlu1 %2283 }
 0x275   : > { %v4756_v24 = vpop.permute.xlu0 %1278  ;;  %1530 = vrot.lane.b32.xlu1 %v1502_v0, %s3750_s10 }
 0x276   : > { %6685 = vst [vmem:[#allocation93_spill] sm:$0xff] %v4756_v24  ;;  %1802 = vrot.lane.b32.xlu0 %v1770_v14, %s3753_s14  ;;  %v1421_v24 = vmul.f32 %v4274_v49, %v4138_v6  ;;  %v1675_v14 = vmul.f32 %v4612_v48, %v4096_v43 }
 0x277   : > { %v4760_v27 = vpop.permute.xlu1 %2279 }
 0x278   : > { %6686 = vst [vmem:[#allocation94_spill] sm:$0xff] %v4760_v27 }
 0x279   : > { %v4766_v45 = vpop.permute.xlu0 %1268  ;;  %1264 = vrot.lane.b32.xlu1 %v1237_v55, %s3747_s28  ;;  %v1767_v55 = vmul.f32 %v4625_v16, %v4195_v17  ;;  %s3762_s28 = smov 47  }
 0x27a   : > { %6687 = vst [vmem:[#allocation95_spill] sm:$0xff] %v4766_v45  ;;  %1536 = vrot.lane.b32.xlu0 %v1505_v35, %s3750_s10  ;;  %v1592_v35 = vmul.f32 %v4282_v50, %v4201_v12 }
 0x27c   : > { %v4772_v0 = vpop.permute.xlu1 %2371 }
 0x27d   : > { %v4776_v32 = vpop.permute.xlu0 %1364  ;;  %1456 = vrot.lane.b32.xlu1 %v1421_v24, %s3749_s9  ;;  %v1859_v24 = vmul.f32 %v4618_v2, %v4130_v18 }
 0x27e   : > { %6688 = vst [vmem:[#allocation96_spill] sm:$0xff] %v4776_v32  ;;  %1700 = vrot.lane.b32.xlu0 %v1675_v14, %s3752_s13 }
 0x280   : > { %v4782_v39 = vpop.permute.xlu1 %2367 }
 0x281   : > { %v4786_v49 = vpop.permute.xlu0 %1266  ;;  %1526 = vrot.lane.b32.xlu1 %v1500_v19, %s3750_s10  ;;  %v1684_v19 = vmul.f32 %v4313_v15, %v4126_v63 }
 0x282   : > { %6689 = vst [vmem:[#allocation97_spill] sm:$0xff] %v4786_v49  ;;  %1796 = vrot.lane.b32.xlu0 %v1767_v55, %s3753_s14  ;;  %v1674_v55 = vmul.f32 %v4612_v48, %v4078_v37 }
 0x285   : > { %v4794_v14 = vpop.permute.xlu0 %1192  ;;  %1622 = vrot.lane.b32.xlu1 %v1592_v35, %s3751_s11  ;;  %v4797_v45 = vpop.permute.xlu1 %2459  ;;  %v1590_v35 = vmul.f32 %v4282_v50, %v4187_v13 }
 0x286   : > { %6690 = vst [vmem:[#allocation98_spill] sm:$0xff] %v4794_v14  ;;  %6691 = vst [vmem:[#allocation99_spill] sm:$0xff] %v4797_v45  ;;  %1892 = vrot.lane.b32.xlu0 %v1859_v24, %s3754_s15  ;;  %v1858_v24 = vmul.f32 %v4618_v2, %v4119_v56 }
 0x289   : > { %v4804_v49 = vpop.permute.xlu0 %1262  ;;  %1718 = vrot.lane.b32.xlu1 %v1684_v19, %s3752_s13  ;;  %v4807_v32 = vpop.permute.xlu1 %2455  ;;  %v1325_v19 = vmul.f32 %v4234_v10, %v4105_v59 }
 0x28a   : > { %6692 = vst [vmem:[#allocation100_spill] sm:$0xff] %v4804_v49  ;;  %1698 = vrot.lane.b32.xlu0 %v1674_v55, %s3752_s13  ;;  %v1593_v55 = vmul.f32 %v4282_v50, %v4206_v21  ;;  %v1588_v50 = vmul.f32 %v4295_v47, %v4093_v42 }
 0x28d   : > { %v4814_v14 = vpop.permute.xlu0 %1358  ;;  %1618 = vrot.lane.b32.xlu1 %v1590_v35, %s3751_s11  ;;  %v1509_v35 = vmul.f32 %v4287_v8, %v4138_v6 }
 0x28e   : > { %6693 = vst [vmem:[#allocation101_spill] sm:$0xff] %v4814_v14  ;;  %1890 = vrot.lane.b32.xlu0 %v1858_v24, %s3754_s15  ;;  %v4818_v41 = vpop.permute.xlu1 %2547  ;;  %v1763_v24 = vmul.f32 %v4635_v1, %v4096_v43 }
 0x291   : > { %v4824_v49 = vpop.permute.xlu0 %1454  ;;  %1352 = vrot.lane.b32.xlu1 %v1325_v19, %s3748_s29  ;;  %v1855_v19 = vmul.f32 %v4646_v51, %v4195_v17  ;;  %s3763_s29 = smov 46  }
 0x292   : > { %6694 = vst [vmem:[#allocation102_spill] sm:$0xff] %v4824_v49  ;;  %1624 = vrot.lane.b32.xlu0 %v1593_v55, %s3751_s11  ;;  %v4828_v5 = vpop.permute.xlu1 %2543 }
 0x293   : > { %6695 = vst [vmem:[#allocation103_spill] sm:$0xff] %v4828_v5 }
 0x295   : > { %v4834_v14 = vpop.permute.xlu0 %1354  ;;  %1544 = vrot.lane.b32.xlu1 %v1509_v35, %s3750_s10  ;;  %v1680_v35 = vmul.f32 %v4308_v54, %v4201_v12 }
 0x296   : > { %6696 = vst [vmem:[#allocation104_spill] sm:$0xff] %v4834_v14  ;;  %1788 = vrot.lane.b32.xlu0 %v1763_v24, %s3753_s14  ;;  %v1947_v24 = vmul.f32 %v4630_v20, %v4130_v18 }
 0x297   : > { %v4838_v10 = vpop.permute.xlu1 %2635 }
 0x298   : > { %6697 = vst [vmem:[#allocation105_spill] sm:$0xff] %v4838_v10 }
 0x299   : > { %v4844_v55 = vpop.permute.xlu0 %1280  ;;  %1614 = vrot.lane.b32.xlu1 %v1588_v50, %s3751_s11  ;;  %v1772_v50 = vmul.f32 %v4607_v28, %v4126_v63 }
 0x29a   : > { %6698 = vst [vmem:[#allocation106_spill] sm:$0xff] %v4844_v55  ;;  %1884 = vrot.lane.b32.xlu0 %v1855_v19, %s3754_s15  ;;  %v1762_v19 = vmul.f32 %v4635_v1, %v4078_v37 }
 0x29b   : > { %v4848_v8 = vpop.permute.xlu1 %2631 }
 0x29c   : > { %6699 = vst [vmem:[#allocation107_spill] sm:$0xff] %v4848_v8 }
 0x29d   : > { %v4854_v49 = vpop.permute.xlu0 %1350  ;;  %1710 = vrot.lane.b32.xlu1 %v1680_v35, %s3752_s13  ;;  %v1678_v35 = vmul.f32 %v4308_v54, %v4187_v13 }
 0x29e   : > { %6700 = vst [vmem:[#allocation108_spill] sm:$0xff] %v4854_v49  ;;  %1980 = vrot.lane.b32.xlu0 %v1947_v24, %s3755_s16  ;;  %v1946_v24 = vmul.f32 %v4630_v20, %v4119_v56 }
 0x2a0   : > { %v4860_v14 = vpop.permute.xlu1 %2723 }
 0x2a1   : > { %6701 = vst [vmem:[#allocation109_spill] sm:$0xff] %v4860_v14  ;;  %v4864_v55 = vpop.permute.xlu0 %1446  ;;  %1806 = vrot.lane.b32.xlu1 %v1772_v50, %s3753_s14  ;;  %v1413_v14 = vmul.f32 %v4250_v36, %v4105_v59 }
 0x2a2   : > { %6702 = vst [vmem:[#allocation110_spill] sm:$0xff] %v4864_v55  ;;  %1786 = vrot.lane.b32.xlu0 %v1762_v19, %s3753_s14  ;;  %v1681_v19 = vmul.f32 %v4308_v54, %v4206_v21  ;;  %v1676_v54 = vmul.f32 %v4612_v48, %v4093_v42 }
 0x2a4   : > { %v4870_v49 = vpop.permute.xlu1 %1276 }
 0x2a5   : > { %6703 = vst [vmem:[#allocation111_spill] sm:$0xff] %v4870_v49  ;;  %v4874_v8 = vpop.permute.xlu0 %1542  ;;  %1706 = vrot.lane.b32.xlu1 %v1678_v35, %s3752_s13 }
 0x2a6   : > { %6704 = vst [vmem:[#allocation112_spill] sm:$0xff] %v4874_v8  ;;  %1978 = vrot.lane.b32.xlu0 %v1946_v24, %s3755_s16  ;;  %v1597_v8 = vmul.f32 %v4300_v52, %v4138_v6  ;;  %v1851_v24 = vmul.f32 %v4656_v38, %v4096_v43 }
 0x2a8   : > { %v4880_v50 = vpop.permute.xlu1 %1274 }
 0x2a9   : > { %v4884_v55 = vpop.permute.xlu0 %1442  ;;  %1440 = vrot.lane.b32.xlu1 %v1413_v14, %s3749_s9  ;;  %s3764_s9 = smov 45  }
 0x2aa   : > { %6705 = vst [vmem:[#allocation113_spill] sm:$0xff] %v4884_v55  ;;  %1712 = vrot.lane.b32.xlu0 %v1681_v19, %s3752_s13  ;;  %v1943_v19 = vmul.f32 %v4666_v61, %v4195_v17  ;;  %v1768_v55 = vmul.f32 %v4625_v16, %v4201_v12 }
 0x2ac   : > { %v4890_v35 = vpop.permute.xlu1 %1270 }
 0x2ad   : > { %6706 = vst [vmem:[#allocation114_spill] sm:$0xff] %v4890_v35  ;;  %v4894_v36 = vpop.permute.xlu0 %1272  ;;  %1632 = vrot.lane.b32.xlu1 %v1597_v8, %s3751_s11 }
 0x2ae   : > { %6707 = vst [vmem:[#allocation115_spill] sm:$0xff] %v4894_v36  ;;  %1876 = vrot.lane.b32.xlu0 %v1851_v24, %s3754_s15  ;;  %v2035_v24 = vmul.f32 %v4642_v25, %v4130_v18 }
 0x2b0   : > { %v4900_v14 = vpop.permute.xlu1 %1366 }
 0x2b1   : > { %6708 = vst [vmem:[#allocation116_spill] sm:$0xff] %v4900_v14  ;;  %v4904_v52 = vpop.permute.xlu0 %1436  ;;  %1702 = vrot.lane.b32.xlu1 %v1676_v54, %s3752_s13  ;;  %v1860_v54 = vmul.f32 %v4618_v2, %v4126_v63 }
 0x2b2   : > { %6709 = vst [vmem:[#allocation117_spill] sm:$0xff] %v4904_v52  ;;  %1972 = vrot.lane.b32.xlu0 %v1943_v19, %s3755_s16  ;;  %v1850_v19 = vmul.f32 %v4656_v38, %v4078_v37 }
 0x2b4   : > { %v4910_v8 = vpop.permute.xlu1 %1362 }
 0x2b5   : > { %6710 = vst [vmem:[#allocation118_spill] sm:$0xff] %v4910_v8  ;;  %v4914_v35 = vpop.permute.xlu0 %1532  ;;  %1798 = vrot.lane.b32.xlu1 %v1768_v55, %s3753_s14  ;;  %v1766_v55 = vmul.f32 %v4625_v16, %v4187_v13 }
 0x2b6   : > { %6711 = vst [vmem:[#allocation119_spill] sm:$0xff] %v4914_v35  ;;  %2068 = vrot.lane.b32.xlu0 %v2035_v24, %s3756_s17  ;;  %v2034_v24 = vmul.f32 %v4642_v25, %v4119_v56 }
 0x2b8   : > { %v4920_v14 = vpop.permute.xlu1 %1260 }
 0x2b9   : > { %6712 = vst [vmem:[#allocation120_spill] sm:$0xff] %v4920_v14  ;;  %v4924_v36 = vpop.permute.xlu0 %1628  ;;  %1894 = vrot.lane.b32.xlu1 %v1860_v54, %s3754_s15 }
 0x2ba   : > { %6713 = vst [vmem:[#allocation121_spill] sm:$0xff] %v4924_v36  ;;  %1874 = vrot.lane.b32.xlu0 %v1850_v19, %s3754_s15  ;;  %v1501_v36 = vmul.f32 %v4270_v62, %v4105_v59  ;;  %v1769_v19 = vmul.f32 %v4625_v16, %v4206_v21  ;;  %v1764_v16 = vmul.f32 %v4635_v1, %v4093_v42 }
 0x2bc   : > { %v4930_v35 = vpop.permute.xlu1 %1356 }
 0x2bd   : > { %6714 = vst [vmem:[#allocation122_spill] sm:$0xff] %v4930_v35  ;;  %v4934_v52 = vpop.permute.xlu0 %1434  ;;  %1794 = vrot.lane.b32.xlu1 %v1766_v55, %s3753_s14  ;;  %v1685_v35 = vmul.f32 %v4313_v15, %v4138_v6 }
 0x2be   : > { %6715 = vst [vmem:[#allocation123_spill] sm:$0xff] %v4934_v52  ;;  %2066 = vrot.lane.b32.xlu0 %v2034_v24, %s3756_s17  ;;  %v1939_v24 = vmul.f32 %v4674_v33, %v4096_v43 }
 0x2c0   : > { %v4940_v54 = vpop.permute.xlu1 %1452 }
 0x2c1   : > { %v4944_v8 = vpop.permute.xlu0 %1626  ;;  %1528 = vrot.lane.b32.xlu1 %v1501_v36, %s3750_s10 }
 0x2c2   : > { %6716 = vst [vmem:[#allocation124_spill] sm:$0xff] %v4944_v8  ;;  %1800 = vrot.lane.b32.xlu0 %v1769_v19, %s3753_s14  ;;  %v2031_v19 = vmul.f32 %v4686_v26, %v4195_v17 }
 0x2c4   : > { %v4950_v55 = vpop.permute.xlu1 %1258 }
 0x2c5   : > { %v4954_v62 = vpop.permute.xlu0 %1360  ;;  %1720 = vrot.lane.b32.xlu1 %v1685_v35, %s3752_s13 }
 0x2c6   : > { %6717 = vst [vmem:[#allocation125_spill] sm:$0xff] %v4954_v62  ;;  %1964 = vrot.lane.b32.xlu0 %v1939_v24, %s3755_s16  ;;  %v1856_v62 = vmul.f32 %v4646_v51, %v4201_v12  ;;  %v2123_v24 = vmul.f32 %v4653_v57, %v4130_v18 }
 0x2c8   : > { %v4960_v36 = vpop.permute.xlu1 %1450 }
 0x2c9   : > { %6718 = vst [vmem:[#allocation126_spill] sm:$0xff] %v4960_v36  ;;  %v4964_v15 = vpop.permute.xlu0 %1524  ;;  %1790 = vrot.lane.b32.xlu1 %v1764_v16, %s3753_s14  ;;  %v1948_v16 = vmul.f32 %v4630_v20, %v4126_v63 }
 0x2ca   : > { %6719 = vst [vmem:[#allocation127_spill] sm:$0xff] %v4964_v15  ;;  %2060 = vrot.lane.b32.xlu0 %v2031_v19, %s3756_s17  ;;  %v1938_v19 = vmul.f32 %v4674_v33, %v4078_v37 }
 0x2cc   : > { %v4970_v35 = vpop.permute.xlu1 %1348 }
 0x2cd   : > { %6720 = vst [vmem:[#allocation128_spill] sm:$0xff] %v4970_v35  ;;  %v4974_v8 = vpop.permute.xlu0 %1620  ;;  %1886 = vrot.lane.b32.xlu1 %v1856_v62, %s3754_s15  ;;  %v1854_v62 = vmul.f32 %v4646_v51, %v4187_v13 }
 0x2ce   : > { %6721 = vst [vmem:[#allocation129_spill] sm:$0xff] %v4974_v8  ;;  %2156 = vrot.lane.b32.xlu0 %v2123_v24, %s3757_s18  ;;  %v2122_v24 = vmul.f32 %v4653_v57, %v4119_v56 }
 0x2d0   : > { %v4980_v15 = vpop.permute.xlu1 %1444 }
 0x2d1   : > { %6722 = vst [vmem:[#allocation130_spill] sm:$0xff] %v4980_v15  ;;  %v4984_v52 = vpop.permute.xlu0 %1716  ;;  %1982 = vrot.lane.b32.xlu1 %v1948_v16, %s3755_s16  ;;  %v1589_v15 = vmul.f32 %v4295_v47, %v4105_v59 }
 0x2d2   : > { %6723 = vst [vmem:[#allocation131_spill] sm:$0xff] %v4984_v52  ;;  %1962 = vrot.lane.b32.xlu0 %v1938_v19, %s3755_s16  ;;  %v1857_v19 = vmul.f32 %v4646_v51, %v4206_v21  ;;  %v1852_v51 = vmul.f32 %v4656_v38, %v4093_v42 }
 0x2d4   : > { %v4990_v8 = vpop.permute.xlu1 %1540 }
 0x2d5   : > { %v4994_v36 = vpop.permute.xlu0 %1522  ;;  %1882 = vrot.lane.b32.xlu1 %v1854_v62, %s3754_s15 }
 0x2d6   : > { %6724 = vst [vmem:[#allocation132_spill] sm:$0xff] %v4994_v36  ;;  %2154 = vrot.lane.b32.xlu0 %v2122_v24, %s3757_s18  ;;  %v1773_v36 = vmul.f32 %v4607_v28, %v4138_v6  ;;  %v2027_v24 = vmul.f32 %v4696_v9, %v4096_v43 }
 0x2d8   : > { %v5000_v16 = vpop.permute.xlu1 %1346 }
 0x2d9   : > { %v5004_v52 = vpop.permute.xlu0 %1714  ;;  %1616 = vrot.lane.b32.xlu1 %v1589_v15, %s3751_s11 }
 0x2da   : > { %6725 = vst [vmem:[#allocation133_spill] sm:$0xff] %v5004_v52  ;;  %1888 = vrot.lane.b32.xlu0 %v1857_v19, %s3754_s15  ;;  %v2119_v19 = vmul.f32 %v4709_v7, %v4195_v17 }
 0x2dc   : > { %v5010_v62 = vpop.permute.xlu1 %1538 }
 0x2dd   : > { %v5014_v47 = vpop.permute.xlu0 %1448  ;;  %1808 = vrot.lane.b32.xlu1 %v1773_v36, %s3753_s14  ;;  %v3758_v36 = vmov 2  }
 0x2de   : > { %6726 = vst [vmem:[#allocation134_spill] sm:$0xff] %v5014_v47  ;;  %2052 = vrot.lane.b32.xlu0 %v2027_v24, %s3756_s17  ;;  %v1944_v47 = vmul.f32 %v4666_v61, %v4201_v12  ;;  %3484 = vset.pattern.permute.xlu1 %v3758_v36 }
 0x2df   : > { %3483 = vset.pattern.permute.xlu0 %v3758_v36  ;;  %v2026_v36 = vmul.f32 %v4696_v9, %v4078_v37 }
 0x2e0   : > { %v5020_v15 = vpop.permute.xlu1 %1368 }
 0x2e1   : > { %6727 = vst [vmem:[#allocation135_spill] sm:$0xff] %v5020_v15  ;;  %v5024_v28 = vpop.permute.xlu0 %1612  ;;  %1878 = vrot.lane.b32.xlu1 %v1852_v51, %s3754_s15  ;;  %v2211_v15 = vmul.f32 %v4664_v58, %v4130_v18  ;;  %v2036_v51 = vmul.f32 %v4642_v25, %v4126_v63 }
 0x2e2   : > { %6728 = vst [vmem:[#allocation136_spill] sm:$0xff] %v5024_v28  ;;  %2148 = vrot.lane.b32.xlu0 %v2119_v19, %s3757_s18 }
 0x2e4   : > { %v5030_v24 = vpop.permute.xlu1 %1438 }
 0x2e5   : > { %6729 = vst [vmem:[#allocation137_spill] sm:$0xff] %v5030_v24  ;;  %v5034_v52 = vpop.permute.xlu0 %1708  ;;  %1974 = vrot.lane.b32.xlu1 %v1944_v47, %s3755_s16  ;;  %v1942_v47 = vmul.f32 %v4666_v61, %v4187_v13 }
 0x2e6   : > { %6730 = vst [vmem:[#allocation138_spill] sm:$0xff] %v5034_v52  ;;  %2244 = vrot.lane.b32.xlu0 %v2211_v15, %s3759_s19  ;;  %v2210_v15 = vmul.f32 %v4664_v58, %v4119_v56 }
 0x2e8   : > { %v5040_v19 = vpop.permute.xlu1 %1534 }
 0x2e9   : > { %6731 = vst [vmem:[#allocation139_spill] sm:$0xff] %v5040_v19  ;;  %v5044_v28 = vpop.permute.xlu0 %1804  ;;  %2070 = vrot.lane.b32.xlu1 %v2036_v51, %s3756_s17  ;;  %v1677_v19 = vmul.f32 %v4612_v48, %v4105_v59 }
 0x2ea   : > { %6732 = vst [vmem:[#allocation140_spill] sm:$0xff] %v5044_v28  ;;  %2050 = vrot.lane.b32.xlu0 %v2026_v36, %s3756_s17  ;;  %v1945_v36 = vmul.f32 %v4666_v61, %v4206_v21  ;;  %v1940_v61 = vmul.f32 %v4674_v33, %v4093_v42 }
 0x2ec   : > { %v5050_v52 = vpop.permute.xlu1 %1630 }
 0x2ed   : > { %6733 = vst [vmem:[#allocation141_spill] sm:$0xff] %v5050_v52  ;;  %v5054_v24 = vpop.permute.xlu0 %1610  ;;  %1970 = vrot.lane.b32.xlu1 %v1942_v47, %s3755_s16  ;;  %v1861_v52 = vmul.f32 %v4618_v2, %v4138_v6 }
 0x2ee   : > { %2242 = vrot.lane.b32.xlu0 %v2210_v15, %s3759_s19  ;;  %v2115_v15 = vmul.f32 %v4719_v46, %v4096_v43 }
 0x2f0   : > { %v5060_v51 = vpop.permute.xlu1 %1530 }
 0x2f1   : > { %6734 = vst [vmem:[#allocation142_spill] sm:$0xff] %v5060_v51  ;;  %v5064_v28 = vpop.permute.xlu0 %1802  ;;  %1704 = vrot.lane.b32.xlu1 %v1677_v19, %s3752_s13  ;;  %s3765_s13 = smov 44  }
 0x2f2   : > { %1976 = vrot.lane.b32.xlu0 %v1945_v36, %s3755_s16  ;;  %v2207_v36 = vmul.f32 %v4730_v31, %v4195_v17 }
 0x2f4   : > { %v5070_v47 = vpop.permute.xlu1 %1264 }
 0x2f5   : > { %6735 = vst [vmem:[#allocation143_spill] sm:$0xff] %v5070_v47  ;;  %v5074_v48 = vpop.permute.xlu0 %1536  ;;  %1896 = vrot.lane.b32.xlu1 %v1861_v52, %s3754_s15  ;;  %v2032_v47 = vmul.f32 %v4686_v26, %v4201_v12 }
 0x2f6   : > { %6736 = vst [vmem:[#allocation144_spill] sm:$0xff] %v5074_v48  ;;  %2140 = vrot.lane.b32.xlu0 %v2115_v15, %s3757_s18  ;;  %v2299_v15 = vmul.f32 %v4678_v29, %v4130_v18 }
 0x2f8   : > { %v5080_v19 = vpop.permute.xlu1 %1456 }
 0x2f9   : > { %6737 = vst [vmem:[#allocation145_spill] sm:$0xff] %v5080_v19  ;;  %v5084_v2 = vpop.permute.xlu0 %1700  ;;  %1966 = vrot.lane.b32.xlu1 %v1940_v61, %s3755_s16  ;;  %v2124_v61 = vmul.f32 %v4653_v57, %v4126_v63 }
 0x2fa   : > { %6738 = vst [vmem:[#allocation146_spill] sm:$0xff] %v5084_v2  ;;  %2236 = vrot.lane.b32.xlu0 %v2207_v36, %s3759_s19  ;;  %v2114_v36 = vmul.f32 %v4719_v46, %v4078_v37 }
 0x2fc   : > { %v5090_v52 = vpop.permute.xlu1 %1526 }
 0x2fd   : > { %6739 = vst [vmem:[#allocation147_spill] sm:$0xff] %v5090_v52  ;;  %v5094_v51 = vpop.permute.xlu0 %1796  ;;  %2062 = vrot.lane.b32.xlu1 %v2032_v47, %s3756_s17  ;;  %v2030_v47 = vmul.f32 %v4686_v26, %v4187_v13 }
 0x2fe   : > { %6740 = vst [vmem:[#allocation148_spill] sm:$0xff] %v5094_v51  ;;  %2332 = vrot.lane.b32.xlu0 %v2299_v15, %s3760_s20  ;;  %v2298_v15 = vmul.f32 %v4678_v29, %v4119_v56 }
 0x300   : > { %v5100_v19 = vpop.permute.xlu1 %1622 }
 0x301   : > { %6741 = vst [vmem:[#allocation149_spill] sm:$0xff] %v5100_v19  ;;  %v5104_v48 = vpop.permute.xlu0 %1892  ;;  %2158 = vrot.lane.b32.xlu1 %v2124_v61, %s3757_s18  ;;  %v1765_v19 = vmul.f32 %v4635_v1, %v4105_v59 }
 0x302   : > { %6742 = vst [vmem:[#allocation150_spill] sm:$0xff] %v5104_v48  ;;  %2138 = vrot.lane.b32.xlu0 %v2114_v36, %s3757_s18  ;;  %v2033_v36 = vmul.f32 %v4686_v26, %v4206_v21  ;;  %v2028_v26 = vmul.f32 %v4696_v9, %v4093_v42 }
 0x304   : > { %v5110_v51 = vpop.permute.xlu1 %1718 }
 0x305   : > { %6743 = vst [vmem:[#allocation151_spill] sm:$0xff] %v5110_v51  ;;  %v5114_v52 = vpop.permute.xlu0 %1698  ;;  %2058 = vrot.lane.b32.xlu1 %v2030_v47, %s3756_s17  ;;  %v1949_v51 = vmul.f32 %v4630_v20, %v4138_v6 }
 0x306   : > { %2330 = vrot.lane.b32.xlu0 %v2298_v15, %s3760_s20  ;;  %v2203_v15 = vmul.f32 %v4740_v44, %v4096_v43 }
 0x308   : > { %v5120_v61 = vpop.permute.xlu1 %1618 }
 0x309   : > { %6744 = vst [vmem:[#allocation152_spill] sm:$0xff] %v5120_v61  ;;  %v5124_v48 = vpop.permute.xlu0 %1890  ;;  %1792 = vrot.lane.b32.xlu1 %v1765_v19, %s3753_s14 }
 0x30a   : > { %2064 = vrot.lane.b32.xlu0 %v2033_v36, %s3756_s17  ;;  %v2295_v36 = vmul.f32 %v4750_v30, %v4195_v17 }
 0x30c   : > { %v5130_v47 = vpop.permute.xlu1 %1352 }
 0x30d   : > { %6745 = vst [vmem:[#allocation153_spill] sm:$0xff] %v5130_v47  ;;  %v5134_v1 = vpop.permute.xlu0 %1624  ;;  %1984 = vrot.lane.b32.xlu1 %v1949_v51, %s3755_s16  ;;  %v2120_v47 = vmul.f32 %v4709_v7, %v4201_v12 }
 0x30e   : > { %6746 = vst [vmem:[#allocation154_spill] sm:$0xff] %v5134_v1  ;;  %2228 = vrot.lane.b32.xlu0 %v2203_v15, %s3759_s19  ;;  %v2387_v15 = vmul.f32 %v4690_v22, %v4130_v18 }
 0x310   : > { %v5140_v19 = vpop.permute.xlu1 %1544 }
 0x311   : > { %6747 = vst [vmem:[#allocation155_spill] sm:$0xff] %v5140_v19  ;;  %v5144_v20 = vpop.permute.xlu0 %1788  ;;  %2054 = vrot.lane.b32.xlu1 %v2028_v26, %s3756_s17  ;;  %v2212_v26 = vmul.f32 %v4664_v58, %v4126_v63 }
 0x312   : > { %6748 = vst [vmem:[#allocation156_spill] sm:$0xff] %v5144_v20  ;;  %2324 = vrot.lane.b32.xlu0 %v2295_v36, %s3760_s20  ;;  %v2202_v36 = vmul.f32 %v4740_v44, %v4078_v37 }
 0x314   : > { %v5150_v51 = vpop.permute.xlu1 %1614 }
 0x315   : > { %6749 = vst [vmem:[#allocation157_spill] sm:$0xff] %v5150_v51  ;;  %v5154_v61 = vpop.permute.xlu0 %1884  ;;  %2150 = vrot.lane.b32.xlu1 %v2120_v47, %s3757_s18  ;;  %v2118_v47 = vmul.f32 %v4709_v7, %v4187_v13 }
 0x316   : > { %6750 = vst [vmem:[#allocation158_spill] sm:$0xff] %v5154_v61  ;;  %2420 = vrot.lane.b32.xlu0 %v2387_v15, %s3761_s26  ;;  %v2386_v15 = vmul.f32 %v4690_v22, %v4119_v56 }
 0x318   : > { %v5160_v19 = vpop.permute.xlu1 %1710 }
 0x319   : > { %6751 = vst [vmem:[#allocation159_spill] sm:$0xff] %v5160_v19  ;;  %v5164_v1 = vpop.permute.xlu0 %1980  ;;  %2246 = vrot.lane.b32.xlu1 %v2212_v26, %s3759_s19  ;;  %v1853_v19 = vmul.f32 %v4656_v38, %v4105_v59 }
 0x31a   : > { %6752 = vst [vmem:[#allocation160_spill] sm:$0xff] %v5164_v1  ;;  %2226 = vrot.lane.b32.xlu0 %v2202_v36, %s3759_s19  ;;  %v2121_v36 = vmul.f32 %v4709_v7, %v4206_v21  ;;  %v2116_v7 = vmul.f32 %v4719_v46, %v4093_v42 }
 0x31c   : > { %v5170_v51 = vpop.permute.xlu1 %1806 }
 0x31d   : > { %6753 = vst [vmem:[#allocation161_spill] sm:$0xff] %v5170_v51  ;;  %v5174_v61 = vpop.permute.xlu0 %1786  ;;  %2146 = vrot.lane.b32.xlu1 %v2118_v47, %s3757_s18  ;;  %v2037_v51 = vmul.f32 %v4642_v25, %v4138_v6 }
 0x31e   : > { %2418 = vrot.lane.b32.xlu0 %v2386_v15, %s3761_s26  ;;  %v2291_v15 = vmul.f32 %v4760_v27, %v4096_v43 }
 0x320   : > { %v5180_v26 = vpop.permute.xlu1 %1706 }
 0x321   : > { %6754 = vst [vmem:[#allocation162_spill] sm:$0xff] %v5180_v26  ;;  %v5184_v1 = vpop.permute.xlu0 %1978  ;;  %1880 = vrot.lane.b32.xlu1 %v1853_v19, %s3754_s15 }
 0x322   : > { %2152 = vrot.lane.b32.xlu0 %v2121_v36, %s3757_s18  ;;  %v2383_v36 = vmul.f32 %v4772_v0, %v4195_v17 }
 0x324   : > { %v5190_v47 = vpop.permute.xlu1 %1440 }
 0x325   : > { %6755 = vst [vmem:[#allocation163_spill] sm:$0xff] %v5190_v47  ;;  %v5194_v38 = vpop.permute.xlu0 %1712  ;;  %2072 = vrot.lane.b32.xlu1 %v2037_v51, %s3756_s17  ;;  %v2208_v47 = vmul.f32 %v4730_v31, %v4201_v12 }
 0x326   : > { %6756 = vst [vmem:[#allocation164_spill] sm:$0xff] %v5194_v38  ;;  %2316 = vrot.lane.b32.xlu0 %v2291_v15, %s3760_s20  ;;  %v2475_v15 = vmul.f32 %v4701_v34, %v4130_v18 }
 0x328   : > { %v5200_v19 = vpop.permute.xlu1 %1632 }
 0x329   : > { %6757 = vst [vmem:[#allocation165_spill] sm:$0xff] %v5200_v19  ;;  %v5204_v25 = vpop.permute.xlu0 %1876  ;;  %2142 = vrot.lane.b32.xlu1 %v2116_v7, %s3757_s18  ;;  %v2300_v7 = vmul.f32 %v4678_v29, %v4126_v63 }
 0x32a   : > { %6758 = vst [vmem:[#allocation166_spill] sm:$0xff] %v5204_v25  ;;  %2412 = vrot.lane.b32.xlu0 %v2383_v36, %s3761_s26  ;;  %v2290_v36 = vmul.f32 %v4760_v27, %v4078_v37 }
 0x32c   : > { %v5210_v51 = vpop.permute.xlu1 %1702 }
 0x32d   : > { %6759 = vst [vmem:[#allocation167_spill] sm:$0xff] %v5210_v51  ;;  %v5214_v26 = vpop.permute.xlu0 %1972  ;;  %2238 = vrot.lane.b32.xlu1 %v2208_v47, %s3759_s19  ;;  %v2206_v47 = vmul.f32 %v4730_v31, %v4187_v13 }
 0x32e   : > { %6760 = vst [vmem:[#allocation168_spill] sm:$0xff] %v5214_v26  ;;  %2508 = vrot.lane.b32.xlu0 %v2475_v15, %s3762_s28  ;;  %v2474_v15 = vmul.f32 %v4701_v34, %v4119_v56 }
 0x330   : > { %v5220_v19 = vpop.permute.xlu1 %1798 }
 0x331   : > { %6761 = vst [vmem:[#allocation169_spill] sm:$0xff] %v5220_v19  ;;  %v5224_v38 = vpop.permute.xlu0 %2068  ;;  %2334 = vrot.lane.b32.xlu1 %v2300_v7, %s3760_s20  ;;  %v1941_v19 = vmul.f32 %v4674_v33, %v4105_v59 }
 0x332   : > { %6762 = vst [vmem:[#allocation170_spill] sm:$0xff] %v5224_v38  ;;  %2314 = vrot.lane.b32.xlu0 %v2290_v36, %s3760_s20  ;;  %v2209_v36 = vmul.f32 %v4730_v31, %v4206_v21  ;;  %v2204_v31 = vmul.f32 %v4740_v44, %v4093_v42 }
 0x334   : > { %v5230_v51 = vpop.permute.xlu1 %1894 }
 0x335   : > { %6763 = vst [vmem:[#allocation171_spill] sm:$0xff] %v5230_v51  ;;  %v5234_v26 = vpop.permute.xlu0 %1874  ;;  %2234 = vrot.lane.b32.xlu1 %v2206_v47, %s3759_s19  ;;  %v2125_v51 = vmul.f32 %v4653_v57, %v4138_v6 }
 0x336   : > { %2506 = vrot.lane.b32.xlu0 %v2474_v15, %s3762_s28  ;;  %v2379_v15 = vmul.f32 %v4782_v39, %v4096_v43 }
 0x338   : > { %v5240_v7 = vpop.permute.xlu1 %1794 }
 0x339   : > { %6764 = vst [vmem:[#allocation172_spill] sm:$0xff] %v5240_v7  ;;  %v5244_v38 = vpop.permute.xlu0 %2066  ;;  %1968 = vrot.lane.b32.xlu1 %v1941_v19, %s3755_s16 }
 0x33a   : > { %6765 = vst [vmem:[#allocation173_spill] sm:$0xff] %v5244_v38  ;;  %2240 = vrot.lane.b32.xlu0 %v2209_v36, %s3759_s19  ;;  %v2471_v36 = vmul.f32 %v4797_v45, %v4195_v17 }
 0x33c   : > { %v5250_v47 = vpop.permute.xlu1 %1528 }
 0x33d   : > { %6766 = vst [vmem:[#allocation174_spill] sm:$0xff] %v5250_v47  ;;  %v5254_v33 = vpop.permute.xlu0 %1800  ;;  %2160 = vrot.lane.b32.xlu1 %v2125_v51, %s3757_s18  ;;  %v2296_v47 = vmul.f32 %v4750_v30, %v4201_v12 }
 0x33e   : > { %6767 = vst [vmem:[#allocation175_spill] sm:$0xff] %v5254_v33  ;;  %2404 = vrot.lane.b32.xlu0 %v2379_v15, %s3761_s26  ;;  %v2563_v15 = vmul.f32 %v4712_v53, %v4130_v18 }
 0x340   : > { %v5260_v19 = vpop.permute.xlu1 %1720 }
 0x341   : > { %6768 = vst [vmem:[#allocation176_spill] sm:$0xff] %v5260_v19  ;;  %v5264_v57 = vpop.permute.xlu0 %1964  ;;  %2230 = vrot.lane.b32.xlu1 %v2204_v31, %s3759_s19  ;;  %v2388_v31 = vmul.f32 %v4690_v22, %v4126_v63 }
 0x342   : > { %6769 = vst [vmem:[#allocation177_spill] sm:$0xff] %v5264_v57  ;;  %2500 = vrot.lane.b32.xlu0 %v2471_v36, %s3762_s28  ;;  %v2378_v36 = vmul.f32 %v4782_v39, %v4078_v37 }
 0x344   : > { %v5270_v51 = vpop.permute.xlu1 %1790 }
 0x345   : > { %6770 = vst [vmem:[#allocation178_spill] sm:$0xff] %v5270_v51  ;;  %v5274_v7 = vpop.permute.xlu0 %2060  ;;  %2326 = vrot.lane.b32.xlu1 %v2296_v47, %s3760_s20  ;;  %v2294_v47 = vmul.f32 %v4750_v30, %v4187_v13 }
 0x346   : > { %6771 = vst [vmem:[#allocation179_spill] sm:$0xff] %v5274_v7  ;;  %2596 = vrot.lane.b32.xlu0 %v2563_v15, %s3763_s29  ;;  %v2562_v15 = vmul.f32 %v4712_v53, %v4119_v56 }
 0x348   : > { %v5280_v19 = vpop.permute.xlu1 %1886 }
 0x349   : > { %6772 = vst [vmem:[#allocation180_spill] sm:$0xff] %v5280_v19  ;;  %v5284_v33 = vpop.permute.xlu0 %2156  ;;  %2422 = vrot.lane.b32.xlu1 %v2388_v31, %s3761_s26  ;;  %v2029_v19 = vmul.f32 %v4696_v9, %v4105_v59 }
 0x34a   : > { %6773 = vst [vmem:[#allocation181_spill] sm:$0xff] %v5284_v33  ;;  %2402 = vrot.lane.b32.xlu0 %v2378_v36, %s3761_s26  ;;  %v2297_v36 = vmul.f32 %v4750_v30, %v4206_v21  ;;  %v2292_v30 = vmul.f32 %v4760_v27, %v4093_v42 }
 0x34c   : > { %v5290_v51 = vpop.permute.xlu1 %1982 }
 0x34d   : > { %6774 = vst [vmem:[#allocation182_spill] sm:$0xff] %v5290_v51  ;;  %v5294_v7 = vpop.permute.xlu0 %1962  ;;  %2322 = vrot.lane.b32.xlu1 %v2294_v47, %s3760_s20  ;;  %v2213_v51 = vmul.f32 %v4664_v58, %v4138_v6 }
 0x34e   : > { %6775 = vst [vmem:[#allocation183_spill] sm:$0xff] %v5294_v7  ;;  %2594 = vrot.lane.b32.xlu0 %v2562_v15, %s3763_s29  ;;  %v2467_v15 = vmul.f32 %v4807_v32, %v4096_v43  ;;  %v6801_v7 = vld [vmem:[#allocation26_spill] sm:$0xff] }
 0x350   : > { %v5300_v31 = vpop.permute.xlu1 %1882 }
 0x351   : > { %6776 = vst [vmem:[#allocation184_spill] sm:$0xff] %v5300_v31  ;;  %v5304_v33 = vpop.permute.xlu0 %2154  ;;  %2056 = vrot.lane.b32.xlu1 %v2029_v19, %s3756_s17  ;;  %s3767_s17 = smov [#allocation7]  }
 0x352   : > { %6777 = vst [vmem:[#allocation185_spill] sm:$0xff] %v5304_v33  ;;  %2328 = vrot.lane.b32.xlu0 %v2297_v36, %s3760_s20  ;;  %v2559_v36 = vmul.f32 %v4818_v41, %v4195_v17 }
 0x354   : > { %v5310_v47 = vpop.permute.xlu1 %1616 }
 0x355   : > { %6778 = vst [vmem:[#allocation186_spill] sm:$0xff] %v5310_v47  ;;  %v5314_v9 = vpop.permute.xlu0 %1888  ;;  %2248 = vrot.lane.b32.xlu1 %v2213_v51, %s3759_s19  ;;  %v2384_v47 = vmul.f32 %v4772_v0, %v4201_v12 }
 0x356   : > { %6779 = vst [vmem:[#allocation187_spill] sm:$0xff] %v5314_v9  ;;  %2492 = vrot.lane.b32.xlu0 %v2467_v15, %s3762_s28  ;;  %v2651_v15 = vmul.f32 %v4724_v4, %v4130_v18  ;;  %v6792_v9 = vld [vmem:[#allocation23_spill] sm:$0xff] }
 0x358   : > { %v5320_v19 = vpop.permute.xlu1 %1808 }
 0x359   : > { %6780 = vst [vmem:[#allocation188_spill] sm:$0xff] %v5320_v19  ;;  %v5324_v58 = vpop.permute.xlu0 %2052  ;;  %2318 = vrot.lane.b32.xlu1 %v2292_v30, %s3760_s20  ;;  %v2476_v30 = vmul.f32 %v4701_v34, %v4126_v63 }
 0x35a   : > { %6781 = vst [vmem:[#allocation189_spill] sm:$0xff] %v5324_v58  ;;  %2588 = vrot.lane.b32.xlu0 %v2559_v36, %s3763_s29  ;;  %v6799_v58 = vld [vmem:[#allocation66_spill] sm:$0xff] }
 0x35c   : > { %v5330_v51 = vpop.permute.xlu1 %1878 }
 0x35d   : > { %6782 = vst [vmem:[#allocation190_spill] sm:$0xff] %v5330_v51  ;;  %v5334_v31 = vpop.permute.xlu0 %2148  ;;  %2414 = vrot.lane.b32.xlu1 %v2384_v47, %s3761_s26  ;;  %v3584_v51 = vld [vmem:[%s6445_s4 + $0x10] sm:$0xff]  ;;  %v2382_v47 = vmul.f32 %v4772_v0, %v4187_v13 }
 0x35e   : > { %6783 = vst [vmem:[#allocation191_spill] sm:$0xff] %v5334_v31  ;;  %2684 = vrot.lane.b32.xlu0 %v2651_v15, %s3764_s9  ;;  %v2650_v15 = vmul.f32 %v4724_v4, %v4119_v56  ;;  %v6800_v4 = vld [vmem:[#allocation27_spill] sm:$0xff] }
 0x360   : > { %v5340_v19 = vpop.permute.xlu1 %1974 }
 0x361   : > { %6784 = vst [vmem:[#allocation192_spill] sm:$0xff] %v5340_v19  ;;  %v5342_v36 = vpop.permute.xlu0 %2244  ;;  %2510 = vrot.lane.b32.xlu1 %v2476_v30, %s3762_s28  ;;  %v2117_v30 = vmul.f32 %v4719_v46, %v4105_v59  ;;  %v685_v19 = vmul.f32 %v4028_v3, %v4078_v37  ;;  %v687_v46 = vmul.f32 %v4028_v3, %v4093_v42 }
 0x362   : > { %6785 = vst [vmem:[#allocation193_spill] sm:$0xff] %v5342_v36  ;;  %2815 = vperm.xlu0 %3483, %v3584_v51   ;;  %v2385_v51 = vmul.f32 %v4772_v0, %v4206_v21  ;;  %v755_v0 = vsel %vm754_vm2, %v4319_v23, %v4323_v11  ;;  %v2555_v23 = vmul.f32 %v4828_v5, %v4096_v43  ;;  %v6794_v36 = vld [vmem:[#allocation24_spill] sm:$0xff]  ;;  %v6797_v5 = vld [vmem:[#allocation25_spill] sm:$0xff] }
 0x364   : > { %v5350_v31 = vpop.permute.xlu1 %2070 }
 0x365   : > { %6786 = vst [vmem:[#allocation194_spill] sm:$0xff] %v5350_v31  ;;  %v5354_v34 = vpop.permute.xlu0 %2050  ;;  %2410 = vrot.lane.b32.xlu1 %v2382_v47, %s3761_s26  ;;  %v686_v47 = vmul.f32 %v4028_v3, %v4096_v43  ;;  %v6790_v3 = vld [vmem:[#allocation19_spill] sm:$0xff] }
 0x366   : > { %6787 = vst [vmem:[#allocation195_spill] sm:$0xff] %v5354_v34  ;;  %2682 = vrot.lane.b32.xlu0 %v2650_v15, %s3764_s9  ;;  %v756_v15 = vsel %vm754_vm2, %v4323_v11, %v4329_v60  ;;  %v6793_v11 = vld [vmem:[#allocation22_spill] sm:$0xff]  ;;  %v6798_v34 = vld [vmem:[#allocation67_spill] sm:$0xff] }
 0x367   : > { %v774_v43 = vadd.f32 %v756_v15, %v686_v47  ;;  %v2380_v47 = vmul.f32 %v4782_v39, %v4093_v42  ;;  %v6804_v15 = vld [vmem:[#allocation70_spill] sm:$0xff] }
 0x368   : > { %v5360_v27 = vpop.permute.xlu1 %1970 }
 0x369   : > { %6788 = vst [vmem:[#allocation196_spill] sm:$0xff] %v5360_v27  ;;  %v5364_v31 = vpop.permute.xlu0 %2242  ;;  %2144 = vrot.lane.b32.xlu1 %v2117_v30, %s3757_s18  ;;  %v2301_v30 = vmul.f32 %v4678_v29, %v4138_v6  ;;  %v757_v27 = vsel %vm754_vm2, %v4329_v60, %v4333_v40  ;;  %v844_v29 = vsel %vm842_vm3, %v6792_v9, %v6794_v36  ;;  %v6795_v40 = vld [vmem:[#allocation14_spill] sm:$0xff]  ;;  %s3643_s18 = sshll.u32 %s3767_s17, 4  ;;  %s3644_s18 = int_to_ptr.vmem [resolvable:$false] %s3643_s18 }
 0x36a   : > { %6789 = vst [vmem:[#allocation197_spill] sm:$0xff] %v5364_v31  ;;  %2416 = vrot.lane.b32.xlu0 %v2385_v51, %s3761_s26  ;;  %v5387_v51 = vmul.f32 %v6790_v3, %v4187_v13  ;;  %v843_v31 = vsel %vm842_vm3, %v6793_v11, %v6792_v9  ;;  %v5401_v60 = vmul.f32 %v6790_v3, %v4195_v17 }
 0x36b   : > { %v691_v33 = vmul.f32 %v6795_v40, %v4119_v56  ;;  %v845_v11 = vsel %vm842_vm3, %v6794_v36, %v6797_v5  ;;  %v761_v9 = vsel %vm754_vm2, %v6799_v58, %v6798_v34  ;;  %v775_v38 = vadd.f32 %v757_v27, %v687_v46  ;;  %v6803_v36 = vld [vmem:[#allocation71_spill] sm:$0xff] }
 0x36c   : > { %v5389_v21 = vpop.permute.xlu1 %1704  ;;  %v931_v56 = vsel %vm930_vm4, %v6801_v7, %v6800_v4  ;;  %v862_v5 = vadd.f32 %v844_v29, %v774_v43  ;;  %v849_v58 = vsel %vm842_vm3, %v6804_v15, %v6803_v36  ;;  %v2647_v27 = vmul.f32 %v4838_v10, %v4195_v17  ;;  %v6806_v7 = vld [vmem:[#allocation31_spill] sm:$0xff] }
 0x36d   : > { %6791 = vst [vmem:[#allocation19_spill] sm:$0xff] %v5389_v21  ;;  %v5405_v37 = vpop.permute.xlu0 %1976  ;;  %2336 = vrot.lane.b32.xlu1 %v2301_v30, %s3760_s20  ;;  %v773_v21 = vadd.f32 %v755_v0, %v685_v19  ;;  %v863_v46 = vadd.f32 %v845_v11, %v775_v38  ;;  %v6810_v15 = vld [vmem:[#allocation75_spill] sm:$0xff]  ;;  %v6812_v11 = vld [vmem:[#allocation32_spill] sm:$0xff] }
 0x36e   : > { %6796 = vst [vmem:[#allocation23_spill] sm:$0xff] %v5405_v37  ;;  %2580 = vrot.lane.b32.xlu0 %v2555_v23, %s3763_s29  ;;  %v6802_v37 = vld [vmem:[#allocation28_spill] sm:$0xff]  ;;  %v6807_v23 = vld [vmem:[#allocation30_spill] sm:$0xff] }
 0x36f   : > { %v932_v19 = vsel %vm930_vm4, %v6800_v4, %v6802_v37  ;;  %v861_v0 = vadd.f32 %v843_v31, %v773_v21  ;;  %v1019_v34 = vsel %vm1018_vm5, %v6807_v23, %v6806_v7  ;;  %v779_v4 = vadd.f32 %v761_v9, %v691_v33  ;;  %v6809_v31 = vld [vmem:[#allocation29_spill] sm:$0xff]  ;;  %v6813_v9 = vld [vmem:[#allocation35_spill] sm:$0xff]  ;;  %v6814_v23 = vld [vmem:[#allocation34_spill] sm:$0xff] }
 0x370   : > { %v5426_v30 = vpop.permute.xlu1 %1896  ;;  %v950_v21 = vadd.f32 %v932_v19, %v862_v5  ;;  %v933_v29 = vsel %vm930_vm4, %v6802_v37, %v6809_v31  ;;  %v1020_v33 = vsel %vm1018_vm5, %v6806_v7, %v6812_v11  ;;  %v2472_v19 = vmul.f32 %v4797_v45, %v4201_v12  ;;  %v6815_v37 = vld [vmem:[#allocation33_spill] sm:$0xff]  ;;  %v6817_v31 = vld [vmem:[#allocation78_spill] sm:$0xff]  ;;  %v6819_v7 = vld [vmem:[#allocation91_spill] sm:$0xff] }
 0x371   : > { %6805 = vst [vmem:[#allocation22_spill] sm:$0xff] %v5426_v30  ;;  %v5433_v57 = vpop.permute.xlu0 %2140  ;;  %2406 = vrot.lane.b32.xlu1 %v2380_v47, %s3761_s26  ;;  %v949_v43 = vadd.f32 %v931_v56, %v861_v0  ;;  %v6811_v30 = vld [vmem:[#allocation74_spill] sm:$0xff]  ;;  %v1107_v47 = vsel %vm1106_vm6, %v6814_v23, %v6813_v9  ;;  %v867_v56 = vadd.f32 %v849_v58, %v779_v4  ;;  %v6820_v23 = vld [vmem:[#allocation36_spill] sm:$0xff]  ;;  %v6821_v4 = vld [vmem:[#allocation39_spill] sm:$0xff] }
 0x372   : > { %6808 = vst [vmem:[#allocation24_spill] sm:$0xff] %v5433_v57  ;;  %v937_v38 = vsel %vm930_vm4, %v6811_v30, %v6810_v15  ;;  %2676 = vrot.lane.b32.xlu0 %v2647_v27, %s3764_s9  ;;  %v1021_v5 = vsel %vm1018_vm5, %v6812_v11, %v6815_v37  ;;  %v6816_v30 = vld [vmem:[#allocation79_spill] sm:$0xff]  ;;  %v2739_v15 = vmul.f32 %v6819_v7, %v4130_v18 }
 0x373   : > { %v1037_v0 = vadd.f32 %v1019_v34, %v949_v43  ;;  %v1025_v27 = vsel %vm1018_vm5, %v6817_v31, %v6816_v30  ;;  %v951_v36 = vadd.f32 %v933_v29, %v863_v46  ;;  %v1108_v58 = vsel %vm1106_vm6, %v6813_v9, %v6820_v23  ;;  %v6822_v34 = vld [vmem:[#allocation38_spill] sm:$0xff]  ;;  %v6824_v7 = vld [vmem:[#allocation83_spill] sm:$0xff] }
 0x374   : > { %v5457_v17 = vpop.permute.xlu1 %1966  ;;  %v1195_v43 = vsel %vm1194_vm7, %v6822_v34, %v6821_v4  ;;  %v955_v57 = vadd.f32 %v937_v38, %v867_v56  ;;  %v1038_v37 = vadd.f32 %v1020_v33, %v950_v21  ;;  %v6825_v46 = vld [vmem:[#allocation82_spill] sm:$0xff]  ;;  %v5480_v38 = vmul.f32 %v6795_v40, %v4130_v18 }
 0x375   : > { %6818 = vst [vmem:[#allocation14_spill] sm:$0xff] %v5457_v17  ;;  %v5467_v11 = vpop.permute.xlu0 %2236  ;;  %2502 = vrot.lane.b32.xlu1 %v2472_v19, %s3762_s28  ;;  %v1125_v31 = vadd.f32 %v1107_v47, %v1037_v0  ;;  %v690_v17 = vmul.f32 %v6790_v3, %v4201_v12  ;;  %v1113_v29 = vsel %vm1106_vm6, %v6825_v46, %v6824_v7  ;;  %v6826_v3 = vld [vmem:[#allocation37_spill] sm:$0xff]  ;;  %v6827_v0 = vld [vmem:[#allocation87_spill] sm:$0xff]  ;;  %v6828_v34 = vld [vmem:[#allocation86_spill] sm:$0xff] }
 0x376   : > { %6823 = vst [vmem:[#allocation25_spill] sm:$0xff] %v5467_v11  ;;  %2772 = vrot.lane.b32.xlu0 %v2739_v15, %s3765_s13  ;;  %v5476_v9 = vadd.f32 %v1021_v5, %v951_v36  ;;  %v1043_v56 = vadd.f32 %v1025_v27, %v955_v57  ;;  %v2564_v21 = vmul.f32 %v4712_v53, %v4126_v63  ;;  %v6829_v5 = vld [vmem:[#allocation40_spill] sm:$0xff]  ;;  %v6830_v57 = vld [vmem:[#allocation45_spill] sm:$0xff]  ;;  %v6838_v11 = vld [vmem:[#allocation118_spill] sm:$0xff] }
 0x377   : > { %v5484_v33 = vadd.f32 %v1108_v58, %v1038_v37  ;;  %v1109_v47 = vsel %vm1106_vm6, %v6820_v23, %v6826_v3  ;;  %v1213_v19 = vadd.f32 %v1195_v43, %v1125_v31  ;;  %v1201_v36 = vsel %vm1194_vm7, %v6828_v34, %v6827_v0  ;;  %v6831_v27 = vld [vmem:[#allocation44_spill] sm:$0xff]  ;;  %v6833_v23 = vld [vmem:[#allocation43_spill] sm:$0xff]  ;;  %v6834_v43 = vld [vmem:[#allocation42_spill] sm:$0xff] }
 0x378   : > { %v5492_v15 = vpop.permute.xlu1 %2062  ;;  %v1196_v18 = vsel %vm1194_vm7, %v6821_v4, %v6829_v5  ;;  %v760_v58 = vsel %vm754_vm2, %v6831_v27, %v6830_v57  ;;  %v1131_v37 = vadd.f32 %v1113_v29, %v1043_v56  ;;  %v758_v31 = vsel %vm754_vm2, %v6834_v43, %v6833_v23  ;;  %v3585_v56 = vld [vmem:[%s6445_s4 + $0x8] sm:$0xff] }
 0x379   : > { %v5500_v46 = vpop.permute.xlu0 %2332  ;;  %2598 = vrot.lane.b32.xlu1 %v2564_v21, %s3763_s29  ;;  %v759_v3 = vsel %vm754_vm2, %v6833_v23, %v6831_v27  ;;  %v1289_v4 = vsel %vm1282_vm8, %v4880_v50, %v4870_v49  ;;  %v1283_v29 = vsel %vm1282_vm8, %v4950_v55, %v4920_v14  ;;  %v6835_v21 = vld [vmem:[#allocation49_spill] sm:$0xff]  ;;  %v6836_v34 = vld [vmem:[#allocation48_spill] sm:$0xff]  ;;  %v2470_v27 = vmul.f32 %v4797_v45, %v4187_v13 }
 0x37a   : > { %6832 = vst [vmem:[#allocation66_spill] sm:$0xff] %v5500_v46  ;;  %2811 = vperm.xlu0 %3483, %v3585_v56   ;;  %v848_v57 = vsel %vm842_vm3, %v6836_v34, %v6835_v21  ;;  %v1219_v43 = vadd.f32 %v1201_v36, %v1131_v37  ;;  %v778_v23 = vadd.f32 %v760_v58, %v690_v17  ;;  %v6837_v50 = vld [vmem:[#allocation96_spill] sm:$0xff]  ;;  %v6840_v21 = vld [vmem:[#allocation53_spill] sm:$0xff] }
 0x37b   : > { %v1377_v49 = vsel %vm1370_vm9, %v6838_v11, %v6837_v50  ;;  %v1371_v55 = vsel %vm1370_vm9, %v5000_v16, %v4970_v35  ;;  %v2646_v56 = vmul.f32 %v4838_v10, %v4187_v13  ;;  %v6841_v36 = vld [vmem:[#allocation52_spill] sm:$0xff]  ;;  %v1301_v17 = vadd.f32 %v1283_v29, %v1213_v19  ;;  %v6842_v45 = vld [vmem:[#allocation57_spill] sm:$0xff] }
 0x37c   : > { %v5529_v14 = vpop.permute.xlu1 %2158  ;;  %v936_v37 = vsel %vm930_vm4, %v6841_v36, %v6840_v21  ;;  %v1307_v0 = vadd.f32 %v1289_v4, %v1219_v43  ;;  %v866_v11 = vadd.f32 %v848_v57, %v778_v23  ;;  %v6843_v50 = vld [vmem:[#allocation56_spill] sm:$0xff]  ;;  %v2205_v19 = vmul.f32 %v4740_v44, %v4105_v59  ;;  %v6848_v23 = vld [vmem:[#allocation46_spill] sm:$0xff] }
 0x37d   : > { %6839 = vst [vmem:[#allocation27_spill] sm:$0xff] %v5529_v14  ;;  %v5536_v58 = vpop.permute.xlu0 %2138  ;;  %2498 = vrot.lane.b32.xlu1 %v2470_v27, %s3762_s28  ;;  %v1024_v16 = vsel %vm1018_vm5, %v6843_v50, %v6842_v45  ;;  %v6844_v14 = vld [vmem:[#allocation126_spill] sm:$0xff]  ;;  %v1389_v4 = vadd.f32 %v1371_v55, %v1301_v17  ;;  %v6845_v29 = vmov 0   ;;  %v776_v57 = vadd.f32 %v758_v31, %v5387_v51 }
 0x37e   : > { %v1465_v35 = vsel %vm6579_vm10, %v6844_v14, %v4940_v54  ;;  %2674 = vrot.lane.b32.xlu0 %v2646_v56, %s3764_s9  ;;  %v1395_v21 = vadd.f32 %v1377_v49, %v1307_v0  ;;  %v954_v43 = vadd.f32 %v936_v37, %v866_v11  ;;  %v1553_v45 = vsel %vm6581_vm11, %v5010_v62, %v4990_v8  ;;  %v6847_v0 = vld [vmem:[#allocation47_spill] sm:$0xff]  ;;  %v6849_v56 = vld [vmem:[#allocation61_spill] sm:$0xff]  ;;  %v6850_v37 = vld [vmem:[#allocation60_spill] sm:$0xff] }
 0x37f   : > { %3485 = vset.pattern.permute.xlu0 %v6845_v29  ;;  %v2381_v14 = vmul.f32 %v4782_v39, %v4105_v59  ;;  %v777_v49 = vadd.f32 %v759_v3, %v5401_v60  ;;  %v846_v44 = vsel %vm842_vm3, %v6848_v23, %v6847_v0  ;;  %v847_v51 = vsel %vm842_vm3, %v6847_v0, %v6836_v34  ;;  %v6851_v39 = vld [vmem:[#allocation117_spill] sm:$0xff]  ;;  %v6852_v11 = vld [vmem:[#allocation123_spill] sm:$0xff] }
 0x380   : > { %v5553_v27 = vpop.permute.xlu1 %2058  ;;  %v1483_v31 = vadd.f32 %v1465_v35, %v1395_v21  ;;  %v1042_v62 = vadd.f32 %v1024_v16, %v954_v43  ;;  %v1112_v17 = vsel %vm1106_vm6, %v6850_v37, %v6849_v56  ;;  %v1459_v60 = vsel %vm6579_vm10, %v6852_v11, %v6851_v39  ;;  %v6854_v23 = vld [vmem:[#allocation65_spill] sm:$0xff]  ;;  %v6859_v56 = vld [vmem:[#allocation132_spill] sm:$0xff]  ;;  %v6862_v11 = vld [vmem:[#allocation50_spill] sm:$0xff] }
 0x381   : > { %6846 = vst [vmem:[#allocation26_spill] sm:$0xff] %v5553_v27  ;;  %v2331_v55 = vpop.permute.xlu0 %2330  ;;  %2232 = vrot.lane.b32.xlu1 %v2205_v19, %s3759_s19  ;;  %v1477_v35 = vadd.f32 %v1459_v60, %v1389_v4  ;;  %v2389_v16 = vmul.f32 %v4690_v22, %v4138_v6  ;;  %v5579_v21 = vadd.f32 %v1109_v47, %v5476_v9  ;;  %v6855_v9 = vld [vmem:[#allocation64_spill] sm:$0xff]  ;;  %v6868_v29 = vld [vmem:[#allocation101_spill] sm:$0xff]  ;;  %s3645_s19 = scalar_lea.vmem %s3644_s18, 1536 }
 0x382   : > { %v5573_v3 = vsel %vm6575_vm12, %v2331_v55, %v5500_v46  ;;  %2408 = vrot.lane.b32.xlu0 %v2381_v14, %s3761_s26  ;;  %v1571_v34 = vadd.f32 %v1553_v45, %v1483_v31  ;;  %v5582_v19 = vadd.f32 %v1196_v18, %v5484_v33  ;;  %v5586_v43 = vmul.f32 %v6795_v40, %v4126_v63  ;;  %v6856_v40 = vld [vmem:[#allocation121_spill] sm:$0xff]  ;;  %v6857_v18 = vld [vmem:[#allocation124_spill] sm:$0xff]  ;;  %v6858_v55 = vld [vmem:[#allocation127_spill] sm:$0xff] }
 0x383   : > { %v2565_v14 = vmul.f32 %v4712_v53, %v4138_v6  ;;  %v5592_v4 = vadd.f32 %v846_v44, %v776_v57  ;;  %v5594_v45 = vadd.f32 %v847_v51, %v777_v49  ;;  %v1130_v22 = vadd.f32 %v1112_v17, %v1042_v62  ;;  %v6860_v57 = vld [vmem:[#allocation136_spill] sm:$0xff]  ;;  %v6861_v17 = vld [vmem:[#allocation51_spill] sm:$0xff]  ;;  %v6870_v46 = vld [vmem:[#allocation133_spill] sm:$0xff] }
 0x384   : > { %v5588_v0 = vpop.permute.xlu1 %1792  ;;  %v1200_v47 = vsel %vm1194_vm7, %v6855_v9, %v6854_v23  ;;  %v1641_v31 = vsel %vm1634_vm13, %v6857_v18, %v6856_v40  ;;  %v1547_v53 = vsel %vm6581_vm11, %v6859_v56, %v6858_v55  ;;  %v1635_v49 = vsel %vm1634_vm13, %v5054_v24, %v6860_v57  ;;  %v6864_v23 = vld [vmem:[#allocation114_spill] sm:$0xff]  ;;  %v6871_v27 = vld [vmem:[#allocation140_spill] sm:$0xff] }
 0x385   : > { %6853 = vst [vmem:[#allocation28_spill] sm:$0xff] %v5588_v0  ;;  %v5599_v33 = vpop.permute.xlu0 %2064  ;;  %2424 = vrot.lane.b32.xlu1 %v2389_v16, %s3761_s26  ;;  %v1659_v44 = vadd.f32 %v1641_v31, %v1571_v34  ;;  %v1565_v51 = vadd.f32 %v1547_v53, %v1477_v35  ;;  %v2468_v62 = vmul.f32 %v4807_v32, %v4093_v42  ;;  %v6863_v16 = vld [vmem:[#allocation115_spill] sm:$0xff]  ;;  %v6874_v55 = vld [vmem:[#allocation150_spill] sm:$0xff]  ;;  %vm2074_vm12 = vcmask 547840   ;;  %v6895_v40 = vld [vmem:[#allocation24_spill] sm:$0xff] }
 0x386   : > { %2600 = vrot.lane.b32.xlu0 %v2565_v14, %s3763_s29  ;;  %v934_v60 = vsel %vm930_vm4, %v6862_v11, %v6861_v17  ;;  %v1288_v18 = vsel %vm1282_vm8, %v6864_v23, %v6863_v16  ;;  %v1723_v24 = vsel %vm1722_vm14, %v5114_v52, %v5084_v2  ;;  %v6866_v35 = vld [vmem:[#allocation107_spill] sm:$0xff]  ;;  %v1218_v14 = vadd.f32 %v1200_v47, %v1130_v22  ;;  %v6867_v16 = vld [vmem:[#allocation125_spill] sm:$0xff]  ;;  %v6872_v2 = vld [vmem:[#allocation134_spill] sm:$0xff] }
 0x387   : > { %v2644_v34 = vmul.f32 %v6866_v35, %v4093_v42  ;;  %v1653_v31 = vadd.f32 %v1635_v49, %v1565_v51  ;;  %v2560_v11 = vmul.f32 %v4818_v41, %v4201_v12  ;;  %v1376_v0 = vsel %vm1370_vm9, %v6868_v29, %v6867_v16  ;;  %v6869_v52 = vld [vmem:[#allocation131_spill] sm:$0xff]  ;;  %v6873_v16 = vld [vmem:[#allocation110_spill] sm:$0xff] }
 0x388   : > { %v5623_v56 = vpop.permute.xlu1 %1984  ;;  %v1817_v22 = vsel %vm6583_vm15, %v5064_v28, %v6871_v27  ;;  %v1811_v47 = vsel %vm6583_vm15, %v5174_v61, %v5144_v20  ;;  %v1306_v49 = vadd.f32 %v1288_v18, %v1218_v14  ;;  %v1464_v57 = vsel %vm6579_vm10, %v6873_v16, %v6872_v2  ;;  %v6876_v61 = vld [vmem:[#allocation109_spill] sm:$0xff]  ;;  %v6878_v2 = vld [vmem:[#allocation144_spill] sm:$0xff]  ;;  %v6879_v14 = vld [vmem:[#allocation139_spill] sm:$0xff] }
 0x389   : > { %6865 = vst [vmem:[#allocation70_spill] sm:$0xff] %v5623_v56  ;;  %v5627_v53 = vpop.permute.xlu0 %2228  ;;  %2494 = vrot.lane.b32.xlu1 %v2468_v62, %s3762_s28  ;;  %v1729_v56 = vsel %vm1722_vm14, %v6870_v46, %v6869_v52  ;;  %v1741_v62 = vadd.f32 %v1723_v24, %v1653_v31  ;;  %v1905_v46 = vsel %vm1898_vm0, %v5124_v48, %v6874_v55  ;;  %v6880_v31 = vld [vmem:[#allocation160_spill] sm:$0xff]  ;;  %vm2162_vm10 = vcmask 539648   ;;  %v6887_v55 = vld [vmem:[#allocation173_spill] sm:$0xff]  ;;  %v6889_v52 = vld [vmem:[#allocation195_spill] sm:$0xff] }
 0x38a   : > { %2670 = vrot.lane.b32.xlu0 %v2644_v34, %s3764_s9  ;;  %v1747_v51 = vadd.f32 %v1729_v56, %v1659_v44  ;;  %v1899_v28 = vsel %vm1898_vm0, %v5234_v26, %v5204_v25  ;;  %v2736_v18 = vmul.f32 %v6876_v61, %v4201_v12  ;;  %v1394_v44 = vadd.f32 %v1376_v0, %v1306_v49  ;;  %v6882_v25 = vld [vmem:[#allocation183_spill] sm:$0xff]  ;;  %v6883_v0 = vld [vmem:[#allocation90_spill] sm:$0xff] }
 0x38b   : > { %v1829_v56 = vadd.f32 %v1811_v47, %v1741_v62  ;;  %v1552_v48 = vsel %vm6581_vm11, %v6879_v14, %v6878_v2  ;;  %v1993_v26 = vsel %vm1986_vm1, %v5184_v1, %v6880_v31  ;;  %v6885_v62 = vld [vmem:[#allocation149_spill] sm:$0xff]  ;;  %vm2250_vm11 = vcmask 531456  }
 0x38c   : > { %v5654_v27 = vpop.permute.xlu1 %2054  ;;  %v1835_v24 = vadd.f32 %v1817_v22, %v1747_v51  ;;  %v2652_v22 = vmul.f32 %v6883_v0, %v4126_v63  ;;  %v1482_v47 = vadd.f32 %v1464_v57, %v1394_v44  ;;  %v6884_v51 = vld [vmem:[#allocation154_spill] sm:$0xff]  ;;  %v6888_v31 = vld [vmem:[#allocation189_spill] sm:$0xff] }
 0x38d   : > { %6875 = vst [vmem:[#allocation31_spill] sm:$0xff] %v5654_v27  ;;  %v5658_v34 = vpop.permute.xlu0 %2324  ;;  %2590 = vrot.lane.b32.xlu1 %v2560_v11, %s3763_s29  ;;  %v6881_v27 = vld [vmem:[#allocation177_spill] sm:$0xff]  ;;  %v1917_v11 = vadd.f32 %v1899_v28, %v1829_v56  ;;  %v1640_v2 = vsel %vm1634_vm13, %v6885_v62, %v6884_v51  ;;  %v952_v56 = vadd.f32 %v934_v60, %v5592_v4  ;;  %v6892_v51 = vld [vmem:[#allocation159_spill] sm:$0xff] }
 0x38e   : > { %6877 = vst [vmem:[#allocation30_spill] sm:$0xff] %v5658_v34  ;;  %v1987_v20 = vsel %vm1986_vm1, %v6882_v25, %v6881_v27  ;;  %2766 = vrot.lane.b32.xlu0 %v2736_v18, %s3765_s13  ;;  %v1923_v49 = vadd.f32 %v1905_v46, %v1835_v24  ;;  %v6886_v34 = vld [vmem:[#allocation170_spill] sm:$0xff]  ;;  %v2075_v25 = vsel %vm2074_vm12, %v6889_v52, %v6888_v31  ;;  %v6890_v27 = vld [vmem:[#allocation15_spill] sm:$0xff]  ;;  %v6893_v52 = vld [vmem:[#allocation181_spill] sm:$0xff] }
 0x38f   : > { %v2081_v1 = vsel %vm2074_vm12, %v6887_v55, %v6886_v34  ;;  %v2642_v57 = vmul.f32 %v6866_v35, %v6890_v27  ;;  %v1570_v46 = vadd.f32 %v1552_v48, %v1482_v47  ;;  %v2005_v44 = vadd.f32 %v1987_v20, %v1917_v11  ;;  %v6891_v55 = vld [vmem:[#allocation164_spill] sm:$0xff]  ;;  %v6894_v31 = vld [vmem:[#allocation185_spill] sm:$0xff] }
 0x390   : > { %v5682_v18 = vpop.permute.xlu1 %2150  ;;  %v2011_v28 = vadd.f32 %v1993_v26, %v1923_v49  ;;  %v1728_v34 = vsel %vm1722_vm14, %v6892_v51, %v6891_v55  ;;  %v2169_v62 = vsel %vm2162_vm10, %v6894_v31, %v6893_v52  ;;  %v2163_v48 = vsel %vm2162_vm10, %v5536_v58, %v6895_v40  ;;  %v6897_v49 = vld [vmem:[#allocation169_spill] sm:$0xff] }
 0x391   : > { %v5686_v24 = vpop.permute.xlu0 %2420  ;;  %2686 = vrot.lane.b32.xlu1 %v2652_v22, %s3764_s9  ;;  %v1658_v20 = vadd.f32 %v1640_v2, %v1570_v46  ;;  %v2093_v47 = vadd.f32 %v2075_v25, %v2005_v44  ;;  %v2466_v4 = vmul.f32 %v4807_v32, %v6890_v27  ;;  %v935_v60 = vsel %vm930_vm4, %v6861_v17, %v6841_v36  ;;  %v6896_v22 = vld [vmem:[#allocation175_spill] sm:$0xff]  ;;  %v6898_v11 = vld [vmem:[#allocation193_spill] sm:$0xff]  ;;  %v6902_v25 = vld [vmem:[#allocation54_spill] sm:$0xff] }
 0x392   : > { %2666 = vrot.lane.b32.xlu0 %v2642_v57, %s3764_s9  ;;  %v2099_v26 = vadd.f32 %v2081_v1, %v2011_v28  ;;  %v1816_v31 = vsel %vm6583_vm15, %v6897_v49, %v6896_v22  ;;  %v6899_v55 = vld [vmem:[#allocation197_spill] sm:$0xff]  ;;  %v2469_v2 = vmul.f32 %v4807_v32, %v4105_v59  ;;  %v6901_v1 = vld [vmem:[#allocation55_spill] sm:$0xff]  ;;  %v6903_v44 = vld [vmem:[#allocation68_spill] sm:$0xff]  ;;  %vm2426_vm15 = vcmask 392192  }
 0x393   : > { %v2257_v58 = vsel %vm2250_vm11, %v6899_v55, %v6898_v11  ;;  %v1022_v57 = vsel %vm1018_vm5, %v6902_v25, %v6901_v1  ;;  %v1746_v46 = vadd.f32 %v1728_v34, %v1658_v20  ;;  %v2181_v36 = vadd.f32 %v2163_v48, %v2093_v47  ;;  %v6904_v22 = vld [vmem:[#allocation67_spill] sm:$0xff]  ;;  %v6906_v11 = vld [vmem:[#allocation180_spill] sm:$0xff] }
 0x394   : > { %v5711_v40 = vpop.permute.xlu1 %2246  ;;  %v2187_v28 = vadd.f32 %v2169_v62, %v2099_v26  ;;  %v762_v52 = vsel %vm754_vm2, %v6904_v22, %v6903_v44  ;;  %v6905_v55 = vld [vmem:[#allocation187_spill] sm:$0xff]  ;;  %v2558_v34 = vmul.f32 %v4818_v41, %v4187_v13  ;;  %v6907_v26 = vld [vmem:[#allocation41_spill] sm:$0xff]  ;;  %v6909_v22 = vld [vmem:[#allocation192_spill] sm:$0xff] }
 0x395   : > { %6900 = vst [vmem:[#allocation29_spill] sm:$0xff] %v5711_v40  ;;  %v2227_v17 = vpop.permute.xlu0 %2226  ;;  %2490 = vrot.lane.b32.xlu1 %v2466_v4, %s3762_s28  ;;  %v1904_v40 = vsel %vm1898_vm0, %v6906_v11, %v6905_v55  ;;  %v1834_v62 = vadd.f32 %v1816_v31, %v1746_v46  ;;  %v1197_v47 = vsel %vm1194_vm7, %v6829_v5, %v6907_v26  ;;  %v6908_v25 = vld [vmem:[#allocation23_spill] sm:$0xff] }
 0x396   : > { %v2251_v32 = vsel %vm2250_vm11, %v2227_v17, %v5627_v53  ;;  %2496 = vrot.lane.b32.xlu0 %v2469_v2, %s3762_s28  ;;  %v2275_v48 = vadd.f32 %v2257_v58, %v2187_v28  ;;  %v953_v4 = vadd.f32 %v935_v60, %v5594_v45  ;;  %v1992_v17 = vsel %vm1986_vm1, %v6909_v22, %v6908_v25  ;;  %v6910_v58 = vld [vmem:[#allocation69_spill] sm:$0xff]  ;;  %v6911_v60 = vld [vmem:[#allocation72_spill] sm:$0xff] }
 0x397   : > { %v5730_v20 = vadd.f32 %v2251_v32, %v2181_v36  ;;  %v2653_v2 = vmul.f32 %v6883_v0, %v4138_v6  ;;  %v1040_v31 = vadd.f32 %v1022_v57, %v952_v56  ;;  %v763_v46 = vsel %vm754_vm2, %v6903_v44, %v6910_v58  ;;  %v6912_v32 = vld [vmem:[#allocation71_spill] sm:$0xff]  ;;  %v6917_v58 = vld [vmem:[#allocation92_spill] sm:$0xff] }
 0x398   : > { %v5739_v55 = vpop.permute.xlu1 %2146  ;;  %v1922_v28 = vadd.f32 %v1904_v40, %v1834_v62  ;;  %v2363_v36 = vadd.f32 %v5573_v3, %v2275_v48  ;;  %v780_v45 = vadd.f32 %v762_v52, %v5480_v38  ;;  %v850_v26 = vsel %vm842_vm3, %v6912_v32, %v6911_v60  ;;  %v6913_v40 = vld [vmem:[#allocation73_spill] sm:$0xff]  ;;  %v6914_v38 = vld [vmem:[#allocation94_spill] sm:$0xff]  ;;  %v6915_v62 = vld [vmem:[#allocation76_spill] sm:$0xff] }
 0x399   : > { %v2419_v5 = vpop.permute.xlu0 %2418  ;;  %2586 = vrot.lane.b32.xlu1 %v2558_v34, %s3763_s29  ;;  %v2080_v0 = vsel %vm2074_vm12, %v5492_v15, %v5599_v33  ;;  %v851_v3 = vsel %vm842_vm3, %v6911_v60, %v6913_v40  ;;  %v2293_v52 = vmul.f32 %v6914_v38, %v4105_v59  ;;  %v1023_v34 = vsel %vm1018_vm5, %v6901_v1, %v6843_v50  ;;  %v6916_v48 = vld [vmem:[#allocation75_spill] sm:$0xff]  ;;  %v6920_v32 = vld [vmem:[#allocation77_spill] sm:$0xff]  ;;  %v6921_v40 = vld [vmem:[#allocation80_spill] sm:$0xff] }
 0x39a   : > { %v2433_v56 = vsel %vm2426_vm15, %v2419_v5, %v5686_v24  ;;  %2688 = vrot.lane.b32.xlu0 %v2653_v2, %s3764_s9  ;;  %v2010_v57 = vadd.f32 %v1992_v17, %v1922_v28  ;;  %v781_v33 = vadd.f32 %v763_v46, %v5586_v43  ;;  %v938_v25 = vsel %vm930_vm4, %v6916_v48, %v6915_v62  ;;  %v6918_v28 = vld [vmem:[#allocation59_spill] sm:$0xff]  ;;  %v6924_v48 = vld [vmem:[#allocation84_spill] sm:$0xff] }
 0x39b   : > { %v5761_v44 = vadd.f32 %v2433_v56, %v2363_v36  ;;  %v2732_v17 = vmul.f32 %v6917_v58, %v4093_v42  ;;  %v6919_v36 = vld [vmem:[#allocation58_spill] sm:$0xff]  ;;  %v868_v60 = vadd.f32 %v850_v26, %v780_v45  ;;  %v939_v50 = vsel %vm930_vm4, %v6915_v62, %v6920_v32  ;;  %v6922_v62 = vld [vmem:[#allocation81_spill] sm:$0xff] }
 0x39c   : > { %v5772_v2 = vpop.permute.xlu1 %1880  ;;  %v1110_v5 = vsel %vm1106_vm6, %v6919_v36, %v6918_v28  ;;  %v2098_v1 = vadd.f32 %v2080_v0, %v2010_v57  ;;  %v1111_v46 = vsel %vm1106_vm6, %v6918_v28, %v6850_v37  ;;  %v869_v56 = vadd.f32 %v851_v3, %v781_v33  ;;  %v6927_v32 = vld [vmem:[#allocation62_spill] sm:$0xff] }
 0x39d   : > { %v2153_v43 = vpop.permute.xlu0 %2152  ;;  %2320 = vrot.lane.b32.xlu1 %v2293_v52, %s3760_s20  ;;  %v1026_v38 = vsel %vm1018_vm5, %v6816_v30, %v6921_v40  ;;  %v956_v26 = vadd.f32 %v938_v25, %v868_v60  ;;  %v1027_v0 = vsel %vm1018_vm5, %v6921_v40, %v6922_v62  ;;  %v6923_v52 = vld [vmem:[#allocation89_spill] sm:$0xff]  ;;  %v1041_v3 = vadd.f32 %v1023_v34, %v953_v4  ;;  %v6926_v60 = vld [vmem:[#allocation63_spill] sm:$0xff] }
 0x39e   : > { %v2168_v45 = vsel %vm2162_vm10, %v5682_v18, %v2153_v43  ;;  %2758 = vrot.lane.b32.xlu0 %v2732_v17, %s3765_s13  ;;  %v2477_v37 = vmul.f32 %v6923_v52, %v4138_v6  ;;  %v957_v33 = vadd.f32 %v939_v50, %v869_v56  ;;  %v1114_v30 = vsel %vm1106_vm6, %v6824_v7, %v6924_v48  ;;  %v6925_v17 = vld [vmem:[#allocation103_spill] sm:$0xff]  ;;  %v6928_v40 = vld [vmem:[#allocation85_spill] sm:$0xff] }
 0x39f   : > { %v5795_v57 = vadd.f32 %v2168_v45, %v2098_v1  ;;  %v2557_v25 = vmul.f32 %v6925_v17, %v4105_v59  ;;  %v1128_v36 = vadd.f32 %v1110_v5, %v1040_v31  ;;  %v1198_v1 = vsel %vm1194_vm7, %v6927_v32, %v6926_v60  ;;  %v6930_v31 = vld [vmem:[#allocation88_spill] sm:$0xff]  ;;  %v6931_v5 = vld [vmem:[#allocation87_spill] sm:$0xff]  ;;  %v6933_v62 = vld [vmem:[#allocation97_spill] sm:$0xff] }
 0x3a0   : > { %v5802_v28 = vpop.permute.xlu1 %2072  ;;  %v1044_v43 = vadd.f32 %v1026_v38, %v956_v26  ;;  %v1115_v4 = vsel %vm1106_vm6, %v6924_v48, %v6928_v40  ;;  %v1129_v7 = vadd.f32 %v1111_v46, %v1041_v3  ;;  %v1199_v50 = vsel %vm1194_vm7, %v6926_v60, %v6855_v9  ;;  %v6932_v26 = vld [vmem:[#allocation95_spill] sm:$0xff]  ;;  %v6934_v48 = vld [vmem:[#allocation98_spill] sm:$0xff] }
 0x3a1   : > { %v5812_v34 = vpop.permute.xlu0 %2316  ;;  %2512 = vrot.lane.b32.xlu1 %v2477_v37, %s3762_s28  ;;  %v1045_v56 = vadd.f32 %v1027_v0, %v957_v33  ;;  %v1202_v45 = vsel %vm1194_vm7, %v6931_v5, %v6930_v31  ;;  %v1286_v52 = vsel %vm1282_vm8, %v6933_v62, %v6932_v26  ;;  %v1203_v46 = vsel %vm1194_vm7, %v6930_v31, %v6934_v48  ;;  %v6937_v40 = vld [vmem:[#allocation111_spill] sm:$0xff] }
 0x3a2   : > { %6929 = vst [vmem:[#allocation74_spill] sm:$0xff] %v5812_v34  ;;  %2584 = vrot.lane.b32.xlu0 %v2557_v25, %s3763_s29  ;;  %v1132_v38 = vadd.f32 %v1114_v30, %v1044_v43  ;;  %v2556_v37 = vmul.f32 %v6925_v17, %v4093_v42  ;;  %v5831_v9 = vadd.f32 %v1197_v47, %v5579_v21  ;;  %v6935_v30 = vld [vmem:[#allocation91_spill] sm:$0xff]  ;;  %v6936_v43 = vld [vmem:[#allocation93_spill] sm:$0xff]  ;;  %vm6950_vm2 = vcmask 850944  }
 0x3a3   : > { %v1216_v0 = vadd.f32 %v1198_v1, %v1128_v36  ;;  %v1133_v3 = vadd.f32 %v1115_v4, %v1045_v56  ;;  %v2741_v25 = vmul.f32 %v6935_v30, %v4138_v6  ;;  %v1217_v60 = vadd.f32 %v1199_v50, %v1129_v7  ;;  %v6939_v36 = vld [vmem:[#allocation106_spill] sm:$0xff]  ;;  %v6941_v50 = vld [vmem:[#allocation116_spill] sm:$0xff]  ;;  %v6944_v62 = vld [vmem:[#allocation99_spill] sm:$0xff] }
 0x3a4   : > { %v5833_v33 = vpop.permute.xlu1 %2142  ;;  %v1220_v32 = vadd.f32 %v1202_v45, %v1132_v38  ;;  %v1290_v5 = vsel %vm1282_vm8, %v6937_v40, %v6936_v43  ;;  %v2740_v42 = vmul.f32 %v6935_v30, %v4126_v63  ;;  %v1291_v1 = vsel %vm1282_vm8, %v6936_v43, %v6939_v36  ;;  %v6940_v6 = vld [vmem:[#allocation18_spill] sm:$0xff]  ;;  %v6942_v56 = vld [vmem:[#allocation96_spill] sm:$0xff]  ;;  %v6943_v38 = vld [vmem:[#allocation21_spill] sm:$0xff] }
 0x3a5   : > { %v5840_v31 = vpop.permute.xlu0 %2412  ;;  %2582 = vrot.lane.b32.xlu1 %v2556_v37, %s3763_s29  ;;  %v1304_v21 = vadd.f32 %v1286_v52, %v1216_v0  ;;  %v1221_v47 = vadd.f32 %v1203_v46, %v1133_v3  ;;  %v5851_v4 = vmul.f32 %v6935_v30, %v6940_v6  ;;  %v1287_v7 = vsel %vm1282_vm8, %v6932_v26, %v6864_v23  ;;  %v6945_v46 = vld [vmem:[#allocation100_spill] sm:$0xff]  ;;  %v6947_v3 = vld [vmem:[#allocation122_spill] sm:$0xff]  ;;  %vm6956_vm3 = vmmov %vm6950_vm2 }
 0x3a6   : > { %6938 = vst [vmem:[#allocation32_spill] sm:$0xff] %v5840_v31  ;;  %2776 = vrot.lane.b32.xlu0 %v2741_v25, %s3765_s13  ;;  %v1378_v63 = vsel %vm1370_vm9, %v6942_v56, %v6941_v50  ;;  %v2648_v45 = vmul.f32 %v4838_v10, %v4201_v12  ;;  %v5863_v52 = vmul.f32 %v6944_v62, %v6943_v38  ;;  %v6946_v37 = vld [vmem:[#allocation120_spill] sm:$0xff]  ;;  %v6949_v40 = vld [vmem:[#allocation102_spill] sm:$0xff]  ;;  %vm6957_vm4 = vmmov %vm6950_vm2  ;;  %vm6959_vm5 = vcmask 719872  }
 0x3a7   : > { %v1308_v48 = vadd.f32 %v1290_v5, %v1220_v32  ;;  %v1284_v0 = vsel %vm1282_vm8, %v6946_v37, %v6945_v46  ;;  %v6948_v30 = vld [vmem:[#allocation104_spill] sm:$0xff]  ;;  %v2737_v25 = vmul.f32 %v6876_v61, %v6943_v38  ;;  %v1309_v43 = vadd.f32 %v1291_v1, %v1221_v47  ;;  %v6954_v1 = vld [vmem:[#allocation130_spill] sm:$0xff]  ;;  %vm6964_vm6 = vmmov %vm6959_vm5 }
 0x3a8   : > { %v1374_v23 = vsel %vm1370_vm9, %v6948_v30, %v6947_v3  ;;  %v5871_v26 = vpop.permute.xlu1 %2238  ;;  %v1375_v12 = vsel %vm1370_vm9, %v6947_v3, %v6868_v29  ;;  %v1466_v32 = vsel %vm6950_vm2, %v4940_v54, %v6949_v40  ;;  %v2554_v36 = vmul.f32 %v6925_v17, %v6890_v27  ;;  %v6952_v62 = vld [vmem:[#allocation108_spill] sm:$0xff]  ;;  %v6955_v30 = vld [vmem:[#allocation113_spill] sm:$0xff]  ;;  %vm6966_vm7 = vmmov %vm6950_vm2 }
 0x3a9   : > { %v5881_v5 = vpop.permute.xlu0 %2508  ;;  %2678 = vrot.lane.b32.xlu1 %v2648_v45, %s3764_s9  ;;  %v1305_v6 = vadd.f32 %v1287_v7, %v1217_v60  ;;  %v1396_v56 = vadd.f32 %v1378_v63, %v1308_v48  ;;  %v6953_v37 = vld [vmem:[#allocation128_spill] sm:$0xff]  ;;  %v1462_v29 = vsel %vm6956_vm3, %v6955_v30, %v6954_v1  ;;  %v1302_v54 = vadd.f32 %v1284_v0, %v5582_v19  ;;  %v6978_v31 = vld [vmem:[#allocation127_spill] sm:$0xff] }
 0x3aa   : > { %6951 = vst [vmem:[#allocation35_spill] sm:$0xff] %v5881_v5  ;;  %v1372_v47 = vsel %vm1370_vm9, %v6953_v37, %v6952_v62  ;;  %2768 = vrot.lane.b32.xlu0 %v2737_v25, %s3765_s13  ;;  %v1392_v3 = vadd.f32 %v1374_v23, %v1304_v21  ;;  %v1463_v45 = vsel %vm6957_vm4, %v6954_v1, %v6873_v16  ;;  %v6958_v17 = vld [vmem:[#allocation112_spill] sm:$0xff]  ;;  %v6962_v23 = vld [vmem:[#allocation135_spill] sm:$0xff]  ;;  %v6965_v1 = vld [vmem:[#allocation137_spill] sm:$0xff]  ;;  %vm6967_vm2 = vcmask 523264  }
 0x3ab   : > { %v1554_v60 = vsel %vm6959_vm5, %v4990_v8, %v6958_v17  ;;  %v1393_v7 = vadd.f32 %v1375_v12, %v1305_v6  ;;  %v1484_v63 = vadd.f32 %v1466_v32, %v1396_v56  ;;  %v6960_v37 = vld [vmem:[#allocation16_spill] sm:$0xff]  ;;  %v1390_v21 = vadd.f32 %v1372_v47, %v1302_v54  ;;  %v6963_v8 = vld [vmem:[#allocation119_spill] sm:$0xff]  ;;  %v6969_v54 = vld [vmem:[#allocation121_spill] sm:$0xff] }
 0x3ac   : > { %v5900_v48 = vpop.permute.xlu1 %2334  ;;  %v5904_v30 = vmul.f32 %v6866_v35, %v6960_v37  ;;  %v6961_v25 = vld [vmem:[#allocation20_spill] sm:$0xff]  ;;  %v1480_v0 = vadd.f32 %v1462_v29, %v1392_v3  ;;  %v1379_v16 = vsel %vm1370_vm9, %v6941_v50, %v6962_v23  ;;  %v1551_v12 = vsel %vm6964_vm6, %v6963_v8, %v6879_v14  ;;  %v6968_v29 = vld [vmem:[#allocation141_spill] sm:$0xff]  ;;  %vm6973_vm4 = vmmov %vm6959_vm5 }
 0x3ad   : > { %v5908_v19 = vmul.f32 %v6876_v61, %v6961_v25  ;;  %v2315_v32 = vpop.permute.xlu0 %2314  ;;  %2774 = vrot.lane.b32.xlu1 %v2740_v42, %s3765_s13  ;;  %v1481_v6 = vadd.f32 %v1463_v45, %v1393_v7  ;;  %v1572_v56 = vadd.f32 %v1554_v60, %v1484_v63  ;;  %v1460_v25 = vsel %vm6966_vm7, %v6851_v39, %v6965_v1  ;;  %v6970_v3 = vld [vmem:[#allocation149_spill] sm:$0xff]  ;;  %v6972_v60 = vld [vmem:[#allocation142_spill] sm:$0xff]  ;;  %v6974_v7 = vld [vmem:[#allocation143_spill] sm:$0xff] }
 0x3ae   : > { %v2339_v47 = vsel %vm6967_vm2, %v2315_v32, %v5812_v34  ;;  %v1642_v50 = vsel %vm1634_vm13, %v6969_v54, %v6968_v29  ;;  %v6971_v23 = vld [vmem:[#allocation129_spill] sm:$0xff]  ;;  %vm2514_vm3 = vcmask 384000   ;;  %v1397_v42 = vadd.f32 %v1379_v16, %v1309_v43  ;;  %vm6976_vm5 = vmmov %vm6966_vm7  ;;  %v6980_v43 = vld [vmem:[#allocation138_spill] sm:$0xff] }
 0x3af   : > { %v1639_v14 = vsel %vm1634_vm13, %v6971_v23, %v6970_v3  ;;  %v5929_v35 = vadd.f32 %v2339_v47, %v5730_v20  ;;  %v1569_v45 = vadd.f32 %v1551_v12, %v1481_v6  ;;  %v1550_v39 = vsel %vm6973_vm4, %v6972_v60, %v6963_v8  ;;  %v6975_v54 = vld [vmem:[#allocation145_spill] sm:$0xff]  ;;  %v6977_v3 = vld [vmem:[#allocation147_spill] sm:$0xff]  ;;  %vm6979_vm6 = vmmov %vm6973_vm4 }
 0x3b0   : > { %v1285_v63 = vsel %vm1282_vm8, %v6945_v46, %v6974_v7  ;;  %v2235_v32 = vpop.permute.xlu1 %2234  ;;  %v1467_v59 = vsel %vm6976_vm5, %v6949_v40, %v6975_v54  ;;  %v1548_v20 = vsel %vm6979_vm6, %v6978_v31, %v6977_v3  ;;  %v1727_v16 = vsel %vm1722_vm14, %v6980_v43, %v6892_v51  ;;  %v6981_v12 = vld [vmem:[#allocation25_spill] sm:$0xff]  ;;  %v6982_v54 = vld [vmem:[#allocation151_spill] sm:$0xff]  ;;  %v6984_v51 = vld [vmem:[#allocation148_spill] sm:$0xff] }
 0x3b1   : > { %v5948_v8 = vsel %vm2250_vm11, %v2235_v32, %v6981_v12  ;;  %v2507_v6 = vpop.permute.xlu0 %2506  ;;  %2578 = vrot.lane.b32.xlu1 %v2554_v36, %s3763_s29  ;;  %v1478_v46 = vadd.f32 %v1460_v25, %v1390_v21  ;;  %v1660_v47 = vadd.f32 %v1642_v50, %v1572_v56  ;;  %v1657_v60 = vadd.f32 %v1639_v14, %v1569_v45  ;;  %v6983_v31 = vld [vmem:[#allocation131_spill] sm:$0xff]  ;;  %v6987_v45 = vld [vmem:[#allocation153_spill] sm:$0xff]  ;;  %vm6993_vm2 = vmmov %vm6973_vm4 }
 0x3b2   : > { %v2521_v40 = vsel %vm2514_vm3, %v2507_v6, %v5881_v5  ;;  %v1568_v7 = vadd.f32 %v1550_v39, %v1480_v0  ;;  %v1730_v10 = vsel %vm1722_vm14, %v6983_v31, %v6982_v54  ;;  %vm6985_vm8 = vcmask 695296   ;;  %v6986_v0 = vld [vmem:[#allocation152_spill] sm:$0xff]  ;;  %v6988_v6 = vld [vmem:[#allocation161_spill] sm:$0xff]  ;;  %v6996_v31 = vld [vmem:[#allocation171_spill] sm:$0xff] }
 0x3b3   : > { %v1815_v34 = vsel %vm6985_vm8, %v6984_v51, %v6897_v49  ;;  %v5960_v32 = vadd.f32 %v2521_v40, %v5761_v44  ;;  %v1303_v36 = vadd.f32 %v1285_v63, %v5831_v9  ;;  %v1485_v21 = vadd.f32 %v1467_v59, %v1397_v42  ;;  %v6989_v49 = vld [vmem:[#allocation140_spill] sm:$0xff]  ;;  %vm6990_vm7 = vmmov %vm6985_vm8  ;;  %v6991_v40 = vld [vmem:[#allocation158_spill] sm:$0xff] }
 0x3b4   : > { %v1566_v56 = vadd.f32 %v1548_v20, %v1478_v46  ;;  %v1745_v25 = vadd.f32 %v1727_v16, %v1657_v60  ;;  %v5963_v50 = vpop.permute.xlu1 %1968  ;;  %v1638_v14 = vsel %vm1634_vm13, %v6986_v0, %v6971_v23  ;;  %v1373_v39 = vsel %vm1370_vm9, %v6952_v62, %v6987_v45  ;;  %v6992_v63 = vld [vmem:[#allocation155_spill] sm:$0xff]  ;;  %v6994_v16 = vld [vmem:[#allocation157_spill] sm:$0xff]  ;;  %v6995_v46 = vld [vmem:[#allocation136_spill] sm:$0xff] }
 0x3b5   : > { %v1818_v44 = vsel %vm6990_vm7, %v6989_v49, %v6988_v6  ;;  %v1903_v59 = vsel %vm1898_vm0, %v6991_v40, %v6906_v11  ;;  %v2241_v9 = vpop.permute.xlu0 %2240  ;;  %2770 = vrot.lane.b32.xlu1 %v5851_v4, %s3765_s13  ;;  %v1748_v42 = vadd.f32 %v1730_v10, %v1660_v47  ;;  %v1555_v23 = vsel %vm6993_vm2, %v6958_v17, %v6992_v63  ;;  %v6997_v0 = vld [vmem:[#allocation150_spill] sm:$0xff]  ;;  %v6998_v45 = vld [vmem:[#allocation168_spill] sm:$0xff]  ;;  %vm7001_vm9 = vmmov %vm6976_vm5 }
 0x3b6   : > { %v1833_v20 = vadd.f32 %v1815_v34, %v1745_v25  ;;  %v2256_v62 = vsel %vm2250_vm11, %v5871_v26, %v2241_v9  ;;  %v1636_v60 = vsel %vm1634_vm13, %v6995_v46, %v6994_v16  ;;  %v1906_v11 = vsel %vm1898_vm0, %v6997_v0, %v6996_v31  ;;  %v6999_v9 = vld [vmem:[#allocation162_spill] sm:$0xff]  ;;  %v7000_v46 = vld [vmem:[#allocation163_spill] sm:$0xff]  ;;  %v7003_v27 = vld [vmem:[#allocation160_spill] sm:$0xff] }
 0x3b7   : > { %v1991_v10 = vsel %vm1986_vm1, %v6998_v45, %v6909_v22  ;;  %v5994_v4 = vadd.f32 %v2256_v62, %v5795_v57  ;;  %v1656_v17 = vadd.f32 %v1638_v14, %v1568_v7  ;;  %v1391_v34 = vadd.f32 %v1373_v39, %v1303_v36  ;;  %v7002_v5 = vld [vmem:[#allocation182_spill] sm:$0xff]  ;;  %v7004_v57 = vld [vmem:[#allocation179_spill] sm:$0xff]  ;;  %vm7007_vm4 = vmmov %vm6990_vm7 }
 0x3b8   : > { %v1836_v47 = vadd.f32 %v1818_v44, %v1748_v42  ;;  %v1921_v25 = vadd.f32 %v1903_v59, %v1833_v20  ;;  %v5996_v49 = vpop.permute.xlu1 %2160  ;;  %v1726_v63 = vsel %vm1722_vm14, %v6999_v9, %v6980_v43  ;;  %v1461_v0 = vsel %vm7001_vm9, %v6965_v1, %v7000_v46  ;;  %v7005_v59 = vld [vmem:[#allocation165_spill] sm:$0xff]  ;;  %v7006_v42 = vld [vmem:[#allocation172_spill] sm:$0xff]  ;;  %v7008_v20 = vld [vmem:[#allocation194_spill] sm:$0xff] }
 0x3b9   : > { %v1994_v22 = vsel %vm1986_vm1, %v7003_v27, %v7002_v5  ;;  %v2079_v7 = vsel %vm2074_vm12, %v7004_v57, %v5492_v15  ;;  %v6010_v36 = vpop.permute.xlu0 %2404  ;;  %2504 = vrot.lane.b32.xlu1 %v5863_v52, %s3762_s28  ;;  %v1573_v14 = vadd.f32 %v1555_v23, %v1485_v21  ;;  %v1654_v39 = vadd.f32 %v1636_v60, %v1566_v56  ;;  %v7009_v62 = vld [vmem:[#allocation170_spill] sm:$0xff]  ;;  %v7010_v9 = vld [vmem:[#allocation191_spill] sm:$0xff]  ;;  %vm7017_vm5 = vmmov %vm6993_vm2  ;;  %s3766_s28 = smov 2  }
 0x3ba   : > { %v1924_v43 = vadd.f32 %v1906_v11, %v1836_v47  ;;  %v2009_v44 = vadd.f32 %v1991_v10, %v1921_v25  ;;  %v1643_v1 = vsel %vm1634_vm13, %v6968_v29, %v7005_v59  ;;  %v1814_v27 = vsel %vm7007_vm4, %v7006_v42, %v6984_v51  ;;  %v7011_v29 = vld [vmem:[#allocation184_spill] sm:$0xff]  ;;  %v7012_v47 = vld [vmem:[#allocation27_spill] sm:$0xff]  ;;  %v7013_v51 = vld [vmem:[#allocation181_spill] sm:$0xff] }
 0x3bb   : > { %v2082_v15 = vsel %vm2074_vm12, %v7009_v62, %v7008_v20  ;;  %v2167_v52 = vsel %vm2162_vm10, %v7010_v9, %v5682_v18  ;;  %v1744_v21 = vadd.f32 %v1726_v63, %v1656_v17  ;;  %v1479_v56 = vadd.f32 %v1461_v0, %v1391_v34  ;;  %v7019_v59 = vld [vmem:[#allocation29_spill] sm:$0xff]  ;;  %vm7035_vm7 = vmmov %vm7007_vm4 }
 0x3bc   : > { %v2012_v23 = vadd.f32 %v1994_v22, %v1924_v43  ;;  %v2097_v60 = vadd.f32 %v2079_v7, %v2009_v44  ;;  %v6026_v11 = vpop.permute.xlu1 %2230  ;;  %v1902_v10 = vsel %vm1898_vm0, %v7011_v29, %v6991_v40  ;;  %v2170_v25 = vsel %vm2162_vm10, %v7013_v51, %v7012_v47  ;;  %v7014_v22 = vld [vmem:[#allocation167_spill] sm:$0xff]  ;;  %v7015_v7 = vld [vmem:[#allocation146_spill] sm:$0xff]  ;;  %v7020_v42 = vld [vmem:[#allocation193_spill] sm:$0xff] }
 0x3bd   : > { %v2255_v46 = vsel %vm2250_vm11, %v6981_v12, %v5871_v26  ;;  %v6040_v18 = vsel %vm2250_vm11, %v5627_v53, %v6026_v11  ;;  %v6042_v17 = vpop.permute.xlu0 %2500  ;;  %2668 = vrot.lane.b32.xlu1 %v5904_v30, %s3764_s9  ;;  %v1661_v34 = vadd.f32 %v1643_v1, %v1573_v14  ;;  %v1832_v40 = vadd.f32 %v1814_v27, %v1744_v21  ;;  %v7016_v44 = vld [vmem:[#allocation174_spill] sm:$0xff]  ;;  %v7018_v53 = vld [vmem:[#allocation196_spill] sm:$0xff] }
 0x3be   : > { %v2100_v63 = vadd.f32 %v2082_v15, %v2012_v23  ;;  %v2185_v0 = vadd.f32 %v2167_v52, %v2097_v60  ;;  %v1724_v43 = vsel %vm1722_vm14, %v7015_v7, %v7014_v22  ;;  %v1549_v26 = vsel %vm7017_vm5, %v6977_v3, %v7016_v44  ;;  %v7021_v14 = vld [vmem:[#allocation176_spill] sm:$0xff]  ;;  %v7022_v21 = vld [vmem:[#allocation186_spill] sm:$0xff] }
 0x3bf   : > { %v1990_v12 = vsel %vm1986_vm1, %v7018_v53, %v6998_v45  ;;  %v2258_v30 = vsel %vm2250_vm11, %v7020_v42, %v7019_v59  ;;  %v1731_v1 = vsel %vm1722_vm14, %v6982_v54, %v7021_v14  ;;  %v1920_v27 = vadd.f32 %v1902_v10, %v1832_v40  ;;  %v7023_v23 = vld [vmem:[#allocation26_spill] sm:$0xff]  ;;  %v7034_v14 = vld [vmem:[#allocation28_spill] sm:$0xff] }
 0x3c0   : > { %v2188_v62 = vadd.f32 %v2170_v25, %v2100_v63  ;;  %v2273_v15 = vadd.f32 %v2255_v46, %v2185_v0  ;;  %v6061_v52 = vpop.permute.xlu1 %2326  ;;  %v1637_v3 = vsel %vm1634_vm13, %v6994_v16, %v7022_v21  ;;  %v2078_v45 = vsel %vm2074_vm12, %v7023_v23, %v7004_v57  ;;  %v7024_v60 = vld [vmem:[#allocation66_spill] sm:$0xff]  ;;  %v7028_v57 = vld [vmem:[#allocation19_spill] sm:$0xff]  ;;  %vm7031_vm13 = vmmov %vm7007_vm4 }
 0x3c1   : > { %vm7025_vm6 = vcmask 523264   ;;  %v7026_v51 = vld [vmem:[#allocation30_spill] sm:$0xff]  ;;  %v6075_v10 = vpop.permute.xlu0 %2596  ;;  %2764 = vrot.lane.b32.xlu1 %v5908_v19, %s3765_s13  ;;  %v1567_v25 = vadd.f32 %v1549_v26, %v1479_v56  ;;  %v2008_v46 = vadd.f32 %v1990_v12, %v1920_v27  ;;  %v1742_v63 = vadd.f32 %v1724_v43, %v1654_v39  ;;  %v7032_v43 = vld [vmem:[#allocation188_spill] sm:$0xff] }
 0x3c2   : > { %v2346_v29 = vsel %vm7025_vm6, %v7024_v60, %v5900_v48  ;;  %vm7027_vm8 = vmmov %vm7025_vm6  ;;  %v2276_v16 = vadd.f32 %v2258_v30, %v2188_v62  ;;  %v1725_v0 = vsel %vm1722_vm14, %v7014_v22, %v7028_v57  ;;  %v2166_v7 = vsel %vm2162_vm10, %v5739_v55, %v7010_v9  ;;  %v7029_v12 = vld [vmem:[#allocation178_spill] sm:$0xff]  ;;  %v7030_v30 = vld [vmem:[#allocation156_spill] sm:$0xff] }
 0x3c3   : > { %v2343_v54 = vsel %vm7027_vm8, %v7026_v51, %v6061_v52  ;;  %v2734_v44 = vmul.f32 %v6876_v61, %v4187_v13  ;;  %v1749_v53 = vadd.f32 %v1731_v1, %v1661_v34  ;;  %v1655_v42 = vadd.f32 %v1637_v3, %v1567_v25  ;;  %vm7033_vm14 = vmmov %vm7007_vm4  ;;  %v3586_v9 = vld [vmem:[%s6445_s4] sm:$0xff]  ;;  %v7036_v62 = vld [vmem:[#allocation22_spill] sm:$0xff] }
 0x3c4   : > { %v6079_v40 = vadd.f32 %v2343_v54, %v2273_v15  ;;  %v2096_v19 = vadd.f32 %v2078_v45, %v2008_v46  ;;  %v2364_v56 = vadd.f32 %v2346_v29, %v2276_v16  ;;  %v6089_v26 = vpop.permute.xlu1 %2422  ;;  %v1812_v39 = vsel %vm7031_vm13, %v7030_v30, %v7029_v12  ;;  %v7037_v21 = vld [vmem:[#allocation190_spill] sm:$0xff]  ;;  %vm7041_vm9 = vmmov %vm7025_vm6 }
 0x3c5   : > { %v1819_v22 = vsel %vm7033_vm14, %v6988_v6, %v7032_v43  ;;  %v1813_v55 = vsel %vm7035_vm7, %v7029_v12, %v7034_v14  ;;  %v2434_v13 = vsel %vm2426_vm15, %v5686_v24, %v6089_v26  ;;  %v2403_v61 = vpop.permute.xlu0 %2402  ;;  %2807 = vperm.xlu1 %3484, %v3586_v9   ;;  %v1743_v34 = vadd.f32 %v1725_v0, %v1655_v42  ;;  %v7038_v25 = vld [vmem:[#allocation166_spill] sm:$0xff]  ;;  %v7044_v43 = vld [vmem:[#allocation31_spill] sm:$0xff]  ;;  %v7047_v9 = vld [vmem:[#allocation24_spill] sm:$0xff] }
 0x3c6   : > { %v2184_v1 = vadd.f32 %v2166_v7, %v2096_v19  ;;  %v6106_v27 = vadd.f32 %v2434_v13, %v2364_v56  ;;  %v2427_v6 = vsel %vm2426_vm15, %v2403_v61, %v6010_v36  ;;  %v1907_v15 = vsel %vm1898_vm0, %v6996_v31, %v7036_v62  ;;  %v7039_v16 = vld [vmem:[#allocation70_spill] sm:$0xff] }
 0x3c7   : > { %v1901_v24 = vsel %vm1898_vm0, %v7037_v21, %v5772_v2  ;;  %v6117_v3 = vadd.f32 %v2427_v6, %v5929_v35  ;;  %vm2602_vm2 = vcmask 375808   ;;  %v1830_v23 = vadd.f32 %v1812_v39, %v1742_v63  ;;  %v7040_v2 = vld [vmem:[#allocation14_spill] sm:$0xff] }
 0x3c8   : > { %v1837_v45 = vadd.f32 %v1819_v22, %v1749_v53  ;;  %v1831_v60 = vadd.f32 %v1813_v55, %v1743_v34  ;;  %v2272_v29 = vadd.f32 %v5948_v8, %v2184_v1  ;;  %v2323_v54 = vpop.permute.xlu1 %2322  ;;  %v1900_v46 = vsel %vm1898_vm0, %v7038_v25, %v7037_v21  ;;  %v7045_v22 = vld [vmem:[#allocation189_spill] sm:$0xff]  ;;  %vm7046_vm0 = vmmov %vm7025_vm6 }
 0x3c9   : > { %v1995_v31 = vsel %vm1986_vm1, %v7002_v5, %v7039_v16  ;;  %v1989_v35 = vsel %vm1986_vm1, %v7040_v2, %v5963_v50  ;;  %v2342_v63 = vsel %vm7041_vm9, %v2323_v54, %v7026_v51  ;;  %v2595_v57 = vpop.permute.xlu0 %2594  ;;  %2762 = vrot.lane.b32.xlu1 %v2734_v44, %s3765_s13  ;;  %v7042_v42 = vmov 0   ;;  %v7043_v5 = vld [vmem:[#allocation177_spill] sm:$0xff] }
 0x3ca   : > { %v1925_v8 = vadd.f32 %v1907_v15, %v1837_v45  ;;  %v1919_v0 = vadd.f32 %v1901_v24, %v1831_v60  ;;  %v2360_v7 = vadd.f32 %v2342_v63, %v2272_v29  ;;  %v2609_v53 = vsel %vm2602_vm2, %v2595_v57, %v6075_v10  ;;  %3486 = vset.pattern.permute.xlu1 %v7042_v42  ;;  %v7051_v25 = vld [vmem:[#allocation105_spill] sm:$0xff]  ;;  %v7054_v57 = vld [vmem:[#allocation107_spill] sm:$0xff] }
 0x3cb   : > { %v1988_v19 = vsel %vm1986_vm1, %v7043_v5, %v7040_v2  ;;  %v2083_v50 = vsel %vm2074_vm12, %v7008_v20, %v5802_v28  ;;  %v2627_v51 = vadd.f32 %v2609_v53, %v5960_v32  ;;  %v2561_v44 = vmul.f32 %v4818_v41, %v6943_v38  ;;  %v7053_v63 = vld [vmem:[#allocation17_spill] sm:$0xff]  ;;  %v7055_v53 = vld [vmem:[#allocation35_spill] sm:$0xff] }
 0x3cc   : > { %v1918_v56 = vadd.f32 %v1900_v46, %v1830_v23  ;;  %v2013_v12 = vadd.f32 %v1995_v31, %v1925_v8  ;;  %v2007_v30 = vadd.f32 %v1989_v35, %v1919_v0  ;;  %v2057_v39 = vpop.permute.xlu1 %2056  ;;  %v2076_v14 = vsel %vm2074_vm12, %v7045_v22, %v7044_v43  ;;  %v7048_v23 = vld [vmem:[#allocation15_spill] sm:$0xff]  ;;  %v7052_v31 = vld [vmem:[#allocation32_spill] sm:$0xff] }
 0x3cd   : > { %v2171_v55 = vsel %vm2162_vm10, %v7012_v47, %v5996_v49  ;;  %v2077_v28 = vsel %vm2074_vm12, %v7044_v43, %v2057_v39  ;;  %v2329_v20 = vpop.permute.xlu0 %2328  ;;  %2592 = vrot.lane.b32.xlu1 %v2561_v44, %s3763_s29  ;;  %v2164_v34 = vsel %vm2162_vm10, %v7047_v9, %v5833_v33  ;;  %v2731_v49 = vmul.f32 %v6917_v58, %v6960_v37  ;;  %v7049_v37 = vld [vmem:[#allocation74_spill] sm:$0xff]  ;;  %vm7050_vm12 = vmmov %vm7046_vm0 }
 0x3ce   : > { %v2006_v32 = vadd.f32 %v1988_v19, %v1918_v56  ;;  %v2101_v41 = vadd.f32 %v2083_v50, %v2013_v12  ;;  %v2095_v13 = vadd.f32 %v2077_v28, %v2007_v30  ;;  %v2344_v61 = vsel %vm7046_vm0, %v6061_v52, %v2329_v20 }
 0x3cf   : > { %v2362_v1 = vadd.f32 %v2344_v61, %v5994_v4  ;;  %v2730_v45 = vmul.f32 %v6917_v58, %v7048_v23  ;;  %v2649_v46 = vmul.f32 %v7051_v25, %v6943_v38  ;;  %v2645_v8 = vmul.f32 %v7054_v57, %v7053_v63 }
 0x3d0   : > { %v2094_v47 = vadd.f32 %v2076_v14, %v2006_v32  ;;  %v2189_v6 = vadd.f32 %v2171_v55, %v2101_v41  ;;  %v2249_v62 = vpop.permute.xlu1 %2248  ;;  %vm2690_vm1 = vcmask 367616   ;;  %v2733_v19 = vmul.f32 %v6917_v58, %v7053_v63 }
 0x3d1   : > { %v2259_v15 = vsel %vm2250_vm11, %v7019_v59, %v2249_v62  ;;  %v6163_v21 = vpop.permute.xlu0 %2492  ;;  %2756 = vrot.lane.b32.xlu1 %v2731_v49, %s3765_s13  ;;  %vm2900_vm4 = vcmask 195584   ;;  %vm3116_vm5 = vcmask 15360  }
 0x3d2   : > { %v2182_v52 = vadd.f32 %v2164_v34, %v2094_v47  ;;  %v2277_v24 = vadd.f32 %v2259_v15, %v2189_v6 }
 0x3d4   : > { %v2270_v4 = vadd.f32 %v6040_v18, %v2182_v52  ;;  %v6169_v60 = vpop.permute.xlu1 %2318 }
 0x3d5   : > { %v2340_v29 = vsel %vm7050_vm12, %v7049_v37, %v6169_v60  ;;  %v6174_v54 = vpop.permute.xlu0 %2588  ;;  %2754 = vrot.lane.b32.xlu1 %v2730_v45, %s3765_s13 }
 0x3d6   : > { %v2358_v59 = vadd.f32 %v2340_v29, %v2270_v4  ;;  %v6239_v29 = vld [vmem:[#allocation5] sm:$0xff] }
 0x3d7   : > { %3307 = vmatprep.mubr.msk.f32.mxu1 %vm2900_vm4, %v6239_v29 }
 0x3d8   : > { %v2415_v16 = vpop.permute.xlu1 %2414 }
 0x3d9   : > { %v2431_v2 = vsel %vm2426_vm15, %v7052_v31, %v2415_v16  ;;  %v6181_v35 = vpop.permute.xlu0 %2684  ;;  %2680 = vrot.lane.b32.xlu1 %v2649_v46, %s3764_s9 }
 0x3da   : > { %v2449_v18 = vadd.f32 %v2431_v2, %v6079_v40 }
 0x3dc   : > { %v6187_v0 = vpop.permute.xlu1 %2510 }
 0x3dd   : > { %v2522_v42 = vsel %vm2514_vm3, %v7055_v53, %v6187_v0  ;;  %v6192_v38 = vpop.permute.xlu0 %2815  ;;  %2672 = vrot.lane.b32.xlu1 %v2645_v8, %s3764_s9  ;;  %s3311_s9 = smul.u32 768, %s3826_s25 }
 0x3de   : > { %v2540_v5 = vadd.f32 %v2522_v42, %v6106_v27 }
 0x3df   : > { %s6394_s15 = scalar_lea.hbm %s6447_s6, %s3311_s9 }
 0x3e0   : > { %v2411_v40 = vpop.permute.xlu1 %2410 }
 0x3e1   : > { %v2430_v50 = vsel %vm2426_vm15, %v2411_v40, %v7052_v31  ;;  %v2683_v44 = vpop.permute.xlu0 %2682  ;;  %2760 = vrot.lane.b32.xlu1 %v2733_v19, %s3765_s13 }
 0x3e2   : > { %v2448_v56 = vadd.f32 %v2430_v50, %v2360_v7  ;;  %v2697_v12 = vsel %vm2690_vm1, %v2683_v44, %v6181_v35 }
 0x3e3   : > { %v6203_v30 = vadd.f32 %v2697_v12, %v2627_v51 }
 0x3e4   : > { %v2145_v39 = vpop.permute.xlu1 %2144 }
 0x3e5   : > { %v2165_v27 = vsel %vm2162_vm10, %v5833_v33, %v2145_v39  ;;  %v2417_v43 = vpop.permute.xlu0 %2416  ;;  %vm7056_vm10 = vmmov %vm7046_vm0 }
 0x3e6   : > { %v2183_v22 = vadd.f32 %v2165_v27, %v2095_v13  ;;  %v2432_v58 = vsel %vm2426_vm15, %v2415_v16, %v2417_v43 }
 0x3e7   : > { %v6208_v14 = vadd.f32 %v2432_v58, %v2362_v1 }
 0x3e8   : > { %v2337_v55 = vpop.permute.xlu1 %2336 }
 0x3e9   : > { %v6210_v28 = vpop.permute.xlu0 %2580  ;;  %v2347_v23 = vsel %vm7056_vm10, %v5900_v48, %v2337_v55 }
 0x3ec   : > { %v2407_v20 = vpop.permute.xlu1 %2406 }
 0x3ed   : > { %v2428_v7 = vsel %vm2426_vm15, %v6010_v36, %v2407_v20  ;;  %v6214_v32 = vpop.permute.xlu0 %2676 }
 0x3ee   : > { %v2446_v51 = vadd.f32 %v2428_v7, %v2358_v59 }
 0x3f0   : > { %v6216_v41 = vpop.permute.xlu1 %2502 }
 0x3f1   : > { %v2519_v33 = vsel %vm2514_vm3, %v6042_v17, %v6216_v41  ;;  %v6221_v13 = vpop.permute.xlu0 %2772 }
 0x3f2   : > { %v2537_v61 = vadd.f32 %v2519_v33, %v2449_v18  ;;  %v6257_v18 = vld [vmem:[%s6446_s5 + $0x8] sm:$0xff] }
 0x3f3   : > { %2897 = vperm.xlu1 %3486, %v6257_v18  }
 0x3f4   : > { %v6223_v9 = vpop.permute.xlu1 %2598 }
 0x3f5   : > { %v2610_v34 = vsel %vm2602_vm2, %v6075_v10, %v6223_v9  ;;  %v6228_v1 = vpop.permute.xlu0 %2811 }
 0x3f6   : > { %v2628_v36 = vadd.f32 %v2610_v34, %v2540_v5 }
 0x3f8   : > { %v2499_v49 = vpop.permute.xlu1 %2498 }
 0x3f9   : > { %v2518_v47 = vsel %vm2514_vm3, %v2499_v49, %v6042_v17  ;;  %v2675_v6 = vpop.permute.xlu0 %2674  ;;  %v2365_v17 = vadd.f32 %v2347_v23, %v2277_v24  ;;  %v6252_v24 = vld [vmem:[%s6446_s5] sm:$0xff] }
 0x3fa   : > { %v2536_v62 = vadd.f32 %v2518_v47, %v2448_v56  ;;  %v2694_v15 = vsel %vm2690_vm1, %v2675_v6, %v6214_v32  ;;  %2892 = vperm.xlu0 %3485, %v6252_v24  }
 0x3fc   : > { %v2233_v52 = vpop.permute.xlu1 %2232 }
 0x3fd   : > { %v2253_v45 = vsel %vm2250_vm11, %v6026_v11, %v2233_v52  ;;  %v2409_v10 = vpop.permute.xlu0 %2408  ;;  %vm7057_vm11 = vmmov %vm7046_vm0 }
 0x3fe   : > { %v2271_v4 = vadd.f32 %v2253_v45, %v2183_v22  ;;  %v2429_v37 = vsel %vm2426_vm15, %v2407_v20, %v2409_v10 }
 0x400   : > { %v2425_v59 = vpop.permute.xlu1 %2424 }
 0x401   : > { %v2435_v25 = vsel %vm2426_vm15, %v6089_v26, %v2425_v59  ;;  %v2601_v46 = vpop.permute.xlu0 %2600  ;;  %vm2778_vm15 = vcmask 359424  }
 0x402   : > { %v2453_v48 = vadd.f32 %v2435_v25, %v2365_v17  ;;  %v2611_v49 = vsel %vm2602_vm2, %v6223_v9, %v2601_v46 }
 0x404   : > { %v2495_v16 = vpop.permute.xlu1 %2494 }
 0x405   : > { %v2516_v11 = vsel %vm2514_vm3, %v6163_v21, %v2495_v16  ;;  %v6247_v31 = vpop.permute.xlu0 %2670 }
 0x406   : > { %v2534_v2 = vadd.f32 %v2516_v11, %v2446_v51 }
 0x408   : > { %v6261_v26 = vpop.permute.xlu1 %2590 }
 0x409   : > { %v2607_v63 = vsel %vm2602_vm2, %v6174_v54, %v6261_v26  ;;  %v6266_v57 = vpop.permute.xlu0 %2766 }
 0x40a   : > { %v2625_v8 = vadd.f32 %v2607_v63, %v2537_v61 }
 0x40c   : > { %v2687_v53 = vpop.permute.xlu1 %2686 }
 0x40d   : > { %v2698_v42 = vsel %vm2690_vm1, %v6181_v35, %v2687_v53  ;;  %v6270_v5 = vpop.permute.xlu0 %2666 }
 0x40e   : > { %v2716_v19 = vadd.f32 %v2698_v42, %v2628_v36 }
 0x410   : > { %v2491_v40 = vpop.permute.xlu1 %2490 }
 0x411   : > { %v2515_v50 = vsel %vm2514_vm3, %v2491_v40, %v6163_v21  ;;  %v2497_v44 = vpop.permute.xlu0 %2496 }
 0x412   : > { %v2533_v56 = vadd.f32 %v2515_v50, %v6117_v3  ;;  %v2517_v51 = vsel %vm2514_vm3, %v2495_v16, %v2497_v44 }
 0x414   : > { %v2587_v12 = vpop.permute.xlu1 %2586 }
 0x415   : > { %v2606_v39 = vsel %vm2602_vm2, %v2587_v12, %v6174_v54  ;;  %v2689_v43 = vpop.permute.xlu0 %2688 }
 0x416   : > { %v2624_v27 = vadd.f32 %v2606_v39, %v2536_v62 }
 0x418   : > { %v2321_v22 = vpop.permute.xlu1 %2320  ;;  %v6277_v58 = vadd.f32 %v2694_v15, %v2624_v27  ;;  %v2699_v15 = vsel %vm2690_vm1, %v2687_v53, %v2689_v43 }
 0x419   : > { %v2341_v35 = vsel %vm7057_vm11, %v6169_v60, %v2321_v22  ;;  %v6281_v7 = vpop.permute.xlu0 %2758 }
 0x41a   : > { %v2359_v55 = vadd.f32 %v2341_v35, %v2271_v4 }
 0x41c   : > { %v2447_v20 = vadd.f32 %v2429_v37, %v2359_v55  ;;  %v2513_v21 = vpop.permute.xlu1 %2512 }
 0x41d   : > { %v2523_v3 = vsel %vm2514_vm3, %v6187_v0, %v2513_v21  ;;  %v6293_v60 = vpop.permute.xlu0 %2584 }
 0x41e   : > { %v2541_v33 = vadd.f32 %v2523_v3, %v2453_v48  ;;  %v6286_v54 = vadd.f32 %v2517_v51, %v2447_v20 }
 0x420   : > { %v6288_v61 = vpop.permute.xlu1 %2582  ;;  %v2629_v47 = vadd.f32 %v2611_v49, %v2541_v33 }
 0x421   : > { %v2604_v34 = vsel %vm2602_vm2, %v6210_v28, %v6288_v61  ;;  %v2777_v52 = vpop.permute.xlu0 %2776 }
 0x422   : > { %v2622_v36 = vadd.f32 %v2604_v34, %v2534_v2  ;;  %v2717_v23 = vadd.f32 %v2699_v15, %v2629_v47 }
 0x424   : > { %v6297_v6 = vpop.permute.xlu1 %2678 }
 0x425   : > { %v2695_v0 = vsel %vm2690_vm1, %v6214_v32, %v6297_v6 }
 0x426   : > { %v2713_v62 = vadd.f32 %v2695_v0, %v2625_v8 }
 0x428   : > { %v2775_v45 = vpop.permute.xlu1 %2774 }
 0x429   : > { %v2786_v10 = vsel %vm2778_vm15, %v6221_v13, %v2775_v45  ;;  %v2787_v4 = vsel %vm2778_vm15, %v2775_v45, %v2777_v52 }
 0x42a   : > { %v2804_v9 = vadd.f32 %v2786_v10, %v2716_v19  ;;  %v2805_v37 = vadd.f32 %v2787_v4, %v2717_v23 }
 0x42c   : > { %v2825_v17 = vadd.f32 %v6192_v38, %v2804_v9  ;;  %v2826_v59 = vadd.f32 %v6192_v38, %v2805_v37  ;;  %v2579_v25 = vpop.permute.xlu1 %2578 }
 0x42d   : > { %v2603_v32 = vsel %vm2602_vm2, %v2579_v25, %v6210_v28 }
 0x42e   : > { %v3284_v46 = vmul.f32 -1.442695, %v2825_v17  ;;  %v3285_v48 = vmul.f32 -1.442695, %v2826_v59  ;;  %v2621_v16 = vadd.f32 %v2603_v32, %v2533_v56 }
 0x430   : > { %3537 = vpow2.f32 %v3284_v46  ;;  %v2771_v11 = vpop.permute.xlu1 %2770 }
 0x431   : > { %3539 = vpow2.f32 %v3285_v48  ;;  %v2785_v2 = vsel %vm2778_vm15, %v2771_v11, %v6221_v13 }
 0x432   : > { %v2803_v63 = vadd.f32 %v2785_v2, %v6203_v30 }
 0x434   : > { %v2824_v8 = vadd.f32 %v6192_v38, %v2803_v63  ;;  %v2505_v53 = vpop.permute.xlu1 %2504  ;;  %v2605_v63 = vsel %vm2602_vm2, %v6288_v61, %v6293_v60 }
 0x435   : > { %v2520_v22 = vsel %vm2514_vm3, %v6216_v41, %v2505_v53  ;;  %vm3091_vm3 = vcmask 23560  }
 0x436   : > { %v3283_v42 = vmul.f32 -1.442695, %v2824_v8  ;;  %v2538_v21 = vadd.f32 %v2520_v22, %v6208_v14 }
 0x438   : > { %3541 = vpow2.f32 %v3283_v42  ;;  %v2669_v19 = vpop.permute.xlu1 %2668 }
 0x439   : > { %v2692_v33 = vsel %vm2690_vm1, %v2669_v19, %v6247_v31  ;;  %v2691_v14 = vsel %vm2690_vm1, %v6270_v5, %v2669_v19  ;;  %v2769_v5 = vpop.permute.xlu0 %2768 }
 0x43a   : > { %v2710_v47 = vadd.f32 %v2692_v33, %v2622_v36  ;;  %v2709_v10 = vadd.f32 %v2691_v14, %v2621_v16  ;;  %v2784_v53 = vsel %vm2778_vm15, %v6266_v57, %v2769_v5 }
 0x43c   : > { %v2765_v40 = vpop.permute.xlu1 %2764 }
 0x43d   : > { %v3538_v50 = vpop.eup %3537  ;;  %v2783_v28 = vsel %vm2778_vm15, %v2765_v40, %v6266_v57 }
 0x43e   : > { %v3540_v44 = vpop.eup %3539  ;;  %v2861_v56 = vadd.f32 1.0, %v3538_v50  ;;  %v2801_v12 = vadd.f32 %v2783_v28, %v2713_v62 }
 0x43f   : > { %v2862_v39 = vadd.f32 1.0, %v3540_v44 }
 0x440   : > { %3543 = vrcp.f32 %v2861_v56  ;;  %v6317_v13 = vadd.f32 %v6228_v1, %v2801_v12  ;;  %v6319_v30 = vpop.permute.xlu1 %2807 }
 0x441   : > { %3545 = vrcp.f32 %v2862_v39 }
 0x442   : > { %v3281_v38 = vmul.f32 -1.442695, %v6317_v13 }
 0x444   : > { %3547 = vpow2.f32 %v3281_v38  ;;  %v2763_v27 = vpop.permute.xlu1 %2762 }
 0x445   : > { %v3542_v43 = vpop.eup %3541  ;;  %v2782_v35 = vsel %vm2778_vm15, %v2763_v27, %v2765_v40 }
 0x446   : > { %v2860_v55 = vadd.f32 1.0, %v3542_v43  ;;  %v2800_v20 = vadd.f32 %v2782_v35, %v6277_v58 }
 0x448   : > { %3549 = vrcp.f32 %v2860_v55  ;;  %v6328_v51 = vadd.f32 %v6228_v1, %v2800_v20  ;;  %v2593_v3 = vpop.permute.xlu1 %2592 }
 0x449   : > { %v2608_v34 = vsel %vm2602_vm2, %v6261_v26, %v2593_v3 }
 0x44a   : > { %v3280_v41 = vmul.f32 -1.442695, %v6328_v51  ;;  %v2626_v49 = vadd.f32 %v2608_v34, %v2538_v21  ;;  %v7058_v34 = vmov 0.0  }
 0x44c   : > { %3551 = vpow2.f32 %v3280_v41  ;;  %v2757_v0 = vpop.permute.xlu1 %2756  ;;  %v292_v41 = vld [vmem:[#allocation5 + $0x8] sm:$0xff] }
 0x44d   : > { %v3544_v58 = vpop.eup %3543  ;;  %v2780_v62 = vsel %vm2778_vm15, %v2757_v0, %v6281_v7 }
 0x44e   : > { %v3546_v15 = vpop.eup %3545  ;;  %v2798_v52 = vadd.f32 %v2780_v62, %v2710_v47  ;;  %v2888_v23 = vmul.f32 %v3544_v58, %v2825_v17 }
 0x44f   : > { %v2889_v45 = vmul.f32 %v3546_v15, %v2826_v59 }
 0x450   : > { %v2819_v26 = vadd.f32 %v6319_v30, %v2798_v52  ;;  %2933 = vmatprep.subr.mxu0 %v2888_v23  ;;  %v2755_v4 = vpop.permute.xlu1 %2754 }
 0x451   : > { %v3548_v9 = vpop.eup %3547  ;;  %3301 = vmatprep.subr.mxu1 %v2889_v45  ;;  %v2779_v36 = vsel %vm2778_vm15, %v2755_v4, %v2757_v0 }
 0x452   : > { %v2858_v37 = vadd.f32 1.0, %v3548_v9  ;;  %v3278_v25 = vmul.f32 -1.442695, %v2819_v26  ;;  %v2797_v32 = vadd.f32 %v2779_v36, %v2709_v10  ;;  %3302 = vmatpush3.msra.mxu1 %v2889_v45  ;;  %v7060_v9 = vld [vmem:[#allocation13_spill] sm:$0xff] }
 0x454   : > { %3553 = vrcp.f32 %v2858_v37  ;;  %v2818_v46 = vadd.f32 %v6319_v30, %v2797_v32  ;;  %v2681_v48 = vpop.permute.xlu1 %2680 }
 0x455   : > { %v3550_v17 = vpop.eup %3549  ;;  %3555 = vpow2.f32 %v3278_v25  ;;  %v2696_v59 = vsel %vm2690_vm1, %v6297_v6, %v2681_v48  ;;  %v2623_v6 = vadd.f32 %v2605_v63, %v6286_v54 }
 0x456   : > { %v2887_v16 = vmul.f32 %v3550_v17, %v2824_v8  ;;  %v3277_v11 = vmul.f32 -1.442695, %v2818_v46  ;;  %v2714_v2 = vadd.f32 %v2696_v59, %v2626_v49 }
 0x458   : > { %3557 = vpow2.f32 %v3277_v11  ;;  %v2802_v42 = vadd.f32 %v2784_v53, %v2714_v2  ;;  %2934 = vmatpush1.msra.mxu0 %v2887_v16  ;;  %v2673_v19 = vpop.permute.xlu1 %2672 }
 0x459   : > { %v3552_v40 = vpop.eup %3551  ;;  %v2693_v50 = vsel %vm2690_vm1, %v6247_v31, %v2673_v19 }
 0x45a   : > { %v2857_v8 = vadd.f32 1.0, %v3552_v40  ;;  %v2823_v28 = vadd.f32 %v6228_v1, %v2802_v42  ;;  %v2711_v44 = vadd.f32 %v2693_v50, %v2623_v6 }
 0x45c   : > { %3559 = vrcp.f32 %v2857_v8  ;;  %v2761_v56 = vpop.permute.xlu1 %2760  ;;  %v3282_v61 = vmul.f32 -1.442695, %v2823_v28 }
 0x45d   : > { %v2781_v57 = vsel %vm2778_vm15, %v6281_v7, %v2761_v56 }
 0x45e   : > { %v2799_v60 = vadd.f32 %v2781_v57, %v2711_v44  ;;  %3561 = vpow2.f32 %v3282_v61 }
 0x460   : > { %v2820_v12 = vadd.f32 %v6319_v30, %v2799_v60 }
 0x461   : > { %v3554_v39 = vpop.eup %3553 }
 0x462   : > { %v3556_v38 = vpop.eup %3555  ;;  %v3279_v27 = vmul.f32 -1.442695, %v2820_v12  ;;  %v2885_v31 = vmul.f32 %v3554_v39, %v6317_v13 }
 0x463   : > { %v2855_v54 = vadd.f32 1.0, %v3556_v38 }
 0x464   : > { %3563 = vpow2.f32 %v3279_v27  ;;  %2935 = vmatprep.subr.mxu0 %v2885_v31 }
 0x465   : > { %v3558_v1 = vpop.eup %3557  ;;  %3565 = vrcp.f32 %v2855_v54 }
 0x466   : > { %v2854_v43 = vadd.f32 1.0, %v3558_v1 }
 0x468   : > { %3567 = vrcp.f32 %v2854_v43 }
 0x469   : > { %v3560_v22 = vpop.eup %3559 }
 0x46a   : > { %v2884_v35 = vmul.f32 %v3560_v22, %v6328_v51 }
 0x46b   : > { %v3562_v7 = vpop.eup %3561 }
 0x46c   : > { %2936 = vmatpush1.msra.mxu0 %v2884_v35  ;;  %v2859_v55 = vadd.f32 1.0, %v3562_v7 }
 0x46e   : > { %3569 = vrcp.f32 %v2859_v55  ;;  %v2898_v62 = vpop.permute.xlu1 %2897 }
 0x471   : > { %v3564_v30 = vpop.eup %3563 }
 0x472   : > { %v3566_v20 = vpop.eup %3565  ;;  %v2856_v21 = vadd.f32 1.0, %v3564_v30 }
 0x473   : > { %v2882_v3 = vmul.f32 %v3566_v20, %v2819_v26  ;;  %v7059_v26 = vld [vmem:[#allocation11_spill] sm:$0xff] }
 0x474   : > { %3571 = vrcp.f32 %v2856_v21 }
 0x475   : > { %v3568_v13 = vpop.eup %3567  ;;  %2937 = vmatprep.subr.mxu0 %v2882_v3  ;;  %v2893_v45 = vpop.permute.xlu0 %2892 }
 0x476   : > { %v2881_v33 = vmul.f32 %v3568_v13, %v2818_v46  ;;  %v7061_v46 = vld [vmem:[#allocation12_spill] sm:$0xff] }
 0x478   : > { %2938 = vmatpush1.msra.mxu0 %v2881_v33 }
 0x479   : > { %3286 = vmatmul.mubr.msk.f32.vlgmr.msra.gmra.mxu0 %vm2900_vm4, %v6239_v29  ;;  %v282_v29 = vld [vmem:[#allocation2 + $0x2] ss:$4 sm:$0x7] }
 0x47a   : > { %2977 = vmatprep.mubr.f32.mxu0 %v7058_v34  ;;  %v3063_v4 = vrot.slane %v282_v29, %v7059_v26  ;;  %v3067_v36 = vrot.slane %v282_v29, %v7060_v9  ;;  %v3071_v48 = vrot.slane %v282_v29, %v7061_v46 }
 0x47b   : > { %v3570_v51 = vpop.eup %3569 }
 0x47c   : > { %v2886_v49 = vmul.f32 %v3570_v51, %v2823_v28 }
 0x47d   : > { %3287 = vmatmul.mubr.msk.f32.gmra.mxu0 %vm2900_vm4, %v292_v41 }
 0x47e   : > { %3303 = vmatprep.subr.mxu1 %v2886_v49 }
 0x47f   : > { %3304 = vmatpush3.msra.mxu1 %v2886_v49 }
 0x481   : > { %v3572_v47 = vpop.eup %3571 }
 0x482   : > { %v2883_v0 = vmul.f32 %v3572_v47, %v2820_v12 }
 0x484   : > { %3305 = vmatprep.subr.mxu1 %v2883_v0 }
 0x485   : > { %3306 = vmatpush3.msra.mxu1 %v2883_v0 }
 0x486   : > { %3308 = vmatmul.mubr.msk.f32.vlgmr.msra.gmra.mxu1 %vm2900_vm4, %v292_v41 }
 0x539   : > { %v2973_v58 = vpop.f32.mrf.mxu0 }
 0x53a   : > { %v6369_v37 = vadd.f32 %v2973_v58, %v2893_v45 }
 0x53b   : > { %v2975_v14 = vpop.f32.mrf.mxu0 }
 0x53c   : > { %v6371_v25 = vadd.f32 %v2975_v14, %v2893_v45  ;;  %v3075_v59 = vmul.f32 %v3063_v4, %v6369_v37 }
 0x53d   : > { %v2979_v15 = vpop.f32.mrf.mxu0 }
 0x53e   : > { %v6363_v52 = vadd.f32 %v2979_v15, %v2898_v62  ;;  %v3076_v11 = vmul.f32 %v3067_v36, %v6371_v25 }
 0x53f   : > { %v2981_v23 = vpop.f32.mrf.mxu0 }
 0x540   : > { %v6365_v10 = vadd.f32 %v2981_v23, %v2898_v62  ;;  %v3078_v32 = vmul.f32 %v3063_v4, %v6363_v52  ;;  %v3081_v50 = vadd.f32 %v3076_v11, %v3075_v59 }
 0x542   : > { %v3079_v5 = vmul.f32 %v3067_v36, %v6365_v10 }
 0x544   : > { %v3085_v2 = vadd.f32 %v3079_v5, %v3078_v32 }
 0x546   : > { %v3309_v17 = vpop.f32.mrf.mxu1 }
 0x547   : > { %v6377_v16 = vadd.f32 %v3309_v17, %v2898_v62 }
 0x548   : > { %v3050_v63 = vpop.f32.mrf.mxu1 }
 0x549   : > { %v3051_v53 = vadd.f32 %v3050_v63, %v2893_v45  ;;  %v3080_v42 = vmul.f32 %v3071_v48, %v6377_v16 }
 0x54b   : > { %v3077_v19 = vmul.f32 %v3071_v48, %v3051_v53  ;;  %v3086_v40 = vadd.f32 %v3085_v2, %v3080_v42 }
 0x54d   : > { %3087 = vadd.xlane.f32.xlu0 %v3086_v40  ;;  %v3082_v6 = vadd.f32 %v3081_v50, %v3077_v19 }
 0x54f   : > { %3083 = vadd.xlane.f32.xlu1 %v3082_v6 }
 0x5d6   : > { %v3088_v8 = vpop.xlane.xlu0 %3087 }
 0x5d7   : > { %v3090_v28 = vmul.f32 %v3088_v8, %v6257_v18 }
 0x5d8   : > { %v3084_v44 = vpop.xlane.xlu1 %3083 }
 0x5d9   : > { %v3089_v56 = vmul.f32 %v3084_v44, %v6252_v24  ;;  %v3093_v61 = vsel %vm3091_vm3, %v3090_v28, 0.0 }
 0x5db   : > { %v3092_v57 = vsel %vm3091_vm3, %v3089_v56, 0.0 }
 0x5dc   : > { %v3094_v60 = vadd.f32 %v3093_v61, %v3092_v57 }
 0x5de   : > { %v3095_v12 = vrot.slane %v3094_v60, 4 }
 0x5e0   : > { %v3096_v39 = vadd.f32 %v3095_v12, %v3094_v60 }
 0x5e2   : > { %v3097_v38 = vrot.slane %v3096_v39, 2 }
 0x5e4   : > { %v3098_v27 = vadd.f32 %v3097_v38, %v3096_v39 }
 0x5e6   : > { %v3099_v31 = vrot.slane %v3098_v27, 1 }
 0x5e8   : > { %v3100_v54 = vadd.f32 %v3099_v31, %v3098_v27 }
 0x5ea   : > { %v3101_v1 = vmax.f32 %v3100_v54, 0.0 }
 0x5ec   : > { %3103 = vrot.lane.b32.xlu0 %v3101_v1, %s3766_s28 }
 0x65e   : > { %v3104_v43 = vpop.permute.xlu0 %3103 }
 0x65f   : > { %v3106_v22 = vmul.f32 %v3104_v43, %v6252_v24  ;;  %v3107_v35 = vmul.f32 %v3104_v43, %v6257_v18 }
 0x661   : > { %3110 = vrot.lane.b32.xlu1 %v3106_v22, %s3731_s12 }
 0x665   : > { %3112 = vrot.lane.b32.xlu1 %v3107_v35, %s3731_s12  ;;  %s270_s12 = sand.u32 1, %s3699_s22  }
 0x666   : > { %s3310_s29 = smul.u32 48, %s270_s12  ;;  %s6401_s25 = scalar_lea.sflag [#allocation4], %s270_s12 }
 0x668   : > { %s272_s10 = scalar_lea.vmem [#allocation7], %s3310_s29 }
 0x669   : > { %s3161_s11 = sshll.u32 %s272_s10, 4  ;;  %s6399_s11 = int_to_ptr.vmem [resolvable:$true] %s3161_s11 }
 0x66a   : > { %s3639_s16 = scalar_lea.vmem %s6399_s11, 768  ;;  %p3646_p8 = scmp.lt.s32.totalorder %s6399_s11, %s3644_s18 }
 0x66b   : > { %p3640_p12 = scmp.ne.s32.totalorder %s6399_s11, %s3639_s16  ;;  %p3647_p11 = scmp.lt.s32.totalorder %s3645_s19, %s3639_s16 }
 0x66d   : > { %p3641_p4 = pnand %p3640_p12, %p7062_p13  ;;  %p3648_p0 = por %p3647_p11, %p3646_p8 }
 0x66f   : > { %p3642_p7 = pneg %p3641_p4 }
 0x671   : > { %p3649_p1 = pnand %p3648_p0, %p3642_p7 }
 0x6d3   : > { %v3111_v7 = vpop.permute.xlu1 %3110 }
 0x6d4   : > { %v3117_v55 = vsel %vm3116_vm5, %v3111_v7, 0.0 }
 0x6d5   : > { %3118 = vadd.xlane.f32.xlu0 %v3117_v55 }
 0x6d7   : > { %v3113_v30 = vpop.permute.xlu1 %3112 }
 0x6d8   : > { %v3120_v20 = vsel %vm3116_vm5, %v3113_v30, 0.0 }
 0x6d9   : > { %3121 = vadd.xlane.f32.xlu1 %v3120_v20 }
 0x75e   : > { %v3119_v21 = vpop.xlane.xlu0 %3118 }
 0x75f   : > { %v3290_v3 = vmul.f32 -1.442695, %v3119_v21 }
 0x761   : > { %3573 = vpow2.f32 %v3290_v3 }
 0x762   : > { %v3122_v13 = vpop.xlane.xlu1 %3121 }
 0x763   : > { %v3291_v24 = vmul.f32 -1.442695, %v3122_v13 }
 0x765   : > { %3575 = vpow2.f32 %v3291_v24 }
 0x76e   : > { %v3574_v33 = vpop.eup %3573 }
 0x76f   : > { %v3129_v34 = vadd.f32 1.0, %v3574_v33 }
 0x771   : > { %3577 = vrcp.f32 %v3129_v34 }
 0x772   : > { %v3576_v18 = vpop.eup %3575 }
 0x773   : > { %v3130_v41 = vadd.f32 1.0, %v3576_v18 }
 0x775   : > { %3579 = vrcp.f32 %v3130_v41 }
 0x77e   : > { %v3578_v51 = vpop.eup %3577 }
 0x77f   : > { %v3135_v49 = vmul.f32 %v3578_v51, %v6369_v37  ;;  %v3136_v47 = vmul.f32 %v3578_v51, %v6371_v25  ;;  %v3137_v0 = vmul.f32 %v3578_v51, %v3051_v53 }
 0x781   : > { %3141 = vst [vmem:[%s272_s10] sm:$0xff] %v3135_v49  ;;  %3142 = vst [vmem:[%s272_s10 + $0x8] sm:$0xff] %v3136_v47 }
 0x782   : > { %3143 = vst [vmem:[%s272_s10 + $0x10] sm:$0xff] %v3137_v0  ;;  %v3580_v58 = vpop.eup %3579 }
 0x783   : > { %v3138_v14 = vmul.f32 %v3580_v58, %v6363_v52  ;;  %v3139_v62 = vmul.f32 %v3580_v58, %v6365_v10  ;;  %v3140_v15 = vmul.f32 %v3580_v58, %v6377_v16 }
 0x785   : > { %3144 = vst [vmem:[%s272_s10 + $0x18] sm:$0xff] %v3138_v14  ;;  %3145 = vst [vmem:[%s272_s10 + $0x20] sm:$0xff] %v3139_v62 }
 0x786   : > { %3146 = vst [vmem:[%s272_s10 + $0x28] sm:$0xff] %v3140_v15 }
 0x787   : > { %3652 = shalt.err (!%p3649_p1)
}
 0x788   : > { %s3653_s20 = scalar_lea.hbm %s6394_s15, 768  ;;  %s3657_s12 = scalar_lea.hbm %s6447_s6, 1536 }
 0x789   : > { %p3654_p2 = scmp.ne.s32.totalorder %s6394_s15, %s3653_s20  ;;  %p3658_p5 = scmp.lt.s32.totalorder %s6394_s15, %s6447_s6 }
 0x78a   : > { %p3659_p6 = scmp.lt.s32.totalorder %s3657_s12, %s3653_s20 }
 0x78b   : > { %p3655_p3 = pnand %p3654_p2, %p7062_p13 }
 0x78c   : > { %p3660_p10 = por %p3659_p6, %p3658_p5 }
 0x78d   : > { %p3656_p9 = pneg %p3655_p3 }
 0x78f   : > { %p3661_p12 = pnand %p3660_p10, %p3656_p9 }
 0x791   : > { %3664 = shalt.err (!%p3661_p12)
}
 0x792   : > { %s3768_s10 = smov 384   ;;  %s3769_s13 = smov 24  }
 0x793   : > { %3320 = dma.vmem_to_hbm [thread:$0]  (%p7062_p13), %s6399_s11, 768, %s6394_s15, %s6401_s25, %s3768_s10, %s3768_s10, %s3769_s13  }
 0x794 PF: > { %p3337_p4 = scmp.ge.s32.totalorder %s3707_s24, 2  ;;  %s3176_s14 = sand.u32 1, %s3695_s21  }
 0x795   : > { %p7063_p7 = scmp.ne.s32.totalorder %s6593_s8, 0  ;;  %s3177_s16 = scalar_lea.sflag [#allocation4], %s3176_s14 }
 0x797   : > { %p3330_p8 = pnand %p3337_p4, %p7063_p7 }
 0x799   : > { %p3331_p11 = pneg %p3330_p8 }
 0x79b   : > { %3690 = dma.done.wait (%p3331_p11), %s3177_s16, 768  }
 0x79c   : > { %3692 = vsyncadd (%p3331_p11), %s3177_s16, 4294966528  ;;  %p18_p0 = scmp.ge.s32.totalorder %s3830_s27, 4   ;;  %s7064_s21 = smov %s3699_s22 }
 0x79d   : > { %s7065_s22 = smov %s3703_s23  ;;  %s7066_s23 = smov %s3841_s30 }
 0x79e   : > { %s7067_s24 = smov %s3830_s27  ;;  %20 = sbr.rel (!%p18_p0) target bundleno = 5 (0x5), region = 90 }
 0x7a3   :  { %3182 = vsyncpa [#allocation3], 1 }
 0x7a4   :  { %3184 = vsyncpa [#allocation3 + $0x1], 1 }
 0x7a5   :  { %3185 = vsyncpa [#allocation6], 1 }
 0x7a6   :  { %3186 = vsyncpa [#allocation4], 1 }
 0x7a7   :  { %3188 = vsyncpa [#allocation4 + $0x1], 1 }

</bundles_post_ra>
